<compile_context>
chip_gen: v7x
topology: tpu7x:2x2x1
jax: 0.10.0
libtpu: 0.0.40
codegen_flags: <defaults>
</compile_context>

<pallas_src>
import functools

import jax
import jax.numpy as jnp
from jax.experimental import pallas as pl
from jax.experimental.pallas import tpu as pltpu

# bf16 MXU operands on every TPU generation (f32 accumulation everywhere).
MXU_DTYPE = jnp.bfloat16


def _vmem():
    return pl.BlockSpec(memory_space=pltpu.MemorySpace.VMEM)


def _round_up(x, m):
    return (x + m - 1) // m * m


# ----------------------------------------------------------------------------
# Fused per-step decoder kernel
# ----------------------------------------------------------------------------
def _build_fused_kernel(n_layers, t_valid, v_valid, mxu_dtype):
    f32 = jnp.float32
    NEG = -1e30  # mask value (exp underflows to exactly 0; avoids inf-inf NaNs)

    def fused_decoder_kernel(*refs):
        (inp_ref,                                   # SMEM (Bp,) int32 [scalar prefetch]
         hidden_ref, enc_ref, proj_e_ref, z_ref,    # VMEM activations
         emb_hbm,                                   # HBM (V, E) embedding table
         awh_ref, ab_ref, av_ref) = refs[:9]        # attention weights
        gru_refs = refs[9:9 + 4 * n_layers]
        ow_ref, ob_ref = refs[9 + 4 * n_layers:11 + 4 * n_layers]
        out_ref, hnew_ref, attn_ref = refs[11 + 4 * n_layers:14 + 4 * n_layers]
        emb_buf, emb_sem = refs[14 + 4 * n_layers:]

        Bp, Tp, H = proj_e_ref.shape
        Vp = ow_ref.shape[1]

        # ---- embedding lookup: per-row DMA gather from HBM; ids on the scalar path ----
        copies = []
        for b in range(Bp):
            cp = pltpu.make_async_copy(emb_hbm.at[pl.ds(inp_ref[b], 1)],
                                       emb_buf.at[pl.ds(b, 1)],
                                       emb_sem.at[b])
            cp.start()
            copies.append(cp)

        # ---- Bahdanau 'concat' attention (overlaps with the gather DMAs) --------------
        # Encoder projection proj_e = enc @ We^T is step-invariant and precomputed outside.
        h_last = hidden_ref[n_layers - 1]                                     # (Bp, H) f32
        proj_h = jnp.dot(h_last.astype(mxu_dtype), awh_ref[...],
                         preferred_element_type=f32) + ab_ref[...]            # (Bp, H) f32
        energy = jnp.tanh(proj_h.reshape(Bp, 1, H) + proj_e_ref[...])         # (Bp,Tp,H) f32
        # Batched MXU contractions (no per-batch Python loops / concats):
        v3 = jnp.broadcast_to(av_ref[...].reshape(1, 1, H), (Bp, 1, H)).astype(mxu_dtype)
        scores = jnp.einsum("bqh,bkh->bqk", v3, energy.astype(mxu_dtype),
                            preferred_element_type=f32)                       # (Bp,1,Tp)
        t_ok = jax.lax.broadcasted_iota(jnp.int32, (Bp, 1, Tp), 2) < t_valid
        scores = jnp.where(t_ok, scores, NEG)
        m = jnp.max(scores, axis=-1, keepdims=True)
        e = jnp.exp(scores - m)
        attn = e * pl.reciprocal(jnp.sum(e, axis=-1, keepdims=True), approx=True)
        attn_ref[...] = attn                                                  # (Bp,1,Tp) f32
        ctx = jnp.einsum("bqk,bkh->bqh", attn.astype(mxu_dtype), enc_ref[...],
                         preferred_element_type=f32).reshape(Bp, H)           # (Bp, H) f32

        # ---- finish the embedding gather -----------------------------------------------
        for cp in copies:
            cp.wait()
        x = emb_buf[...]                                                      # (Bp, E) f32

        # ---- stacked CustomGRU cells: context & z added into the gate pre-activations ---
        cz = jnp.concatenate([ctx, z_ref[...]], axis=-1)                      # (Bp, H+Z)
        for layer in range(n_layers):
            w_xcz, b_xcz, w_h, b_h = gru_refs[4 * layer:4 * layer + 4]
            h_prev = hidden_ref[layer]                                        # (Bp, H)
            # [x | ctx | z] share one fused matmul (biases pre-summed at init);
            # h stays separate because r gates only h's contribution to n.
            g_xcz = jnp.dot(jnp.concatenate([x, cz], axis=-1).astype(mxu_dtype),
                            w_xcz[...], preferred_element_type=f32) + b_xcz[...]   # (Bp,3H)
            g_h = jnp.dot(h_prev.astype(mxu_dtype), w_h[...],
                          preferred_element_type=f32) + b_h[...]                    # (Bp,3H)
            r = jax.nn.sigmoid(g_xcz[:, 0:H] + g_h[:, 0:H])
            u = jax.nn.sigmoid(g_xcz[:, H:2 * H] + g_h[:, H:2 * H])
            n = jnp.tanh(g_xcz[:, 2 * H:3 * H] + r * g_h[:, 2 * H:3 * H])
            h_new = n + u * (h_prev - n)                                      # == (1-u)n + uh
            hnew_ref[layer] = h_new
            x = h_new                                                         # next layer input

        # ---- output projection + masked log_softmax (V padded to a lane-dense width) ---
        logits = jnp.dot(x.astype(mxu_dtype), ow_ref[...],
                         preferred_element_type=f32) + ob_ref[...]            # (Bp, Vp)
        v_ok = jax.lax.broadcasted_iota(jnp.int32, (Bp, Vp), 1) < v_valid
        logits = jnp.where(v_ok, logits, NEG)
        mx = jnp.max(logits, axis=-1, keepdims=True)
        s = logits - mx
        out_ref[...] = s - jnp.log(jnp.sum(jnp.exp(s), axis=-1, keepdims=True))

    return fused_decoder_kernel


# ----------------------------------------------------------------------------
# Wrappers
# ----------------------------------------------------------------------------
def precompute_encoder_projection(params, encoder_outputs):
    """Step-invariant half of the attention: computed ONCE per source sequence and
    reused by every decode step.  Pads B to a sublane multiple and T to a lane-dense
    multiple of 128 (padded positions are masked inside the kernel)."""
    T, B, H = encoder_outputs.shape
    B_pad, T_pad = _round_up(B, 8), _round_up(T, 128)
    enc_bth = jnp.transpose(encoder_outputs, (1, 0, 2))                      # (B, T, H)
    enc_p = jnp.pad(enc_bth, ((0, B_pad - B), (0, T_pad - T), (0, 0)))       # zero pad
    proj_e = jnp.dot(enc_p, params["attn_we_t"])                             # (Bp, Tp, H) f32
    return enc_p.astype(MXU_DTYPE), proj_e


def decoder_step(params, inp, hidden, enc_bf, proj_e, z, t_valid):
    """One fused decode step (single pallas_call)."""
    L, B, H = hidden.shape
    B_pad, T_pad = enc_bf.shape[0], enc_bf.shape[1]
    V, E = params["embeddings"].shape
    V_pad = params["rnn2out_w_t"].shape[1]

    inp_p = jnp.pad(inp.astype(jnp.int32), (0, B_pad - B))          # pad ids with 0 (valid row)
    hid_p = jnp.pad(hidden, ((0, 0), (0, B_pad - B), (0, 0)))
    z_p = jnp.pad(z, ((0, B_pad - B), (0, 0)))

    gru_flat = []
    for p in params["gru"]:
        gru_flat += [p["w_xcz_t"], p["b_xcz"], p["w_h_t"], p["b_h"]]

    # Inputs after the scalar-prefetched ids.  Index 4 (embedding table) stays in HBM.
    inputs = [hid_p, enc_bf, proj_e, z_p, params["embeddings"],
              params["attn_wh_t"], params["attn_b"], params["attn_v"],
              *gru_flat, params["rnn2out_w_t"], params["rnn2out_b"]]
    in_specs = ([_vmem()] * 4 + [pl.BlockSpec(memory_space=pl.ANY)]
                + [_vmem()] * (len(inputs) - 5))

    out_shapes = (jax.ShapeDtypeStruct((B_pad, V_pad), jnp.float32),
                  jax.ShapeDtypeStruct((L, B_pad, H), jnp.float32),
                  jax.ShapeDtypeStruct((B_pad, 1, T_pad), jnp.float32))

    # VMEM limit sized from the actual resident buffers (embedding table excluded: HBM).
    resident = sum(int(a.size) * a.dtype.itemsize for i, a in enumerate(inputs) if i != 4)
    for s in out_shapes:
        n = 1
        for d in s.shape:
            n *= d
        resident += n * jnp.dtype(s.dtype).itemsize
    resident += B_pad * E * 4                                              # gather scratch
    vmem_limit = int(min(64 << 20, max(32 << 20, 2 * resident + (4 << 20))))

    grid_spec = pltpu.PrefetchScalarGridSpec(
        num_scalar_prefetch=1,
        grid=(),
        in_specs=in_specs,
        out_specs=(_vmem(), _vmem(), _vmem()),
        scratch_shapes=[pltpu.VMEM((B_pad, E), jnp.float32),
                        pltpu.SemaphoreType.DMA((B_pad,))])

    out_p, hnew_p, attn_p = pl.pallas_call(
        _build_fused_kernel(L, t_valid, V, MXU_DTYPE),
        out_shape=out_shapes,
        grid_spec=grid_spec,
        compiler_params=pltpu.CompilerParams(vmem_limit_bytes=vmem_limit),
    )(inp_p, *inputs)

    return out_p[:B, :V], hnew_p[:, :B, :], attn_p[:B, :, :t_valid]


def decoder_forward(params, inp, hidden, encoder_outputs, z):
    """CustomAttnDecoderRNN.forward (eval mode): (log_probs, hidden', attn_weights)."""
    T = encoder_outputs.shape[0]
    enc_bf, proj_e = precompute_encoder_projection(params, encoder_outputs)
    return decoder_step(params, inp, hidden, enc_bf, proj_e, z, T)


# ----------------------------------------------------------------------------
# Pure-JAX f32 reference (same math, same master weights) for correctness check.
# ----------------------------------------------------------------------------
def decoder_forward_ref(params, inp, hidden, encoder_outputs, z):
    f32 = jnp.float32
    V = params["embeddings"].shape[0]
    H = hidden.shape[-1]
    emb = params["embeddings"][inp]
    enc_bth = jnp.transpose(encoder_outputs, (1, 0, 2))
    h_last = hidden[-1]
    proj_h = h_last @ params["attn_wh_t"].astype(f32) + params["attn_b"]
    proj_e = enc_bth @ params["attn_we_t"]
    energy = jnp.tanh(proj_h[:, None, :] + proj_e)
    scores = jnp.einsum("bth,h->bt", energy, params["attn_v"].astype(f32)[0])
    attn = jax.nn.softmax(scores, axis=-1)
    ctx = jnp.einsum("bt,bth->bh", attn, enc_bth)
    x, new_h = emb, []
    for layer, p in enumerate(params["gru"]):
        h_prev = hidden[layer]
        g_xcz = jnp.concatenate([x, ctx, z], -1) @ p["w_xcz_t"].astype(f32) + p["b_xcz"]
        g_h = h_prev @ p["w_h_t"].astype(f32) + p["b_h"]
        r = jax.nn.sigmoid(g_xcz[:, :H] + g_h[:, :H])
        u = jax.nn.sigmoid(g_xcz[:, H:2 * H] + g_h[:, H:2 * H])
        n = jnp.tanh(g_xcz[:, 2 * H:] + r * g_h[:, 2 * H:])
        h_new = n + u * (h_prev - n)
        new_h.append(h_new)
        x = h_new
    logits = x @ params["rnn2out_w_t"].astype(f32)[:, :V] + params["rnn2out_b"][:, :V]
    out = jax.nn.log_softmax(logits, axis=-1)
    return out, jnp.stack(new_h), attn[:, None, :]


# ----------------------------------------------------------------------------
# Parameter construction (deterministic, synthetic) — kernel-ready layout:
# pre-transposed (in, out) bf16 matmul weights, fused [x|ctx|z] GRU gate weights,
# pre-summed biases, vocab padded to a lane-dense multiple of 128.
# ----------------------------------------------------------------------------
def init_params(key, vocab_size, emb_dim, hid_dim, z_dim, n_layers, mxu_dtype=MXU_DTYPE):
    ks = iter(jax.random.split(key, 8 * n_layers + 8))
    unif = lambda k, shape, s: jax.random.uniform(k, shape, jnp.float32, -s, s)
    sH = hid_dim ** -0.5
    f32 = jnp.float32
    v_pad = _round_up(vocab_size, 128)

    attn_wh = unif(next(ks), (hid_dim, hid_dim), sH)
    attn_we = unif(next(ks), (hid_dim, hid_dim), sH)
    # rnn2out matches init_weights(): weight U(-0.1, 0.1), bias 0; padded cols are zero.
    w_out = unif(next(ks), (vocab_size, hid_dim), 0.1)
    w_out_t = jnp.zeros((hid_dim, v_pad), f32).at[:, :vocab_size].set(w_out.T)

    params = {
        "embeddings": jax.random.normal(next(ks), (vocab_size, emb_dim), f32),
        "attn_wh_t": attn_wh.T.astype(mxu_dtype),        # hot path (in-kernel)
        "attn_we_t": attn_we.T,                          # once-per-sequence precompute (f32)
        "attn_b": unif(next(ks), (1, hid_dim), sH),
        "attn_v": unif(next(ks), (1, hid_dim), sH).astype(mxu_dtype),
        "rnn2out_w_t": w_out_t.astype(mxu_dtype),        # (H, V_pad)
        "rnn2out_b": jnp.zeros((1, v_pad), f32),
        "gru": [],
    }
    for layer in range(n_layers):
        in_dim = emb_dim if layer == 0 else hid_dim
        wx = unif(next(ks), (3 * hid_dim, in_dim), sH)
        wh = unif(next(ks), (3 * hid_dim, hid_dim), sH)
        wc = unif(next(ks), (3 * hid_dim, hid_dim), sH)
        wz = unif(next(ks), (3 * hid_dim, z_dim), sH)
        bx = unif(next(ks), (1, 3 * hid_dim), sH)
        bh = unif(next(ks), (1, 3 * hid_dim), sH)
        bc = unif(next(ks), (1, 3 * hid_dim), sH)
        bz = unif(next(ks), (1, 3 * hid_dim), sH)
        params["gru"].append({
            "w_xcz_t": jnp.concatenate([wx, wc, wz], axis=1).T.astype(mxu_dtype),
            "b_xcz": bx + bc + bz,
            "w_h_t": wh.T.astype(mxu_dtype),
            "b_h": bh,
        })
    return params


if __name__ == "__main__":
    B, T, E, H, Z, V, L = 2, 8, 32, 32, 16, 50, 2

    key = jax.random.PRNGKey(0)
    k_par, k_inp, k_hid, k_enc, k_z = jax.random.split(key, 5)

    params = init_params(k_par, V, E, H, Z, L)
    inp = jax.random.randint(k_inp, (B,), 0, V, dtype=jnp.int32)
    hidden = 0.1 * jax.random.normal(k_hid, (L, B, H), jnp.float32)
    encoder_outputs = jax.random.normal(k_enc, (T, B, H), jnp.float32)
    z = jax.random.normal(k_z, (B, Z), jnp.float32)

    fwd = jax.jit(functools.partial(decoder_forward, params))
    out, hidden_new, attn_weights = fwd(inp, hidden, encoder_outputs, z)
    jax.block_until_ready((out, hidden_new, attn_weights))

    assert out.shape == (B, V)
    assert hidden_new.shape == (L, B, H)
    assert attn_weights.shape == (B, 1, T)
    assert bool(jnp.all(jnp.isfinite(out)))
    # log_softmax rows exponentiate to probability simplices; attention rows sum to ~1
    # (attention uses the EUP approximate reciprocal, hence the looser tolerance).
    assert jnp.allclose(jnp.exp(out).sum(-1), 1.0, atol=1e-3)
    assert jnp.allclose(attn_weights.sum(-1), 1.0, atol=5e-3)

    # Compare against the f32 reference (kernel uses bf16 MXU operands -> loose atol).
    ref_out, ref_hidden, ref_attn = decoder_forward_ref(params, inp, hidden,
                                                        encoder_outputs, z)
    assert jnp.allclose(out, ref_out, atol=7e-2)
    assert jnp.allclose(hidden_new, ref_hidden, atol=5e-2)
    assert jnp.allclose(attn_weights, ref_attn, atol=5e-2)

    print("KERNEL_OK")
</pallas_src>

<mosaic_0001>
module attributes {stable_mosaic.version = 11 : i64} {
  func.func @fused_decoder_kernel(%arg0: memref<8xi32, #tpu.memory_space<smem>>, %arg1: memref<2x8x32xf32, #tpu.memory_space<vmem>>, %arg2: memref<8x128x32xbf16, #tpu.memory_space<vmem>>, %arg3: memref<8x128x32xf32, #tpu.memory_space<vmem>>, %arg4: memref<8x16xf32, #tpu.memory_space<vmem>>, %arg5: memref<50x32xf32, #tpu.memory_space<any>>, %arg6: memref<32x32xbf16, #tpu.memory_space<vmem>>, %arg7: memref<1x32xf32, #tpu.memory_space<vmem>>, %arg8: memref<1x32xbf16, #tpu.memory_space<vmem>>, %arg9: memref<80x96xbf16, #tpu.memory_space<vmem>>, %arg10: memref<1x96xf32, #tpu.memory_space<vmem>>, %arg11: memref<32x96xbf16, #tpu.memory_space<vmem>>, %arg12: memref<1x96xf32, #tpu.memory_space<vmem>>, %arg13: memref<80x96xbf16, #tpu.memory_space<vmem>>, %arg14: memref<1x96xf32, #tpu.memory_space<vmem>>, %arg15: memref<32x96xbf16, #tpu.memory_space<vmem>>, %arg16: memref<1x96xf32, #tpu.memory_space<vmem>>, %arg17: memref<32x128xbf16, #tpu.memory_space<vmem>>, %arg18: memref<1x128xf32, #tpu.memory_space<vmem>>, %arg19: memref<8x128xf32, #tpu.memory_space<vmem>>, %arg20: memref<2x8x32xf32, #tpu.memory_space<vmem>>, %arg21: memref<8x1x128xf32, #tpu.memory_space<vmem>>, %arg22: memref<8x32xf32, #tpu.memory_space<vmem>>, %arg23: memref<8x!tpu.dma_semaphore, #tpu.memory_space<semaphore_mem>>) attributes {dimension_semantics = [], scalar_prefetch = 1 : i64, scratch_operands = 2 : i64, tpu.core_type = #tpu.core_type<tc>} {
    %c0 = arith.constant 0 : index
    %0 = memref.load %arg0[%c0] : memref<8xi32, #tpu.memory_space<smem>>
    %c0_i32 = arith.constant 0 : i32
    %c0_i32_0 = arith.constant 0 : i32
    %1 = tpu.memref_slice %arg5[%0, %c0_i32_0] : memref<50x32xf32, #tpu.memory_space<any>> -> memref<1x32xf32, #tpu.memory_space<any>>
    %c0_i32_1 = arith.constant 0 : i32
    %c0_i32_2 = arith.constant 0 : i32
    %2 = tpu.memref_slice %arg22[%c0_i32_1, %c0_i32_2] : memref<8x32xf32, #tpu.memory_space<vmem>> -> memref<1x32xf32, #tpu.memory_space<vmem>>
    %3 = tpu.memref_slice %arg23[%c0_i32] : memref<8x!tpu.dma_semaphore, #tpu.memory_space<semaphore_mem>> -> memref<1x!tpu.dma_semaphore, #tpu.memory_space<semaphore_mem>>
    %4 = tpu.memref_squeeze %3 : memref<1x!tpu.dma_semaphore, #tpu.memory_space<semaphore_mem>> -> memref<!tpu.dma_semaphore, #tpu.memory_space<semaphore_mem>>
    tpu.enqueue_dma source(%1 : memref<1x32xf32, #tpu.memory_space<any>>) target(%2 : memref<1x32xf32, #tpu.memory_space<vmem>>) target_semaphore(%4 : memref<!tpu.dma_semaphore, #tpu.memory_space<semaphore_mem>>)
    %c1 = arith.constant 1 : index
    %5 = memref.load %arg0[%c1] : memref<8xi32, #tpu.memory_space<smem>>
    %c1_i32 = arith.constant 1 : i32
    %c0_i32_3 = arith.constant 0 : i32
    %6 = tpu.memref_slice %arg5[%5, %c0_i32_3] : memref<50x32xf32, #tpu.memory_space<any>> -> memref<1x32xf32, #tpu.memory_space<any>>
    %c1_i32_4 = arith.constant 1 : i32
    %c0_i32_5 = arith.constant 0 : i32
    %7 = tpu.memref_slice %arg22[%c1_i32_4, %c0_i32_5] : memref<8x32xf32, #tpu.memory_space<vmem>> -> memref<1x32xf32, #tpu.memory_space<vmem>>
    %8 = tpu.memref_slice %arg23[%c1_i32] : memref<8x!tpu.dma_semaphore, #tpu.memory_space<semaphore_mem>> -> memref<1x!tpu.dma_semaphore, #tpu.memory_space<semaphore_mem>>
    %9 = tpu.memref_squeeze %8 : memref<1x!tpu.dma_semaphore, #tpu.memory_space<semaphore_mem>> -> memref<!tpu.dma_semaphore, #tpu.memory_space<semaphore_mem>>
    tpu.enqueue_dma source(%6 : memref<1x32xf32, #tpu.memory_space<any>>) target(%7 : memref<1x32xf32, #tpu.memory_space<vmem>>) target_semaphore(%9 : memref<!tpu.dma_semaphore, #tpu.memory_space<semaphore_mem>>)
    %c2 = arith.constant 2 : index
    %10 = memref.load %arg0[%c2] : memref<8xi32, #tpu.memory_space<smem>>
    %c2_i32 = arith.constant 2 : i32
    %c0_i32_6 = arith.constant 0 : i32
    %11 = tpu.memref_slice %arg5[%10, %c0_i32_6] : memref<50x32xf32, #tpu.memory_space<any>> -> memref<1x32xf32, #tpu.memory_space<any>>
    %c2_i32_7 = arith.constant 2 : i32
    %c0_i32_8 = arith.constant 0 : i32
    %12 = tpu.memref_slice %arg22[%c2_i32_7, %c0_i32_8] : memref<8x32xf32, #tpu.memory_space<vmem>> -> memref<1x32xf32, #tpu.memory_space<vmem>>
    %13 = tpu.memref_slice %arg23[%c2_i32] : memref<8x!tpu.dma_semaphore, #tpu.memory_space<semaphore_mem>> -> memref<1x!tpu.dma_semaphore, #tpu.memory_space<semaphore_mem>>
    %14 = tpu.memref_squeeze %13 : memref<1x!tpu.dma_semaphore, #tpu.memory_space<semaphore_mem>> -> memref<!tpu.dma_semaphore, #tpu.memory_space<semaphore_mem>>
    tpu.enqueue_dma source(%11 : memref<1x32xf32, #tpu.memory_space<any>>) target(%12 : memref<1x32xf32, #tpu.memory_space<vmem>>) target_semaphore(%14 : memref<!tpu.dma_semaphore, #tpu.memory_space<semaphore_mem>>)
    %c3 = arith.constant 3 : index
    %15 = memref.load %arg0[%c3] : memref<8xi32, #tpu.memory_space<smem>>
    %c3_i32 = arith.constant 3 : i32
    %c0_i32_9 = arith.constant 0 : i32
    %16 = tpu.memref_slice %arg5[%15, %c0_i32_9] : memref<50x32xf32, #tpu.memory_space<any>> -> memref<1x32xf32, #tpu.memory_space<any>>
    %c3_i32_10 = arith.constant 3 : i32
    %c0_i32_11 = arith.constant 0 : i32
    %17 = tpu.memref_slice %arg22[%c3_i32_10, %c0_i32_11] : memref<8x32xf32, #tpu.memory_space<vmem>> -> memref<1x32xf32, #tpu.memory_space<vmem>>
    %18 = tpu.memref_slice %arg23[%c3_i32] : memref<8x!tpu.dma_semaphore, #tpu.memory_space<semaphore_mem>> -> memref<1x!tpu.dma_semaphore, #tpu.memory_space<semaphore_mem>>
    %19 = tpu.memref_squeeze %18 : memref<1x!tpu.dma_semaphore, #tpu.memory_space<semaphore_mem>> -> memref<!tpu.dma_semaphore, #tpu.memory_space<semaphore_mem>>
    tpu.enqueue_dma source(%16 : memref<1x32xf32, #tpu.memory_space<any>>) target(%17 : memref<1x32xf32, #tpu.memory_space<vmem>>) target_semaphore(%19 : memref<!tpu.dma_semaphore, #tpu.memory_space<semaphore_mem>>)
    %c4 = arith.constant 4 : index
    %20 = memref.load %arg0[%c4] : memref<8xi32, #tpu.memory_space<smem>>
    %c4_i32 = arith.constant 4 : i32
    %c0_i32_12 = arith.constant 0 : i32
    %21 = tpu.memref_slice %arg5[%20, %c0_i32_12] : memref<50x32xf32, #tpu.memory_space<any>> -> memref<1x32xf32, #tpu.memory_space<any>>
    %c4_i32_13 = arith.constant 4 : i32
    %c0_i32_14 = arith.constant 0 : i32
    %22 = tpu.memref_slice %arg22[%c4_i32_13, %c0_i32_14] : memref<8x32xf32, #tpu.memory_space<vmem>> -> memref<1x32xf32, #tpu.memory_space<vmem>>
    %23 = tpu.memref_slice %arg23[%c4_i32] : memref<8x!tpu.dma_semaphore, #tpu.memory_space<semaphore_mem>> -> memref<1x!tpu.dma_semaphore, #tpu.memory_space<semaphore_mem>>
    %24 = tpu.memref_squeeze %23 : memref<1x!tpu.dma_semaphore, #tpu.memory_space<semaphore_mem>> -> memref<!tpu.dma_semaphore, #tpu.memory_space<semaphore_mem>>
    tpu.enqueue_dma source(%21 : memref<1x32xf32, #tpu.memory_space<any>>) target(%22 : memref<1x32xf32, #tpu.memory_space<vmem>>) target_semaphore(%24 : memref<!tpu.dma_semaphore, #tpu.memory_space<semaphore_mem>>)
    %c5 = arith.constant 5 : index
    %25 = memref.load %arg0[%c5] : memref<8xi32, #tpu.memory_space<smem>>
    %c5_i32 = arith.constant 5 : i32
    %c0_i32_15 = arith.constant 0 : i32
    %26 = tpu.memref_slice %arg5[%25, %c0_i32_15] : memref<50x32xf32, #tpu.memory_space<any>> -> memref<1x32xf32, #tpu.memory_space<any>>
    %c5_i32_16 = arith.constant 5 : i32
    %c0_i32_17 = arith.constant 0 : i32
    %27 = tpu.memref_slice %arg22[%c5_i32_16, %c0_i32_17] : memref<8x32xf32, #tpu.memory_space<vmem>> -> memref<1x32xf32, #tpu.memory_space<vmem>>
    %28 = tpu.memref_slice %arg23[%c5_i32] : memref<8x!tpu.dma_semaphore, #tpu.memory_space<semaphore_mem>> -> memref<1x!tpu.dma_semaphore, #tpu.memory_space<semaphore_mem>>
    %29 = tpu.memref_squeeze %28 : memref<1x!tpu.dma_semaphore, #tpu.memory_space<semaphore_mem>> -> memref<!tpu.dma_semaphore, #tpu.memory_space<semaphore_mem>>
    tpu.enqueue_dma source(%26 : memref<1x32xf32, #tpu.memory_space<any>>) target(%27 : memref<1x32xf32, #tpu.memory_space<vmem>>) target_semaphore(%29 : memref<!tpu.dma_semaphore, #tpu.memory_space<semaphore_mem>>)
    %c6 = arith.constant 6 : index
    %30 = memref.load %arg0[%c6] : memref<8xi32, #tpu.memory_space<smem>>
    %c6_i32 = arith.constant 6 : i32
    %c0_i32_18 = arith.constant 0 : i32
    %31 = tpu.memref_slice %arg5[%30, %c0_i32_18] : memref<50x32xf32, #tpu.memory_space<any>> -> memref<1x32xf32, #tpu.memory_space<any>>
    %c6_i32_19 = arith.constant 6 : i32
    %c0_i32_20 = arith.constant 0 : i32
    %32 = tpu.memref_slice %arg22[%c6_i32_19, %c0_i32_20] : memref<8x32xf32, #tpu.memory_space<vmem>> -> memref<1x32xf32, #tpu.memory_space<vmem>>
    %33 = tpu.memref_slice %arg23[%c6_i32] : memref<8x!tpu.dma_semaphore, #tpu.memory_space<semaphore_mem>> -> memref<1x!tpu.dma_semaphore, #tpu.memory_space<semaphore_mem>>
    %34 = tpu.memref_squeeze %33 : memref<1x!tpu.dma_semaphore, #tpu.memory_space<semaphore_mem>> -> memref<!tpu.dma_semaphore, #tpu.memory_space<semaphore_mem>>
    tpu.enqueue_dma source(%31 : memref<1x32xf32, #tpu.memory_space<any>>) target(%32 : memref<1x32xf32, #tpu.memory_space<vmem>>) target_semaphore(%34 : memref<!tpu.dma_semaphore, #tpu.memory_space<semaphore_mem>>)
    %c7 = arith.constant 7 : index
    %35 = memref.load %arg0[%c7] : memref<8xi32, #tpu.memory_space<smem>>
    %c7_i32 = arith.constant 7 : i32
    %c0_i32_21 = arith.constant 0 : i32
    %36 = tpu.memref_slice %arg5[%35, %c0_i32_21] : memref<50x32xf32, #tpu.memory_space<any>> -> memref<1x32xf32, #tpu.memory_space<any>>
    %c7_i32_22 = arith.constant 7 : i32
    %c0_i32_23 = arith.constant 0 : i32
    %37 = tpu.memref_slice %arg22[%c7_i32_22, %c0_i32_23] : memref<8x32xf32, #tpu.memory_space<vmem>> -> memref<1x32xf32, #tpu.memory_space<vmem>>
    %38 = tpu.memref_slice %arg23[%c7_i32] : memref<8x!tpu.dma_semaphore, #tpu.memory_space<semaphore_mem>> -> memref<1x!tpu.dma_semaphore, #tpu.memory_space<semaphore_mem>>
    %39 = tpu.memref_squeeze %38 : memref<1x!tpu.dma_semaphore, #tpu.memory_space<semaphore_mem>> -> memref<!tpu.dma_semaphore, #tpu.memory_space<semaphore_mem>>
    tpu.enqueue_dma source(%36 : memref<1x32xf32, #tpu.memory_space<any>>) target(%37 : memref<1x32xf32, #tpu.memory_space<vmem>>) target_semaphore(%39 : memref<!tpu.dma_semaphore, #tpu.memory_space<semaphore_mem>>)
    %c1_24 = arith.constant 1 : index
    %c0_25 = arith.constant 0 : index
    %c0_26 = arith.constant 0 : index
    %40 = vector.load %arg1[%c1_24, %c0_25, %c0_26] : memref<2x8x32xf32, #tpu.memory_space<vmem>>, vector<1x8x32xf32>
    %41 = vector.shape_cast %40 : vector<1x8x32xf32> to vector<8x32xf32>
    %42 = arith.truncf %41 : vector<8x32xf32> to vector<8x32xbf16>
    %c0_27 = arith.constant 0 : index
    %c0_28 = arith.constant 0 : index
    %43 = vector.load %arg6[%c0_27, %c0_28] : memref<32x32xbf16, #tpu.memory_space<vmem>>, vector<32x32xbf16>
    %cst = arith.constant dense<0.000000e+00> : vector<8x32xf32>
    %44 = tpu.matmul %42, %43, %cst {dimension_numbers = #tpu.dot_dimension_numbers<[1], [0], [0], [1], [0, 0, 1, 1], [], []>} : vector<8x32xbf16>, vector<32x32xbf16>, vector<8x32xf32> -> vector<8x32xf32>
    %c0_29 = arith.constant 0 : index
    %c0_30 = arith.constant 0 : index
    %45 = vector.load %arg7[%c0_29, %c0_30] : memref<1x32xf32, #tpu.memory_space<vmem>>, vector<1x32xf32>
    %46 = vector.broadcast %45 : vector<1x32xf32> to vector<8x32xf32>
    %47 = arith.addf %44, %46 : vector<8x32xf32>
    %48 = vector.shape_cast %47 : vector<8x32xf32> to vector<8x1x32xf32>
    %c0_31 = arith.constant 0 : index
    %c0_32 = arith.constant 0 : index
    %c0_33 = arith.constant 0 : index
    %49 = vector.load %arg3[%c0_31, %c0_32, %c0_33] : memref<8x128x32xf32, #tpu.memory_space<vmem>>, vector<8x128x32xf32>
    %50 = vector.broadcast %48 : vector<8x1x32xf32> to vector<8x128x32xf32>
    %51 = arith.addf %50, %49 : vector<8x128x32xf32>
    %52 = math.tanh %51 : vector<8x128x32xf32>
    %c0_34 = arith.constant 0 : index
    %c0_35 = arith.constant 0 : index
    %53 = vector.load %arg8[%c0_34, %c0_35] : memref<1x32xbf16, #tpu.memory_space<vmem>>, vector<1x32xbf16>
    %54 = vector.shape_cast %53 : vector<1x32xbf16> to vector<1x1x32xbf16>
    %55 = vector.shape_cast %54 : vector<1x1x32xbf16> to vector<1x1x32xbf16>
    %56 = vector.broadcast %55 : vector<1x1x32xbf16> to vector<8x1x32xbf16>
    %57 = arith.truncf %52 : vector<8x128x32xf32> to vector<8x128x32xbf16>
    "tpu.trace_start"() <{level = 10 : i32, message = "bqh,bkh->bqk"}> : () -> ()
    %cst_36 = arith.constant dense<0.000000e+00> : vector<8x1x128xf32>
    %58 = tpu.matmul %56, %57, %cst_36 {dimension_numbers = #tpu.dot_dimension_numbers<[2], [2], [1], [1], [0, 0, 0, 1, 1, 1], [0], [0]>} : vector<8x1x32xbf16>, vector<8x128x32xbf16>, vector<8x1x128xf32> -> vector<8x1x128xf32>
    "tpu.trace_stop"() : () -> ()
    %59 = tpu.iota {dimensions = array<i32: 2>} : vector<8x1x128xi32>
    %c8_i32 = arith.constant 8 : i32
    %60 = vector.broadcast %c8_i32 : i32 to vector<8x1x128xi32>
    %61 = arith.cmpi slt, %59, %60 : vector<8x1x128xi32>
    %cst_37 = arith.constant -1.000000e+30 : f32
    %62 = vector.broadcast %cst_37 : f32 to vector<8x1x128xf32>
    %63 = arith.select %61, %58, %62 : vector<8x1x128xi1>, vector<8x1x128xf32>
    %cst_38 = arith.constant dense<0xFF800000> : vector<8x1xf32>
    %64 = vector.multi_reduction <maximumf>, %63, %cst_38 [2] : vector<8x1x128xf32> to vector<8x1xf32>
    %65 = vector.shape_cast %64 : vector<8x1xf32> to vector<8x1x1xf32>
    %66 = vector.broadcast %65 : vector<8x1x1xf32> to vector<8x1x128xf32>
    %67 = arith.subf %63, %66 : vector<8x1x128xf32>
    %68 = math.exp %67 : vector<8x1x128xf32>
    %cst_39 = arith.constant dense<0.000000e+00> : vector<8x1xf32>
    %69 = vector.multi_reduction <add>, %68, %cst_39 [2] : vector<8x1x128xf32> to vector<8x1xf32>
    %70 = vector.shape_cast %69 : vector<8x1xf32> to vector<8x1x1xf32>
    %71 = tpu.reciprocal %70 {approx = true} : vector<8x1x1xf32> -> vector<8x1x1xf32>
    %72 = vector.broadcast %71 : vector<8x1x1xf32> to vector<8x1x128xf32>
    %73 = arith.mulf %68, %72 : vector<8x1x128xf32>
    %c0_40 = arith.constant 0 : index
    %c0_41 = arith.constant 0 : index
    %c0_42 = arith.constant 0 : index
    %74 = vector.load %arg21[%c0_40, %c0_41, %c0_42] : memref<8x1x128xf32, #tpu.memory_space<vmem>>, vector<8x1x128xf32>
    tpu.vector_store %arg21[%c0_40, %c0_41, %c0_42], %73 {strides = array<i32>} : memref<8x1x128xf32, #tpu.memory_space<vmem>>, vector<8x1x128xf32>,
    %75 = arith.truncf %73 : vector<8x1x128xf32> to vector<8x1x128xbf16>
    %c0_43 = arith.constant 0 : index
    %c0_44 = arith.constant 0 : index
    %c0_45 = arith.constant 0 : index
    %76 = vector.load %arg2[%c0_43, %c0_44, %c0_45] : memref<8x128x32xbf16, #tpu.memory_space<vmem>>, vector<8x128x32xbf16>
    "tpu.trace_start"() <{level = 10 : i32, message = "bqk,bkh->bqh"}> : () -> ()
    %cst_46 = arith.constant dense<0.000000e+00> : vector<8x1x32xf32>
    %77 = tpu.matmul %75, %76, %cst_46 {dimension_numbers = #tpu.dot_dimension_numbers<[2], [1], [1], [2], [0, 0, 0, 1, 1, 2], [0], [0]>} : vector<8x1x128xbf16>, vector<8x128x32xbf16>, vector<8x1x32xf32> -> vector<8x1x32xf32>
    "tpu.trace_stop"() : () -> ()
    %78 = vector.shape_cast %77 : vector<8x1x32xf32> to vector<8x32xf32>
    %c0_i32_47 = arith.constant 0 : i32
    %c0_i32_48 = arith.constant 0 : i32
    %79 = tpu.memref_slice %arg5[%0, %c0_i32_48] : memref<50x32xf32, #tpu.memory_space<any>> -> memref<1x32xf32, #tpu.memory_space<any>>
    %c0_i32_49 = arith.constant 0 : i32
    %c0_i32_50 = arith.constant 0 : i32
    %80 = tpu.memref_slice %arg22[%c0_i32_49, %c0_i32_50] : memref<8x32xf32, #tpu.memory_space<vmem>> -> memref<1x32xf32, #tpu.memory_space<vmem>>
    %81 = tpu.memref_slice %arg23[%c0_i32_47] : memref<8x!tpu.dma_semaphore, #tpu.memory_space<semaphore_mem>> -> memref<1x!tpu.dma_semaphore, #tpu.memory_space<semaphore_mem>>
    %82 = tpu.memref_squeeze %81 : memref<1x!tpu.dma_semaphore, #tpu.memory_space<semaphore_mem>> -> memref<!tpu.dma_semaphore, #tpu.memory_space<semaphore_mem>>
    tpu.wait_dma2 semaphore(%82 : memref<!tpu.dma_semaphore, #tpu.memory_space<semaphore_mem>>) src(%79 : memref<1x32xf32, #tpu.memory_space<any>>) dst(%80 : memref<1x32xf32, #tpu.memory_space<vmem>>)
    %c1_i32_51 = arith.constant 1 : i32
    %c0_i32_52 = arith.constant 0 : i32
    %83 = tpu.memref_slice %arg5[%5, %c0_i32_52] : memref<50x32xf32, #tpu.memory_space<any>> -> memref<1x32xf32, #tpu.memory_space<any>>
    %c1_i32_53 = arith.constant 1 : i32
    %c0_i32_54 = arith.constant 0 : i32
    %84 = tpu.memref_slice %arg22[%c1_i32_53, %c0_i32_54] : memref<8x32xf32, #tpu.memory_space<vmem>> -> memref<1x32xf32, #tpu.memory_space<vmem>>
    %85 = tpu.memref_slice %arg23[%c1_i32_51] : memref<8x!tpu.dma_semaphore, #tpu.memory_space<semaphore_mem>> -> memref<1x!tpu.dma_semaphore, #tpu.memory_space<semaphore_mem>>
    %86 = tpu.memref_squeeze %85 : memref<1x!tpu.dma_semaphore, #tpu.memory_space<semaphore_mem>> -> memref<!tpu.dma_semaphore, #tpu.memory_space<semaphore_mem>>
    tpu.wait_dma2 semaphore(%86 : memref<!tpu.dma_semaphore, #tpu.memory_space<semaphore_mem>>) src(%83 : memref<1x32xf32, #tpu.memory_space<any>>) dst(%84 : memref<1x32xf32, #tpu.memory_space<vmem>>)
    %c2_i32_55 = arith.constant 2 : i32
    %c0_i32_56 = arith.constant 0 : i32
    %87 = tpu.memref_slice %arg5[%10, %c0_i32_56] : memref<50x32xf32, #tpu.memory_space<any>> -> memref<1x32xf32, #tpu.memory_space<any>>
    %c2_i32_57 = arith.constant 2 : i32
    %c0_i32_58 = arith.constant 0 : i32
    %88 = tpu.memref_slice %arg22[%c2_i32_57, %c0_i32_58] : memref<8x32xf32, #tpu.memory_space<vmem>> -> memref<1x32xf32, #tpu.memory_space<vmem>>
    %89 = tpu.memref_slice %arg23[%c2_i32_55] : memref<8x!tpu.dma_semaphore, #tpu.memory_space<semaphore_mem>> -> memref<1x!tpu.dma_semaphore, #tpu.memory_space<semaphore_mem>>
    %90 = tpu.memref_squeeze %89 : memref<1x!tpu.dma_semaphore, #tpu.memory_space<semaphore_mem>> -> memref<!tpu.dma_semaphore, #tpu.memory_space<semaphore_mem>>
    tpu.wait_dma2 semaphore(%90 : memref<!tpu.dma_semaphore, #tpu.memory_space<semaphore_mem>>) src(%87 : memref<1x32xf32, #tpu.memory_space<any>>) dst(%88 : memref<1x32xf32, #tpu.memory_space<vmem>>)
    %c3_i32_59 = arith.constant 3 : i32
    %c0_i32_60 = arith.constant 0 : i32
    %91 = tpu.memref_slice %arg5[%15, %c0_i32_60] : memref<50x32xf32, #tpu.memory_space<any>> -> memref<1x32xf32, #tpu.memory_space<any>>
    %c3_i32_61 = arith.constant 3 : i32
    %c0_i32_62 = arith.constant 0 : i32
    %92 = tpu.memref_slice %arg22[%c3_i32_61, %c0_i32_62] : memref<8x32xf32, #tpu.memory_space<vmem>> -> memref<1x32xf32, #tpu.memory_space<vmem>>
    %93 = tpu.memref_slice %arg23[%c3_i32_59] : memref<8x!tpu.dma_semaphore, #tpu.memory_space<semaphore_mem>> -> memref<1x!tpu.dma_semaphore, #tpu.memory_space<semaphore_mem>>
    %94 = tpu.memref_squeeze %93 : memref<1x!tpu.dma_semaphore, #tpu.memory_space<semaphore_mem>> -> memref<!tpu.dma_semaphore, #tpu.memory_space<semaphore_mem>>
    tpu.wait_dma2 semaphore(%94 : memref<!tpu.dma_semaphore, #tpu.memory_space<semaphore_mem>>) src(%91 : memref<1x32xf32, #tpu.memory_space<any>>) dst(%92 : memref<1x32xf32, #tpu.memory_space<vmem>>)
    %c4_i32_63 = arith.constant 4 : i32
    %c0_i32_64 = arith.constant 0 : i32
    %95 = tpu.memref_slice %arg5[%20, %c0_i32_64] : memref<50x32xf32, #tpu.memory_space<any>> -> memref<1x32xf32, #tpu.memory_space<any>>
    %c4_i32_65 = arith.constant 4 : i32
    %c0_i32_66 = arith.constant 0 : i32
    %96 = tpu.memref_slice %arg22[%c4_i32_65, %c0_i32_66] : memref<8x32xf32, #tpu.memory_space<vmem>> -> memref<1x32xf32, #tpu.memory_space<vmem>>
    %97 = tpu.memref_slice %arg23[%c4_i32_63] : memref<8x!tpu.dma_semaphore, #tpu.memory_space<semaphore_mem>> -> memref<1x!tpu.dma_semaphore, #tpu.memory_space<semaphore_mem>>
    %98 = tpu.memref_squeeze %97 : memref<1x!tpu.dma_semaphore, #tpu.memory_space<semaphore_mem>> -> memref<!tpu.dma_semaphore, #tpu.memory_space<semaphore_mem>>
    tpu.wait_dma2 semaphore(%98 : memref<!tpu.dma_semaphore, #tpu.memory_space<semaphore_mem>>) src(%95 : memref<1x32xf32, #tpu.memory_space<any>>) dst(%96 : memref<1x32xf32, #tpu.memory_space<vmem>>)
    %c5_i32_67 = arith.constant 5 : i32
    %c0_i32_68 = arith.constant 0 : i32
    %99 = tpu.memref_slice %arg5[%25, %c0_i32_68] : memref<50x32xf32, #tpu.memory_space<any>> -> memref<1x32xf32, #tpu.memory_space<any>>
    %c5_i32_69 = arith.constant 5 : i32
    %c0_i32_70 = arith.constant 0 : i32
    %100 = tpu.memref_slice %arg22[%c5_i32_69, %c0_i32_70] : memref<8x32xf32, #tpu.memory_space<vmem>> -> memref<1x32xf32, #tpu.memory_space<vmem>>
    %101 = tpu.memref_slice %arg23[%c5_i32_67] : memref<8x!tpu.dma_semaphore, #tpu.memory_space<semaphore_mem>> -> memref<1x!tpu.dma_semaphore, #tpu.memory_space<semaphore_mem>>
    %102 = tpu.memref_squeeze %101 : memref<1x!tpu.dma_semaphore, #tpu.memory_space<semaphore_mem>> -> memref<!tpu.dma_semaphore, #tpu.memory_space<semaphore_mem>>
    tpu.wait_dma2 semaphore(%102 : memref<!tpu.dma_semaphore, #tpu.memory_space<semaphore_mem>>) src(%99 : memref<1x32xf32, #tpu.memory_space<any>>) dst(%100 : memref<1x32xf32, #tpu.memory_space<vmem>>)
    %c6_i32_71 = arith.constant 6 : i32
    %c0_i32_72 = arith.constant 0 : i32
    %103 = tpu.memref_slice %arg5[%30, %c0_i32_72] : memref<50x32xf32, #tpu.memory_space<any>> -> memref<1x32xf32, #tpu.memory_space<any>>
    %c6_i32_73 = arith.constant 6 : i32
    %c0_i32_74 = arith.constant 0 : i32
    %104 = tpu.memref_slice %arg22[%c6_i32_73, %c0_i32_74] : memref<8x32xf32, #tpu.memory_space<vmem>> -> memref<1x32xf32, #tpu.memory_space<vmem>>
    %105 = tpu.memref_slice %arg23[%c6_i32_71] : memref<8x!tpu.dma_semaphore, #tpu.memory_space<semaphore_mem>> -> memref<1x!tpu.dma_semaphore, #tpu.memory_space<semaphore_mem>>
    %106 = tpu.memref_squeeze %105 : memref<1x!tpu.dma_semaphore, #tpu.memory_space<semaphore_mem>> -> memref<!tpu.dma_semaphore, #tpu.memory_space<semaphore_mem>>
    tpu.wait_dma2 semaphore(%106 : memref<!tpu.dma_semaphore, #tpu.memory_space<semaphore_mem>>) src(%103 : memref<1x32xf32, #tpu.memory_space<any>>) dst(%104 : memref<1x32xf32, #tpu.memory_space<vmem>>)
    %c7_i32_75 = arith.constant 7 : i32
    %c0_i32_76 = arith.constant 0 : i32
    %107 = tpu.memref_slice %arg5[%35, %c0_i32_76] : memref<50x32xf32, #tpu.memory_space<any>> -> memref<1x32xf32, #tpu.memory_space<any>>
    %c7_i32_77 = arith.constant 7 : i32
    %c0_i32_78 = arith.constant 0 : i32
    %108 = tpu.memref_slice %arg22[%c7_i32_77, %c0_i32_78] : memref<8x32xf32, #tpu.memory_space<vmem>> -> memref<1x32xf32, #tpu.memory_space<vmem>>
    %109 = tpu.memref_slice %arg23[%c7_i32_75] : memref<8x!tpu.dma_semaphore, #tpu.memory_space<semaphore_mem>> -> memref<1x!tpu.dma_semaphore, #tpu.memory_space<semaphore_mem>>
    %110 = tpu.memref_squeeze %109 : memref<1x!tpu.dma_semaphore, #tpu.memory_space<semaphore_mem>> -> memref<!tpu.dma_semaphore, #tpu.memory_space<semaphore_mem>>
    tpu.wait_dma2 semaphore(%110 : memref<!tpu.dma_semaphore, #tpu.memory_space<semaphore_mem>>) src(%107 : memref<1x32xf32, #tpu.memory_space<any>>) dst(%108 : memref<1x32xf32, #tpu.memory_space<vmem>>)
    %c0_79 = arith.constant 0 : index
    %c0_80 = arith.constant 0 : index
    %111 = vector.load %arg22[%c0_79, %c0_80] : memref<8x32xf32, #tpu.memory_space<vmem>>, vector<8x32xf32>
    %c0_81 = arith.constant 0 : index
    %c0_82 = arith.constant 0 : index
    %112 = vector.load %arg4[%c0_81, %c0_82] : memref<8x16xf32, #tpu.memory_space<vmem>>, vector<8x16xf32>
    %113 = tpu.concatenate %78, %112 in 1 : vector<8x32xf32>, vector<8x16xf32> -> vector<8x48xf32>
    %c0_83 = arith.constant 0 : index
    %c0_84 = arith.constant 0 : index
    %c0_85 = arith.constant 0 : index
    %114 = vector.load %arg1[%c0_83, %c0_84, %c0_85] : memref<2x8x32xf32, #tpu.memory_space<vmem>>, vector<1x8x32xf32>
    %115 = vector.shape_cast %114 : vector<1x8x32xf32> to vector<8x32xf32>
    %116 = tpu.concatenate %111, %113 in 1 : vector<8x32xf32>, vector<8x48xf32> -> vector<8x80xf32>
    %117 = arith.truncf %116 : vector<8x80xf32> to vector<8x80xbf16>
    %c0_86 = arith.constant 0 : index
    %c0_87 = arith.constant 0 : index
    %118 = vector.load %arg9[%c0_86, %c0_87] : memref<80x96xbf16, #tpu.memory_space<vmem>>, vector<80x96xbf16>
    %cst_88 = arith.constant dense<0.000000e+00> : vector<8x96xf32>
    %119 = tpu.matmul %117, %118, %cst_88 {dimension_numbers = #tpu.dot_dimension_numbers<[1], [0], [0], [1], [0, 0, 1, 1], [], []>} : vector<8x80xbf16>, vector<80x96xbf16>, vector<8x96xf32> -> vector<8x96xf32>
    %c0_89 = arith.constant 0 : index
    %c0_90 = arith.constant 0 : index
    %120 = vector.load %arg10[%c0_89, %c0_90] : memref<1x96xf32, #tpu.memory_space<vmem>>, vector<1x96xf32>
    %121 = vector.broadcast %120 : vector<1x96xf32> to vector<8x96xf32>
    %122 = arith.addf %119, %121 : vector<8x96xf32>
    %123 = arith.truncf %115 : vector<8x32xf32> to vector<8x32xbf16>
    %c0_91 = arith.constant 0 : index
    %c0_92 = arith.constant 0 : index
    %124 = vector.load %arg11[%c0_91, %c0_92] : memref<32x96xbf16, #tpu.memory_space<vmem>>, vector<32x96xbf16>
    %cst_93 = arith.constant dense<0.000000e+00> : vector<8x96xf32>
    %125 = tpu.matmul %123, %124, %cst_93 {dimension_numbers = #tpu.dot_dimension_numbers<[1], [0], [0], [1], [0, 0, 1, 1], [], []>} : vector<8x32xbf16>, vector<32x96xbf16>, vector<8x96xf32> -> vector<8x96xf32>
    %c0_94 = arith.constant 0 : index
    %c0_95 = arith.constant 0 : index
    %126 = vector.load %arg12[%c0_94, %c0_95] : memref<1x96xf32, #tpu.memory_space<vmem>>, vector<1x96xf32>
    %127 = vector.broadcast %126 : vector<1x96xf32> to vector<8x96xf32>
    %128 = arith.addf %125, %127 : vector<8x96xf32>
    %129 = vector.extract_strided_slice %122 {offsets = [0, 0], sizes = [8, 32], strides = [1, 1]} : vector<8x96xf32> to vector<8x32xf32>
    %130 = vector.extract_strided_slice %128 {offsets = [0, 0], sizes = [8, 32], strides = [1, 1]} : vector<8x96xf32> to vector<8x32xf32>
    %131 = arith.addf %129, %130 : vector<8x32xf32>
    %132 = arith.negf %131 : vector<8x32xf32>
    %133 = math.exp %132 : vector<8x32xf32>
    %cst_96 = arith.constant 1.000000e+00 : f32
    %134 = vector.broadcast %cst_96 : f32 to vector<8x32xf32>
    %135 = arith.addf %134, %133 : vector<8x32xf32>
    %136 = arith.divf %134, %135 : vector<8x32xf32>
    %137 = vector.extract_strided_slice %122 {offsets = [0, 32], sizes = [8, 32], strides = [1, 1]} : vector<8x96xf32> to vector<8x32xf32>
    %138 = vector.extract_strided_slice %128 {offsets = [0, 32], sizes = [8, 32], strides = [1, 1]} : vector<8x96xf32> to vector<8x32xf32>
    %139 = arith.addf %137, %138 : vector<8x32xf32>
    %140 = arith.negf %139 : vector<8x32xf32>
    %141 = math.exp %140 : vector<8x32xf32>
    %cst_97 = arith.constant 1.000000e+00 : f32
    %142 = vector.broadcast %cst_97 : f32 to vector<8x32xf32>
    %143 = arith.addf %142, %141 : vector<8x32xf32>
    %144 = arith.divf %142, %143 : vector<8x32xf32>
    %145 = vector.extract_strided_slice %122 {offsets = [0, 64], sizes = [8, 32], strides = [1, 1]} : vector<8x96xf32> to vector<8x32xf32>
    %146 = vector.extract_strided_slice %128 {offsets = [0, 64], sizes = [8, 32], strides = [1, 1]} : vector<8x96xf32> to vector<8x32xf32>
    %147 = arith.mulf %136, %146 : vector<8x32xf32>
    %148 = arith.addf %145, %147 : vector<8x32xf32>
    %149 = math.tanh %148 : vector<8x32xf32>
    %150 = arith.subf %115, %149 : vector<8x32xf32>
    %151 = arith.mulf %144, %150 : vector<8x32xf32>
    %152 = arith.addf %149, %151 : vector<8x32xf32>
    %c0_98 = arith.constant 0 : index
    %c0_99 = arith.constant 0 : index
    %c0_100 = arith.constant 0 : index
    %153 = vector.load %arg20[%c0_98, %c0_99, %c0_100] : memref<2x8x32xf32, #tpu.memory_space<vmem>>, vector<1x8x32xf32>
    %154 = vector.shape_cast %153 : vector<1x8x32xf32> to vector<8x32xf32>
    %155 = vector.shape_cast %152 : vector<8x32xf32> to vector<1x8x32xf32>
    tpu.vector_store %arg20[%c0_98, %c0_99, %c0_100], %155 {strides = array<i32>} : memref<2x8x32xf32, #tpu.memory_space<vmem>>, vector<1x8x32xf32>,
    %c1_101 = arith.constant 1 : index
    %c0_102 = arith.constant 0 : index
    %c0_103 = arith.constant 0 : index
    %156 = vector.load %arg1[%c1_101, %c0_102, %c0_103] : memref<2x8x32xf32, #tpu.memory_space<vmem>>, vector<1x8x32xf32>
    %157 = vector.shape_cast %156 : vector<1x8x32xf32> to vector<8x32xf32>
    %158 = tpu.concatenate %152, %113 in 1 : vector<8x32xf32>, vector<8x48xf32> -> vector<8x80xf32>
    %159 = arith.truncf %158 : vector<8x80xf32> to vector<8x80xbf16>
    %c0_104 = arith.constant 0 : index
    %c0_105 = arith.constant 0 : index
    %160 = vector.load %arg13[%c0_104, %c0_105] : memref<80x96xbf16, #tpu.memory_space<vmem>>, vector<80x96xbf16>
    %cst_106 = arith.constant dense<0.000000e+00> : vector<8x96xf32>
    %161 = tpu.matmul %159, %160, %cst_106 {dimension_numbers = #tpu.dot_dimension_numbers<[1], [0], [0], [1], [0, 0, 1, 1], [], []>} : vector<8x80xbf16>, vector<80x96xbf16>, vector<8x96xf32> -> vector<8x96xf32>
    %c0_107 = arith.constant 0 : index
    %c0_108 = arith.constant 0 : index
    %162 = vector.load %arg14[%c0_107, %c0_108] : memref<1x96xf32, #tpu.memory_space<vmem>>, vector<1x96xf32>
    %163 = vector.broadcast %162 : vector<1x96xf32> to vector<8x96xf32>
    %164 = arith.addf %161, %163 : vector<8x96xf32>
    %165 = arith.truncf %157 : vector<8x32xf32> to vector<8x32xbf16>
    %c0_109 = arith.constant 0 : index
    %c0_110 = arith.constant 0 : index
    %166 = vector.load %arg15[%c0_109, %c0_110] : memref<32x96xbf16, #tpu.memory_space<vmem>>, vector<32x96xbf16>
    %cst_111 = arith.constant dense<0.000000e+00> : vector<8x96xf32>
    %167 = tpu.matmul %165, %166, %cst_111 {dimension_numbers = #tpu.dot_dimension_numbers<[1], [0], [0], [1], [0, 0, 1, 1], [], []>} : vector<8x32xbf16>, vector<32x96xbf16>, vector<8x96xf32> -> vector<8x96xf32>
    %c0_112 = arith.constant 0 : index
    %c0_113 = arith.constant 0 : index
    %168 = vector.load %arg16[%c0_112, %c0_113] : memref<1x96xf32, #tpu.memory_space<vmem>>, vector<1x96xf32>
    %169 = vector.broadcast %168 : vector<1x96xf32> to vector<8x96xf32>
    %170 = arith.addf %167, %169 : vector<8x96xf32>
    %171 = vector.extract_strided_slice %164 {offsets = [0, 0], sizes = [8, 32], strides = [1, 1]} : vector<8x96xf32> to vector<8x32xf32>
    %172 = vector.extract_strided_slice %170 {offsets = [0, 0], sizes = [8, 32], strides = [1, 1]} : vector<8x96xf32> to vector<8x32xf32>
    %173 = arith.addf %171, %172 : vector<8x32xf32>
    %174 = arith.negf %173 : vector<8x32xf32>
    %175 = math.exp %174 : vector<8x32xf32>
    %cst_114 = arith.constant 1.000000e+00 : f32
    %176 = vector.broadcast %cst_114 : f32 to vector<8x32xf32>
    %177 = arith.addf %176, %175 : vector<8x32xf32>
    %178 = arith.divf %176, %177 : vector<8x32xf32>
    %179 = vector.extract_strided_slice %164 {offsets = [0, 32], sizes = [8, 32], strides = [1, 1]} : vector<8x96xf32> to vector<8x32xf32>
    %180 = vector.extract_strided_slice %170 {offsets = [0, 32], sizes = [8, 32], strides = [1, 1]} : vector<8x96xf32> to vector<8x32xf32>
    %181 = arith.addf %179, %180 : vector<8x32xf32>
    %182 = arith.negf %181 : vector<8x32xf32>
    %183 = math.exp %182 : vector<8x32xf32>
    %cst_115 = arith.constant 1.000000e+00 : f32
    %184 = vector.broadcast %cst_115 : f32 to vector<8x32xf32>
    %185 = arith.addf %184, %183 : vector<8x32xf32>
    %186 = arith.divf %184, %185 : vector<8x32xf32>
    %187 = vector.extract_strided_slice %164 {offsets = [0, 64], sizes = [8, 32], strides = [1, 1]} : vector<8x96xf32> to vector<8x32xf32>
    %188 = vector.extract_strided_slice %170 {offsets = [0, 64], sizes = [8, 32], strides = [1, 1]} : vector<8x96xf32> to vector<8x32xf32>
    %189 = arith.mulf %178, %188 : vector<8x32xf32>
    %190 = arith.addf %187, %189 : vector<8x32xf32>
    %191 = math.tanh %190 : vector<8x32xf32>
    %192 = arith.subf %157, %191 : vector<8x32xf32>
    %193 = arith.mulf %186, %192 : vector<8x32xf32>
    %194 = arith.addf %191, %193 : vector<8x32xf32>
    %c1_116 = arith.constant 1 : index
    %c0_117 = arith.constant 0 : index
    %c0_118 = arith.constant 0 : index
    %195 = vector.load %arg20[%c1_116, %c0_117, %c0_118] : memref<2x8x32xf32, #tpu.memory_space<vmem>>, vector<1x8x32xf32>
    %196 = vector.shape_cast %195 : vector<1x8x32xf32> to vector<8x32xf32>
    %197 = vector.shape_cast %194 : vector<8x32xf32> to vector<1x8x32xf32>
    tpu.vector_store %arg20[%c1_116, %c0_117, %c0_118], %197 {strides = array<i32>} : memref<2x8x32xf32, #tpu.memory_space<vmem>>, vector<1x8x32xf32>,
    %198 = arith.truncf %194 : vector<8x32xf32> to vector<8x32xbf16>
    %c0_119 = arith.constant 0 : index
    %c0_120 = arith.constant 0 : index
    %199 = vector.load %arg17[%c0_119, %c0_120] : memref<32x128xbf16, #tpu.memory_space<vmem>>, vector<32x128xbf16>
    %cst_121 = arith.constant dense<0.000000e+00> : vector<8x128xf32>
    %200 = tpu.matmul %198, %199, %cst_121 {dimension_numbers = #tpu.dot_dimension_numbers<[1], [0], [0], [1], [0, 0, 1, 1], [], []>} : vector<8x32xbf16>, vector<32x128xbf16>, vector<8x128xf32> -> vector<8x128xf32>
    %c0_122 = arith.constant 0 : index
    %c0_123 = arith.constant 0 : index
    %201 = vector.load %arg18[%c0_122, %c0_123] : memref<1x128xf32, #tpu.memory_space<vmem>>, vector<1x128xf32>
    %202 = vector.broadcast %201 : vector<1x128xf32> to vector<8x128xf32>
    %203 = arith.addf %200, %202 : vector<8x128xf32>
    %204 = tpu.iota {dimensions = array<i32: 1>} : vector<8x128xi32>
    %c50_i32 = arith.constant 50 : i32
    %205 = vector.broadcast %c50_i32 : i32 to vector<8x128xi32>
    %206 = arith.cmpi slt, %204, %205 : vector<8x128xi32>
    %cst_124 = arith.constant -1.000000e+30 : f32
    %207 = vector.broadcast %cst_124 : f32 to vector<8x128xf32>
    %208 = arith.select %206, %203, %207 : vector<8x128xi1>, vector<8x128xf32>
    %cst_125 = arith.constant dense<0xFF800000> : vector<8xf32>
    %209 = vector.multi_reduction <maximumf>, %208, %cst_125 [1] : vector<8x128xf32> to vector<8xf32>
    %210 = vector.shape_cast %209 : vector<8xf32> to vector<8x1xf32>
    %211 = vector.broadcast %210 : vector<8x1xf32> to vector<8x128xf32>
    %212 = arith.subf %208, %211 : vector<8x128xf32>
    %213 = math.exp %212 : vector<8x128xf32>
    %cst_126 = arith.constant dense<0.000000e+00> : vector<8xf32>
    %214 = vector.multi_reduction <add>, %213, %cst_126 [1] : vector<8x128xf32> to vector<8xf32>
    %215 = vector.shape_cast %214 : vector<8xf32> to vector<8x1xf32>
    %216 = math.log %215 : vector<8x1xf32>
    %217 = vector.broadcast %216 : vector<8x1xf32> to vector<8x128xf32>
    %218 = arith.subf %212, %217 : vector<8x128xf32>
    %c0_127 = arith.constant 0 : index
    %c0_128 = arith.constant 0 : index
    %219 = vector.load %arg19[%c0_127, %c0_128] : memref<8x128xf32, #tpu.memory_space<vmem>>, vector<8x128xf32>
    tpu.vector_store %arg19[%c0_127, %c0_128], %218 {strides = array<i32>} : memref<8x128xf32, #tpu.memory_space<vmem>>, vector<8x128xf32>,
    return
  }
}

</mosaic_0001>

<bundles_post_ra>
// kernel: decoder_forward.1
= control target key start
LH: loop header
LB: loop body
LE: loop exit
PB: predicated region body
PF: predicated region fallthrough
CT: control target
= control target key end

     0   :  { %s5725_s0 = inlined_call_operand.vmem [shape: s32[8], index: 0, kind: input, shape index: {}]   ;;  %s5726_s1 = inlined_call_operand.vmem [shape: f32[2,8,32], index: 1, kind: input, shape index: {}]   ;;  %s5727_s2 = inlined_call_operand.vmem [shape: bf16[8,128,32], index: 2, kind: input, shape index: {}]   ;;  %s5728_s3 = inlined_call_operand.vmem [shape: f32[8,128,32], index: 3, kind: input, shape index: {}]   ;;  %s5729_s4 = inlined_call_operand.vmem [shape: f32[8,16], index: 4, kind: input, shape index: {}]   ;;  %s5730_s5 = inlined_call_operand.vmem [shape: f32[50,32], index: 5, kind: input, shape index: {}]   ;;  %s5731_s6 = inlined_call_operand.vmem [shape: bf16[32,32], index: 6, kind: input, shape index: {}]   ;;  %s5732_s7 = inlined_call_operand.vmem [shape: f32[1,32], index: 7, kind: input, shape index: {}]   ;;  %s5733_s8 = inlined_call_operand.vmem [shape: bf16[1,32], index: 8, kind: input, shape index: {}]   ;;  %s5734_s9 = inlined_call_operand.vmem [shape: bf16[80,96], index: 9, kind: input, shape index: {}]   ;;  %s5735_s10 = inlined_call_operand.vmem [shape: f32[1,96], index: 10, kind: input, shape index: {}]   ;;  %s5736_s11 = inlined_call_operand.vmem [shape: bf16[32,96], index: 11, kind: input, shape index: {}]   ;;  %s5737_s12 = inlined_call_operand.vmem [shape: f32[1,96], index: 12, kind: input, shape index: {}]   ;;  %s5738_s13 = inlined_call_operand.vmem [shape: bf16[80,96], index: 13, kind: input, shape index: {}]   ;;  %s5739_s14 = inlined_call_operand.vmem [shape: f32[1,96], index: 14, kind: input, shape index: {}]   ;;  %s5740_s15 = inlined_call_operand.vmem [shape: bf16[32,96], index: 15, kind: input, shape index: {}]   ;;  %s5741_s16 = inlined_call_operand.vmem [shape: f32[1,96], index: 16, kind: input, shape index: {}]   ;;  %s5742_s17 = inlined_call_operand.vmem [shape: bf16[32,128], index: 17, kind: input, shape index: {}]   ;;  %s5743_s18 = inlined_call_operand.vmem [shape: f32[1,128], index: 18, kind: input, shape index: {}]   ;;  %s5744_s19 = inlined_call_operand.vmem [shape: f32[8,128], index: 19, kind: output, shape index: {0}]   ;;  %s5745_s20 = inlined_call_operand.vmem [shape: f32[2,8,32], index: 20, kind: output, shape index: {1}]   ;;  %s5746_s21 = inlined_call_operand.vmem [shape: f32[8,1,128], index: 21, kind: output, shape index: {2}]  }
   0x1   :  { %5751 = sst [smem:[#allocation23_spill]] %s5725_s0 }
   0x2   :  { %5752 = sst [smem:[#allocation24_spill]] %s5726_s1  ;;  %s5758_s26 = sld [smem:[#allocation23_spill]] }
   0x3   :  { %5753 = sst [smem:[#allocation25_spill]] %s5727_s2 }
   0x4   :  { %5754 = sst [smem:[#allocation26_spill]] %s5728_s3 }
   0x5   :  { %5755 = sst [smem:[#allocation27_spill]] %s5729_s4 }
   0x6   :  { %5756 = sst [smem:[#allocation28_spill]] %s5730_s5 }
   0x7   :  { %5757 = sst [smem:[#allocation29_spill]] %s5739_s14 }
   0x8   :  { %s27_s14 = sshll.u32 %s5758_s26, 4  ;;  %s28_s14 = int_to_ptr.vmem [resolvable:$true] %s27_s14 }
   0x9   :  { %s4286_s27 = scalar_lea.vmem %s28_s14, 16  ;;  %p4291_p1 = scmp.lt.s32.totalorder %s28_s14, %s28_s14 }
   0xa   :  { %p4287_p0 = scmp.ne.s32.totalorder %s28_s14, %s4286_s27  ;;  %p4292_p2 = scmp.lt.s32.totalorder %s4286_s27, %s4286_s27 }
   0xc   :  { %p4293_p3 = por %p4292_p2, %p4291_p1 }
   0xe   :  { %p4294_p4 = pnand %p4293_p3, %p4287_p0 }
  0x10   :  { %4297 = shalt.err (!%p4294_p4)  }
  0x11   :  { %s4316_s3 = smov [#allocation5]  }
  0x12   :  { %30 = dma.vmem_to_smem %s28_s14, 16, %s4316_s3, [#allocation4] }
  0x13   :  { %4298 = dma.done.wait [#allocation4], 16 }
  0x14   :  { %4299 = vsyncadd [#allocation4], 4294967280 }
  0x15   :  { %32 = sfence }
  0x16   :  { %s68_s28 = sld [smem:[#allocation5]]  ;;  %s5759_s4 = sld [smem:[#allocation28_spill]] }
  0x1c   :  { %s69_s30 = scalar_lea.vmem %s5759_s4, %s68_s28 }
  0x1d   :  { %v87_v0 = vld [vmem:[%s69_s30] sm:$0x1] }
  0x1e   :  { %88 = vst [vmem:[#allocation2] sm:$0x1] %v87_v0 }
  0x1f   :  { %113 = vsyncadd [#allocation3], 16  ;;  %s3223_s5 = sld [smem:[#allocation5 + $0x1]] }
  0x25   :  { %s115_s1 = scalar_lea.vmem %s5759_s4, %s3223_s5 }
  0x26   :  { %v135_v1 = vld [vmem:[%s115_s1] sm:$0x1] }
  0x27   :  { %136 = vst [vmem:[#allocation2 + $0x1] sm:$0x1] %v135_v1 }
  0x28   :  { %161 = vsyncadd [#allocation3 + $0x1], 16  ;;  %s3224_s14 = sld [smem:[#allocation5 + $0x2]] }
  0x2e   :  { %s163_s25 = scalar_lea.vmem %s5759_s4, %s3224_s14 }
  0x2f   :  { %v183_v2 = vld [vmem:[%s163_s25] sm:$0x1] }
  0x30   :  { %184 = vst [vmem:[#allocation2 + $0x2] sm:$0x1] %v183_v2 }
  0x31   :  { %209 = vsyncadd [#allocation3 + $0x2], 16  ;;  %s3225_s26 = sld [smem:[#allocation5 + $0x3]] }
  0x37   :  { %s211_s28 = scalar_lea.vmem %s5759_s4, %s3225_s26 }
  0x38   :  { %v231_v3 = vld [vmem:[%s211_s28] sm:$0x1] }
  0x39   :  { %232 = vst [vmem:[#allocation2 + $0x3] sm:$0x1] %v231_v3 }
  0x3a   :  { %257 = vsyncadd [#allocation3 + $0x3], 16  ;;  %s3226_s29 = sld [smem:[#allocation5 + $0x4]] }
  0x40   :  { %s259_s5 = scalar_lea.vmem %s5759_s4, %s3226_s29 }
  0x41   :  { %v279_v4 = vld [vmem:[%s259_s5] sm:$0x1] }
  0x42   :  { %280 = vst [vmem:[#allocation2 + $0x4] sm:$0x1] %v279_v4 }
  0x43   :  { %305 = vsyncadd [#allocation3 + $0x4], 16  ;;  %s3227_s22 = sld [smem:[#allocation5 + $0x5]] }
  0x49   :  { %s307_s14 = scalar_lea.vmem %s5759_s4, %s3227_s22 }
  0x4a   :  { %v327_v5 = vld [vmem:[%s307_s14] sm:$0x1] }
  0x4b   :  { %328 = vst [vmem:[#allocation2 + $0x5] sm:$0x1] %v327_v5 }
  0x4c   :  { %353 = vsyncadd [#allocation3 + $0x5], 16  ;;  %s3228_s24 = sld [smem:[#allocation5 + $0x6]] }
  0x52   :  { %s355_s26 = scalar_lea.vmem %s5759_s4, %s3228_s24 }
  0x53   :  { %v375_v6 = vld [vmem:[%s355_s26] sm:$0x1] }
  0x54   :  { %376 = vst [vmem:[#allocation2 + $0x6] sm:$0x1] %v375_v6 }
  0x55   :  { %401 = vsyncadd [#allocation3 + $0x6], 16  ;;  %s3229_s27 = sld [smem:[#allocation5 + $0x7]] }
  0x5b   :  { %s403_s29 = scalar_lea.vmem %s5759_s4, %s3229_s27 }
  0x5c   :  { %v423_v7 = vld [vmem:[%s403_s29] sm:$0x1] }
  0x5d   :  { %424 = vst [vmem:[#allocation2 + $0x7] sm:$0x1] %v423_v7 }
  0x5e   :  { %449 = vsyncadd [#allocation3 + $0x7], 16  ;;  %v3899_v8 = vld [vmem:[%s5731_s6] sm:$0xff]   ;;  %v4317_v9 = vmov 0.0   ;;  %v3900_v10 = vld [vmem:[%s5731_s6 + $0x8] sm:$0xff]   ;;  %s5760_s4 = sld [smem:[#allocation24_spill]]  ;;  %v525_v15 = vlaneseq }
  0x5f   :  { %3513 = vmatprep.subr.bf16.mxu0 %v4317_v9  ;;  %3521 = vmatprep.subr.bf16.mxu1 %v4317_v9  ;;  %vm476_vm0 = vcmask 261120   ;;  %vm4318_vm1 = vmmov 0   ;;  %v4319_v13 = vmov 1966171168   ;;  %v3231_v18 = vld [vmem:[%s5732_s7] ss:$0 sm:$0xff] }
  0x60   :  { %3514 = vmatpush3.bf16.msra.mxu0 %v3899_v8  ;;  %3517 = vmatprep.mubr.msk.bf16.mxu0 %vm4318_vm1, %v4317_v9  ;;  %v523_v14 = vunpack.c.l.s4 %v4319_v13  ;;  %v526_v17 = vshrl.u32 %v525_v15, 7  ;;  %s5761_s25 = sld [smem:[#allocation26_spill]]  ;;  %vm1585_vm3 = vcmask 1040384   ;;  %s5762_s27 = sld [smem:[#allocation25_spill]] }
  0x61   :  { %3515 = vmatprep.subr.bf16.mxu0 %v4317_v9  ;;  %3537 = vmatprep.mubr.msk.bf16.mxu1 %vm4318_vm1, %v4317_v9 }
  0x62   :  { %v524_v16 = vunpack.c.0.s8 %v523_v14  ;;  %v700_v27 = vsub.s32 0, %v526_v17 }
  0x64   :  { %v3230_v11 = vld [vmem:[%s5760_s4 + $0x8] sm:$0xff]  ;;  %3516 = vmatpush3.bf16.msra.mxu0 %v3900_v10  ;;  %v527_v19 = vsub.s32 %v524_v16, %v526_v17 }
  0x65   :  { %v452_v12 = vpack.c.bf16 %v3230_v11, %v3230_v11  ;;  %3541 = vmatprep.subr.bf16.mxu0 %v4317_v9 }
  0x66   :  { %v570_v35 = vld [vmem:[%s5761_s25] sm:$0xff]  ;;  %v571_v36 = vld [vmem:[%s5761_s25 + $0x8] sm:$0xff]  ;;  %v572_v44 = vld [vmem:[%s5761_s25 + $0x10] sm:$0xff] }
  0x67   :  { %3518 = vmatmul.mubr.msk.bf16.vlgmr.msra.gmra.mrb[0].mxu0 %vm476_vm0, %v452_v12  ;;  %v586_v42 = vld [vmem:[%s5761_s25 + $0x80] sm:$0xff]  ;;  %v587_v43 = vld [vmem:[%s5761_s25 + $0x88] sm:$0xff]  ;;  %v573_v49 = vld [vmem:[%s5761_s25 + $0x18] sm:$0xff] }
  0x68   :  { %3557 = vmatprep.mubr.msk.bf16.mxu0 %vm4318_vm1, %v4317_v9  ;;  %v588_v54 = vld [vmem:[%s5761_s25 + $0x90] sm:$0xff]  ;;  %v589_v58 = vld [vmem:[%s5761_s25 + $0x98] sm:$0xff]  ;;  %v574_v63 = vld [vmem:[%s5761_s25 + $0x20] sm:$0xff] }
  0x69   :  { %v575_v0 = vld [vmem:[%s5761_s25 + $0x28] sm:$0xff]  ;;  %v590_v1 = vld [vmem:[%s5761_s25 + $0xa0] sm:$0xff]  ;;  %v576_v13 = vld [vmem:[%s5761_s25 + $0x30] sm:$0xff] }
  0x6a   :  { %v591_v3 = vld [vmem:[%s5761_s25 + $0xa8] sm:$0xff] }
 0x13a   :  { %v514_v20 = vpop.f32.mrb[0].mxu0 }
 0x13b   :  { %v515_v21 = vadd.f32 %v3231_v18, %v514_v20  ;;  %v3519_v22 = vpop.f32.mrb[1].mxu0  ;;  %v577_v18 = vld [vmem:[%s5761_s25 + $0x38] sm:$0xff]  ;;  %v592_v20 = vld [vmem:[%s5761_s25 + $0xb0] sm:$0xff] }
 0x13c   :  { %v517_v23 = vpop.f32.mrb[2].mxu0 }
 0x13d   :  { %v521_v24 = vcombine.high %v515_v21, %v515_v21  ;;  %v528_v25 = vrot.slane %v515_v21, %v527_v19  ;;  %v3520_v26 = vpop.f32.mrb[3].mxu0 }
 0x13f   :  { %v535_v28 = vrot.slane %v521_v24, %v527_v19  ;;  %v536_v29 = vcombine.high %v528_v25, %v528_v25  ;;  %v544_v30 = vrot.slane %v528_v25, %v527_v19  ;;  %v593_v24 = vld [vmem:[%s5761_s25 + $0xb8] sm:$0xff] }
 0x141   :  { %v537_v31 = vcombine.high %v535_v28, %v535_v28  ;;  %v551_v32 = vrot.slane %v535_v28, %v527_v19  ;;  %v558_v33 = vrot.slane %v536_v29, %v527_v19  ;;  %v566_v34 = vcombine.high %v544_v30, %v544_v30 }
 0x142   :  { %v4489_v37 = vrot.slane %v544_v30, %v700_v27 }
 0x143   :  { %v565_v38 = vrot.slane %v537_v31, %v527_v19  ;;  %v567_v39 = vcombine.high %v551_v32, %v551_v32  ;;  %v568_v40 = vcombine.high %v558_v33, %v558_v33  ;;  %v4491_v41 = vrot.slane %v558_v33, %v700_v27  ;;  %v578_v31 = vld [vmem:[%s5761_s25 + $0x40] sm:$0xff] }
 0x144   :  { %v4502_v45 = vrot.slane %v566_v34, %v700_v27  ;;  %v4504_v46 = vrot.slane %v551_v32, %v700_v27  ;;  %v738_v47 = vadd.f32 %v4489_v37, %v570_v35  ;;  %v739_v48 = vadd.f32 %v4489_v37, %v571_v36  ;;  %v579_v34 = vld [vmem:[%s5761_s25 + $0x48] sm:$0xff]  ;;  %v594_v36 = vld [vmem:[%s5761_s25 + $0xc0] sm:$0xff] }
 0x145   :  { %v569_v50 = vcombine.high %v565_v38, %v565_v38  ;;  %v4511_v51 = vrot.slane %v568_v40, %v700_v27  ;;  %v4513_v52 = vrot.slane %v565_v38, %v700_v27  ;;  %v4515_v53 = vrot.slane %v567_v39, %v700_v27 }
 0x146   :  { %3965 = vtanh.f32 %v738_v47  ;;  %v754_v55 = vadd.f32 %v4491_v41, %v586_v42  ;;  %v755_v56 = vadd.f32 %v4491_v41, %v587_v43  ;;  %v740_v57 = vadd.f32 %v4489_v37, %v572_v44  ;;  %v595_v42 = vld [vmem:[%s5761_s25 + $0xc8] sm:$0xff] }
 0x147   :  { %v4526_v59 = vrot.slane %v569_v50, %v700_v27  ;;  %3967 = vtanh.f32 %v739_v48  ;;  %v741_v60 = vadd.f32 %v4489_v37, %v573_v49  ;;  %v756_v61 = vadd.f32 %v4491_v41, %v588_v54  ;;  %v580_v54 = vld [vmem:[%s5761_s25 + $0x50] sm:$0xff] }
 0x148   :  { %3969 = vtanh.f32 %v754_v55  ;;  %v757_v62 = vadd.f32 %v4491_v41, %v589_v58  ;;  %v742_v2 = vadd.f32 %v4489_v37, %v574_v63  ;;  %v743_v4 = vadd.f32 %v4489_v37, %v575_v0  ;;  %v597_v0 = vld [vmem:[%s5761_s25 + $0xd8] sm:$0xff] }
 0x149   :  { %3971 = vtanh.f32 %v755_v56  ;;  %v758_v6 = vadd.f32 %v4491_v41, %v590_v1  ;;  %v759_v8 = vadd.f32 %v4491_v41, %v591_v3  ;;  %v744_v23 = vadd.f32 %v4489_v37, %v576_v13  ;;  %v598_v13 = vld [vmem:[%s5761_s25 + $0xe0] sm:$0xff] }
 0x14a   :  { %3973 = vtanh.f32 %v740_v57  ;;  %v745_v26 = vadd.f32 %v4489_v37, %v577_v18  ;;  %v760_v28 = vadd.f32 %v4491_v41, %v592_v20  ;;  %v761_v29 = vadd.f32 %v4491_v41, %v593_v24  ;;  %v581_v57 = vld [vmem:[%s5761_s25 + $0x58] sm:$0xff]  ;;  %v599_v18 = vld [vmem:[%s5761_s25 + $0xe8] sm:$0xff] }
 0x14b   :  { %3975 = vtanh.f32 %v741_v60  ;;  %v746_v40 = vadd.f32 %v4489_v37, %v578_v31  ;;  %v747_v44 = vadd.f32 %v4489_v37, %v579_v34  ;;  %v762_v48 = vadd.f32 %v4491_v41, %v594_v36  ;;  %v596_v60 = vld [vmem:[%s5761_s25 + $0xd0] sm:$0xff]  ;;  %v601_v34 = vld [vmem:[%s5761_s25 + $0xf8] sm:$0xff] }
 0x14c   :  { %3977 = vtanh.f32 %v756_v61  ;;  %v763_v49 = vadd.f32 %v4491_v41, %v595_v42  ;;  %v748_v63 = vadd.f32 %v4489_v37, %v580_v54 }
 0x14d   :  { %3979 = vtanh.f32 %v757_v62 }
 0x14e   :  { %3981 = vtanh.f32 %v742_v2  ;;  %v749_v2 = vadd.f32 %v4489_v37, %v581_v57 }
 0x14f   :  { %3983 = vtanh.f32 %v743_v4  ;;  %v764_v4 = vadd.f32 %v4491_v41, %v596_v60 }
 0x150   :  { %v3966_v5 = vpop.eup %3965  ;;  %3985 = vtanh.f32 %v758_v6 }
 0x151   :  { %v3968_v7 = vpop.eup %3967  ;;  %3987 = vtanh.f32 %v759_v8 }
 0x152   :  { %v3970_v10 = vpop.eup %3969  ;;  %v995_v11 = vpack.c.bf16 %v3968_v7, %v3966_v5  ;;  %3989 = vtanh.f32 %v744_v23  ;;  %v765_v5 = vadd.f32 %v4491_v41, %v597_v0  ;;  %v582_v7 = vld [vmem:[%s5761_s25 + $0x60] sm:$0xff]  ;;  %v767_v23 = vadd.f32 %v4491_v41, %v599_v18 }
 0x153   :  { %v3972_v12 = vpop.eup %3971  ;;  %3991 = vtanh.f32 %v745_v26 }
 0x154   :  { %v3974_v14 = vpop.eup %3973  ;;  %v1063_v16 = vsel %vm476_vm0, %v995_v11, 0  ;;  %v1003_v17 = vpack.c.bf16 %v3972_v12, %v3970_v10  ;;  %3993 = vtanh.f32 %v760_v28  ;;  %v583_v11 = vld [vmem:[%s5761_s25 + $0x68] sm:$0xff]  ;;  %v585_v28 = vld [vmem:[%s5761_s25 + $0x78] sm:$0xff] }
 0x155   :  { %v3976_v19 = vpop.eup %3975  ;;  %3522 = vmatpush3.bf16.xpose.msra.mxu1 %v1063_v16  ;;  %3995 = vtanh.f32 %v761_v29  ;;  %v751_v20 = vadd.f32 %v4489_v37, %v583_v11  ;;  %v753_v36 = vadd.f32 %v4489_v37, %v585_v28 }
 0x156   :  { %v3978_v21 = vpop.eup %3977  ;;  %v1127_v22 = vsel %vm476_vm0, %v1003_v17, 0  ;;  %3523 = vmatprep.subr.bf16.mxu1 %v4317_v9  ;;  %v996_v27 = vpack.c.bf16 %v3976_v19, %v3974_v14  ;;  %3997 = vtanh.f32 %v746_v40  ;;  %v750_v17 = vadd.f32 %v4489_v37, %v582_v7 }
 0x157   :  { %v3980_v25 = vpop.eup %3979  ;;  %3542 = vmatpush3.bf16.xpose.msra.mxu0 %v1127_v22  ;;  %3999 = vtanh.f32 %v747_v44  ;;  %v766_v22 = vadd.f32 %v4491_v41, %v598_v13  ;;  %v769_v40 = vadd.f32 %v4491_v41, %v601_v34  ;;  %v608_v34 = vld [vmem:[%s5761_s25 + $0x130] sm:$0xff] }
 0x158   :  { %3543 = vmatprep.subr.bf16.mxu0 %v4317_v9  ;;  %v1004_v30 = vpack.c.bf16 %v3980_v25, %v3978_v21  ;;  %v3982_v32 = vpop.eup %3981  ;;  %v1066_v33 = vsel %vm476_vm0, %v996_v27, 0  ;;  %4001 = vtanh.f32 %v762_v48  ;;  %v584_v25 = vld [vmem:[%s5761_s25 + $0x70] sm:$0xff] }
 0x159   :  { %v3984_v35 = vpop.eup %3983  ;;  %4003 = vtanh.f32 %v763_v49 }
 0x15a   :  { %v3986_v38 = vpop.eup %3985  ;;  %v1130_v39 = vsel %vm476_vm0, %v1004_v30, 0  ;;  %v997_v47 = vpack.c.bf16 %v3984_v35, %v3982_v32  ;;  %4005 = vtanh.f32 %v748_v63  ;;  %v600_v30 = vld [vmem:[%s5761_s25 + $0xf0] sm:$0xff] }
 0x15b   :  { %v3988_v43 = vpop.eup %3987  ;;  %4007 = vtanh.f32 %v749_v2  ;;  %v604_v63 = vld [vmem:[%s5761_s25 + $0x110] sm:$0xff]  ;;  %v605_v2 = vld [vmem:[%s5761_s25 + $0x118] sm:$0xff] }
 0x15c   :  { %v1005_v50 = vpack.c.bf16 %v3988_v43, %v3986_v38  ;;  %v3990_v55 = vpop.eup %3989  ;;  %v1069_v56 = vsel %vm476_vm0, %v997_v47, 0  ;;  %4009 = vtanh.f32 %v764_v4  ;;  %v602_v43 = vld [vmem:[%s5761_s25 + $0x100] sm:$0xff]  ;;  %v620_v4 = vld [vmem:[%s5761_s25 + $0x190] sm:$0xff]  ;;  %v772_v7 = vadd.f32 %v4502_v45, %v604_v63 }
 0x15d   :  { %3524 = vmatpush3.bf16.xpose.msra.mxu1 %v1066_v33  ;;  %v3992_v58 = vpop.eup %3991  ;;  %4011 = vtanh.f32 %v765_v5  ;;  %v752_v33 = vadd.f32 %v4489_v37, %v584_v25  ;;  %v603_v37 = vld [vmem:[%s5761_s25 + $0x108] sm:$0xff]  ;;  %v770_v54 = vadd.f32 %v4502_v45, %v602_v43  ;;  %v773_v11 = vadd.f32 %v4502_v45, %v605_v2 }
 0x15e   :  { %3525 = vmatprep.subr.bf16.mxu1 %v4317_v9  ;;  %v3994_v61 = vpop.eup %3993  ;;  %v1133_v62 = vsel %vm476_vm0, %v1005_v50, 0  ;;  %v998_v3 = vpack.c.bf16 %v3992_v58, %v3990_v55  ;;  %4013 = vtanh.f32 %v750_v17  ;;  %v619_v55 = vld [vmem:[%s5761_s25 + $0x188] sm:$0xff]  ;;  %v771_v57 = vadd.f32 %v4502_v45, %v603_v37  ;;  %v606_v17 = vld [vmem:[%s5761_s25 + $0x120] sm:$0xff] }
 0x15f   :  { %3544 = vmatpush3.bf16.xpose.msra.mxu0 %v1130_v39  ;;  %v3996_v1 = vpop.eup %3995  ;;  %4015 = vtanh.f32 %v751_v20  ;;  %v768_v39 = vadd.f32 %v4491_v41, %v600_v30  ;;  %v618_v41 = vld [vmem:[%s5761_s25 + $0x180] sm:$0xff]  ;;  %v788_v13 = vadd.f32 %v4511_v51, %v620_v4  ;;  %v607_v20 = vld [vmem:[%s5761_s25 + $0x128] sm:$0xff]  ;;  %v774_v25 = vadd.f32 %v4502_v45, %v606_v17 }
 0x160   :  { %3545 = vmatprep.subr.bf16.mxu0 %v4317_v9  ;;  %v1006_v6 = vpack.c.bf16 %v3996_v1, %v3994_v61  ;;  %v3998_v8 = vpop.eup %3997  ;;  %v1072_v10 = vsel %vm476_vm0, %v998_v3, 0  ;;  %4017 = vtanh.f32 %v766_v22  ;;  %v786_v60 = vadd.f32 %v4511_v51, %v618_v41  ;;  %v622_v22 = vld [vmem:[%s5761_s25 + $0x1a0] sm:$0xff] }
 0x161   :  { %v4000_v12 = vpop.eup %3999  ;;  %4019 = vtanh.f32 %v767_v23  ;;  %v787_v61 = vadd.f32 %v4511_v51, %v619_v55  ;;  %v775_v28 = vadd.f32 %v4502_v45, %v607_v20  ;;  %v790_v30 = vadd.f32 %v4511_v51, %v622_v22  ;;  %v610_v55 = vld [vmem:[%s5761_s25 + $0x140] sm:$0xff] }
 0x162   :  { %v4002_v14 = vpop.eup %4001  ;;  %v1136_v16 = vsel %vm476_vm0, %v1006_v6, 0  ;;  %v999_v21 = vpack.c.bf16 %v4000_v12, %v3998_v8  ;;  %4021 = vtanh.f32 %v752_v33  ;;  %v621_v8 = vld [vmem:[%s5761_s25 + $0x198] sm:$0xff] }
 0x163   :  { %v4004_v19 = vpop.eup %4003  ;;  %4023 = vtanh.f32 %v753_v36 }
 0x164   :  { %v1007_v24 = vpack.c.bf16 %v4004_v19, %v4002_v14  ;;  %v4006_v26 = vpop.eup %4005  ;;  %v1075_v27 = vsel %vm476_vm0, %v999_v21, 0  ;;  %4025 = vtanh.f32 %v768_v39  ;;  %v789_v14 = vadd.f32 %v4511_v51, %v621_v8  ;;  %v612_v8 = vld [vmem:[%s5761_s25 + $0x150] sm:$0xff] }
 0x165   :  { %3526 = vmatpush3.bf16.xpose.msra.mxu1 %v1069_v56  ;;  %v4008_v29 = vpop.eup %4007  ;;  %4027 = vtanh.f32 %v769_v40  ;;  %v624_v40 = vld [vmem:[%s5761_s25 + $0x1b0] sm:$0xff] }
 0x166   :  { %3527 = vmatprep.subr.bf16.mxu1 %v4317_v9  ;;  %v4010_v31 = vpop.eup %4009  ;;  %v1139_v32 = vsel %vm476_vm0, %v1007_v24, 0  ;;  %v1000_v38 = vpack.c.bf16 %v4008_v29, %v4006_v26  ;;  %4029 = vtanh.f32 %v770_v54  ;;  %v623_v26 = vld [vmem:[%s5761_s25 + $0x1a8] sm:$0xff] }
 0x167   :  { %3546 = vmatpush3.bf16.xpose.msra.mxu0 %v1133_v62  ;;  %v4012_v35 = vpop.eup %4011  ;;  %4031 = vtanh.f32 %v771_v57 }
 0x168   :  { %3547 = vmatprep.subr.bf16.mxu0 %v4317_v9  ;;  %v1008_v42 = vpack.c.bf16 %v4012_v35, %v4010_v31  ;;  %v4014_v44 = vpop.eup %4013  ;;  %v1078_v47 = vsel %vm476_vm0, %v1000_v38, 0  ;;  %4033 = vtanh.f32 %v786_v60  ;;  %v4709_v31 = vld [vmem:[%s5733_s8] sm:$0x1]  ;;  %v609_v38 = vld [vmem:[%s5761_s25 + $0x138] sm:$0xff] }
 0x169   :  { %v4016_v48 = vpop.eup %4015  ;;  %4035 = vtanh.f32 %v787_v61  ;;  %v626_v61 = vld [vmem:[%s5761_s25 + $0x1c0] sm:$0xff] }
 0x16a   :  { %v4018_v49 = vpop.eup %4017  ;;  %v1142_v50 = vsel %vm476_vm0, %v1008_v42, 0  ;;  %v1001_v58 = vpack.c.bf16 %v4016_v48, %v4014_v44  ;;  %4037 = vtanh.f32 %v772_v7  ;;  %v776_v44 = vadd.f32 %v4502_v45, %v608_v34 }
 0x16b   :  { %v4020_v56 = vpop.eup %4019  ;;  %4039 = vtanh.f32 %v773_v11  ;;  %v777_v48 = vadd.f32 %v4502_v45, %v609_v38 }
 0x16c   :  { %v1009_v62 = vpack.c.bf16 %v4020_v56, %v4018_v49  ;;  %v4022_v0 = vpop.eup %4021  ;;  %v1081_v1 = vsel %vm476_vm0, %v1001_v58, 0  ;;  %4041 = vtanh.f32 %v788_v13  ;;  %v792_v49 = vadd.f32 %v4511_v51, %v624_v40  ;;  %v611_v58 = vld [vmem:[%s5761_s25 + $0x148] sm:$0xff] }
 0x16d   :  { %3528 = vmatpush3.bf16.xpose.msra.mxu1 %v1072_v10  ;;  %v4024_v3 = vpop.eup %4023  ;;  %4043 = vtanh.f32 %v789_v14  ;;  %v628_v14 = vld [vmem:[%s5761_s25 + $0x1d0] sm:$0xff] }
 0x16e   :  { %3529 = vmatprep.subr.bf16.mxu1 %v4317_v9  ;;  %v4026_v5 = vpop.eup %4025  ;;  %v1145_v6 = vsel %vm476_vm0, %v1009_v62, 0  ;;  %v1002_v12 = vpack.c.bf16 %v4024_v3, %v4022_v0  ;;  %4045 = vtanh.f32 %v774_v25  ;;  %v778_v0 = vadd.f32 %v4502_v45, %v610_v55 }
 0x16f   :  { %3548 = vmatpush3.bf16.xpose.msra.mxu0 %v1136_v16  ;;  %v4028_v10 = vpop.eup %4027  ;;  %4047 = vtanh.f32 %v775_v28  ;;  %v779_v3 = vadd.f32 %v4502_v45, %v611_v58 }
 0x170   :  { %3549 = vmatprep.subr.bf16.mxu0 %v4317_v9  ;;  %v1010_v16 = vpack.c.bf16 %v4028_v10, %v4026_v5  ;;  %v4030_v18 = vpop.eup %4029  ;;  %v1084_v19 = vsel %vm476_vm0, %v1002_v12, 0  ;;  %4049 = vtanh.f32 %v790_v30  ;;  %v794_v5 = vadd.f32 %v4511_v51, %v626_v61  ;;  %v613_v12 = vld [vmem:[%s5761_s25 + $0x158] sm:$0xff] }
 0x171   :  { %v4032_v21 = vpop.eup %4031 }
 0x172   :  { %v4034_v23 = vpop.eup %4033  ;;  %v1148_v24 = vsel %vm476_vm0, %v1010_v16, 0  ;;  %v1011_v29 = vpack.c.bf16 %v4032_v21, %v4030_v18  ;;  %v780_v18 = vadd.f32 %v4502_v45, %v612_v8  ;;  %v781_v21 = vadd.f32 %v4502_v45, %v613_v12  ;;  %v651_v8 = vld [vmem:[%s5761_s25 + $0x288] sm:$0xff] }
 0x174   :  { %v1191_v36 = vsel %vm476_vm0, %v1011_v29, 0  ;;  %v615_v29 = vld [vmem:[%s5761_s25 + $0x168] sm:$0xff] }
 0x175   :  { %3530 = vmatpush3.bf16.xpose.msra.mxu1 %v1075_v27  ;;  %v4036_v27 = vpop.eup %4035 }
 0x176   :  { %3531 = vmatprep.subr.bf16.mxu1 %v4317_v9  ;;  %v1019_v33 = vpack.c.bf16 %v4036_v27, %v4034_v23  ;;  %v4038_v35 = vpop.eup %4037  ;;  %v796_v23 = vadd.f32 %v4511_v51, %v628_v14  ;;  %v819_v14 = vadd.f32 %v4513_v52, %v651_v8 }
 0x177   :  { %3550 = vmatpush3.bf16.xpose.msra.mxu0 %v1139_v32  ;;  %v791_v32 = vadd.f32 %v4511_v51, %v623_v26  ;;  %v4040_v39 = vpop.eup %4039  ;;  %v614_v26 = vld [vmem:[%s5761_s25 + $0x160] sm:$0xff] }
 0x178   :  { %3551 = vmatprep.subr.bf16.mxu0 %v4317_v9  ;;  %v4042_v42 = vpop.eup %4041  ;;  %v1255_v43 = vsel %vm476_vm0, %v1019_v33, 0  ;;  %v1012_v41 = vpack.c.bf16 %v4040_v39, %v4038_v35  ;;  %v782_v35 = vadd.f32 %v4502_v45, %v614_v26  ;;  %v783_v39 = vadd.f32 %v4502_v45, %v615_v29  ;;  %v653_v26 = vld [vmem:[%s5761_s25 + $0x298] sm:$0xff] }
 0x179   :  { %4051 = vtanh.f32 %v791_v32  ;;  %v4044_v37 = vpop.eup %4043  ;;  %v630_v32 = vld [vmem:[%s5761_s25 + $0x1e0] sm:$0xff] }
 0x17a   :  { %v1020_v54 = vpack.c.bf16 %v4044_v37, %v4042_v42  ;;  %4053 = vtanh.f32 %v776_v44  ;;  %v4046_v56 = vpop.eup %4045  ;;  %v1194_v57 = vsel %vm476_vm0, %v1012_v41, 0  ;;  %v798_v42 = vadd.f32 %v4511_v51, %v630_v32  ;;  %v617_v41 = vld [vmem:[%s5761_s25 + $0x178] sm:$0xff] }
 0x17b   :  { %4055 = vtanh.f32 %v777_v48  ;;  %v4048_v60 = vpop.eup %4047  ;;  %v821_v32 = vadd.f32 %v4513_v52, %v653_v26 }
 0x17c   :  { %4057 = vtanh.f32 %v792_v49  ;;  %v4050_v62 = vpop.eup %4049  ;;  %v1258_v63 = vsel %vm476_vm0, %v1020_v54, 0  ;;  %v1013_v4 = vpack.c.bf16 %v4048_v60, %v4046_v56  ;;  %v785_v60 = vadd.f32 %v4502_v45, %v617_v41 }
 0x17d   :  { %3532 = vmatpush3.bf16.xpose.msra.mxu1 %v1078_v47  ;;  %v625_v47 = vld [vmem:[%s5761_s25 + $0x1b8] sm:$0xff] }
 0x17e   :  { %3533 = vmatprep.subr.bf16.mxu1 %v4317_v9  ;;  %v1197_v11 = vsel %vm476_vm0, %v1013_v4, 0 }
 0x17f   :  { %3552 = vmatpush3.bf16.xpose.msra.mxu0 %v1142_v50  ;;  %v793_v50 = vadd.f32 %v4511_v51, %v625_v47  ;;  %v616_v47 = vld [vmem:[%s5761_s25 + $0x170] sm:$0xff] }
 0x180   :  { %3553 = vmatprep.subr.bf16.mxu0 %v4317_v9  ;;  %v784_v56 = vadd.f32 %v4502_v45, %v616_v47  ;;  %v635_v45 = vld [vmem:[%s5761_s25 + $0x208] sm:$0xff] }
 0x181   :  { %4059 = vtanh.f32 %v793_v50  ;;  %v632_v50 = vld [vmem:[%s5761_s25 + $0x1f0] sm:$0xff]  ;;  %v655_v47 = vld [vmem:[%s5761_s25 + $0x2a8] sm:$0xff] }
 0x182   :  { %4061 = vtanh.f32 %v778_v0 }
 0x183   :  { %v4052_v2 = vpop.eup %4051  ;;  %4063 = vtanh.f32 %v779_v3 }
 0x184   :  { %v1021_v7 = vpack.c.bf16 %v4052_v2, %v4050_v62  ;;  %v4054_v10 = vpop.eup %4053  ;;  %4065 = vtanh.f32 %v794_v5  ;;  %v800_v62 = vadd.f32 %v4511_v51, %v632_v50  ;;  %v823_v50 = vadd.f32 %v4513_v52, %v655_v47 }
 0x185   :  { %3534 = vmatpush3.bf16.xpose.msra.mxu1 %v1081_v1  ;;  %v627_v1 = vld [vmem:[%s5761_s25 + $0x1c8] sm:$0xff]  ;;  %v4056_v13 = vpop.eup %4055 }
 0x186   :  { %3535 = vmatprep.subr.bf16.mxu1 %v4317_v9  ;;  %v4058_v16 = vpop.eup %4057  ;;  %v1261_v17 = vsel %vm476_vm0, %v1021_v7, 0  ;;  %v1014_v22 = vpack.c.bf16 %v4056_v13, %v4054_v10 }
 0x187   :  { %3554 = vmatpush3.bf16.xpose.msra.mxu0 %v1145_v6  ;;  %v795_v6 = vadd.f32 %v4511_v51, %v627_v1  ;;  %v634_v1 = vld [vmem:[%s5761_s25 + $0x200] sm:$0xff] }
 0x188   :  { %3555 = vmatprep.subr.bf16.mxu0 %v4317_v9  ;;  %v1200_v28 = vsel %vm476_vm0, %v1014_v22, 0  ;;  %v802_v7 = vadd.f32 %v4504_v46, %v634_v1  ;;  %v652_v22 = vld [vmem:[%s5761_s25 + $0x290] sm:$0xff]  ;;  %v657_v1 = vld [vmem:[%s5761_s25 + $0x2b8] sm:$0xff] }
 0x189   :  { %4067 = vtanh.f32 %v795_v6 }
 0x18a   :  { %4069 = vtanh.f32 %v780_v18 }
 0x18b   :  { %v4060_v20 = vpop.eup %4059  ;;  %4071 = vtanh.f32 %v781_v21 }
 0x18c   :  { %v1022_v25 = vpack.c.bf16 %v4060_v20, %v4058_v16  ;;  %v4062_v27 = vpop.eup %4061  ;;  %4073 = vtanh.f32 %v796_v23  ;;  %v637_v20 = vld [vmem:[%s5761_s25 + $0x218] sm:$0xff] }
 0x18d   :  { %3536 = vmatpush3.bf16.xpose.msra.mxu1 %v1084_v19  ;;  %v629_v19 = vld [vmem:[%s5761_s25 + $0x1d8] sm:$0xff]  ;;  %v4064_v30 = vpop.eup %4063 }
 0x18e   :  { %3561 = vmatprep.subr.bf16.mxu1 %v4317_v9  ;;  %v4066_v33 = vpop.eup %4065  ;;  %v1264_v34 = vsel %vm476_vm0, %v1022_v25, 0  ;;  %v1015_v40 = vpack.c.bf16 %v4064_v30, %v4062_v27  ;;  %v820_v30 = vadd.f32 %v4513_v52, %v652_v22 }
 0x18f   :  { %3556 = vmatpush3.bf16.xpose.msra.mxu0 %v1148_v24  ;;  %v797_v24 = vadd.f32 %v4511_v51, %v629_v19 }
 0x190   :  { %3581 = vmatprep.subr.bf16.mxu0 %v4317_v9  ;;  %v1203_v48 = vsel %vm476_vm0, %v1015_v40, 0  ;;  %v654_v40 = vld [vmem:[%s5761_s25 + $0x2a0] sm:$0xff] }
 0x191   :  { %4075 = vtanh.f32 %v797_v24 }
 0x192   :  { %4077 = vtanh.f32 %v782_v35 }
 0x193   :  { %v4068_v38 = vpop.eup %4067  ;;  %4079 = vtanh.f32 %v783_v39 }
 0x194   :  { %3538 = vmatmul.mubr.msk.bf16.vlgmr.msra.gmra.mrb[0].mxu1 %vm476_vm0, %v4709_v31  ;;  %v1023_v44 = vpack.c.bf16 %v4068_v38, %v4066_v33  ;;  %v4070_v37 = vpop.eup %4069  ;;  %4081 = vtanh.f32 %v798_v42  ;;  %v639_v38 = vld [vmem:[%s5761_s25 + $0x228] sm:$0xff] }
 0x195   :  { %3562 = vmatpush3.bf16.xpose.msra.mxu1 %v1191_v36  ;;  %3577 = vmatprep.mubr.msk.bf16.mxu1 %vm4318_vm1, %v4317_v9  ;;  %v631_v36 = vld [vmem:[%s5761_s25 + $0x1e8] sm:$0xff]  ;;  %v4072_v49 = vpop.eup %4071 }
 0x196   :  { %3558 = vmatmul.mubr.msk.bf16.vlgmr.msra.gmra.mrb[4].mxu0 %vm476_vm0, %v4709_v31  ;;  %3563 = vmatprep.subr.bf16.mxu1 %v4317_v9  ;;  %v4074_v54 = vpop.eup %4073  ;;  %v1267_v55 = vsel %vm476_vm0, %v1023_v44, 0  ;;  %v1016_v61 = vpack.c.bf16 %v4072_v49, %v4070_v37  ;;  %v822_v49 = vadd.f32 %v4513_v52, %v654_v40 }
 0x197   :  { %3582 = vmatpush3.bf16.xpose.msra.mxu0 %v1255_v43  ;;  %3597 = vmatprep.mubr.msk.bf16.mxu0 %vm4318_vm1, %v4317_v9  ;;  %v799_v43 = vadd.f32 %v4511_v51, %v631_v36 }
 0x198   :  { %3583 = vmatprep.subr.bf16.mxu0 %v4317_v9  ;;  %v1206_v3 = vsel %vm476_vm0, %v1016_v61, 0  ;;  %v656_v61 = vld [vmem:[%s5761_s25 + $0x2b0] sm:$0xff] }
 0x199   :  { %4083 = vtanh.f32 %v799_v43 }
 0x19a   :  { %4085 = vtanh.f32 %v784_v56 }
 0x19b   :  { %v4076_v58 = vpop.eup %4075  ;;  %4087 = vtanh.f32 %v785_v60 }
 0x19c   :  { %v1024_v0 = vpack.c.bf16 %v4076_v58, %v4074_v54  ;;  %v4078_v2 = vpop.eup %4077  ;;  %4089 = vtanh.f32 %v800_v62  ;;  %v641_v58 = vld [vmem:[%s5761_s25 + $0x238] sm:$0xff] }
 0x19d   :  { %3564 = vmatpush3.bf16.xpose.msra.mxu1 %v1194_v57  ;;  %v633_v57 = vld [vmem:[%s5761_s25 + $0x1f8] sm:$0xff]  ;;  %v4080_v4 = vpop.eup %4079 }
 0x19e   :  { %3565 = vmatprep.subr.bf16.mxu1 %v4317_v9  ;;  %v4082_v5 = vpop.eup %4081  ;;  %v1270_v6 = vsel %vm476_vm0, %v1024_v0, 0  ;;  %v1017_v12 = vpack.c.bf16 %v4080_v4, %v4078_v2  ;;  %v824_v4 = vadd.f32 %v4513_v52, %v656_v61 }
 0x19f   :  { %3584 = vmatpush3.bf16.xpose.msra.mxu0 %v1258_v63  ;;  %v801_v63 = vadd.f32 %v4511_v51, %v633_v57  ;;  %v650_v51 = vld [vmem:[%s5761_s25 + $0x280] sm:$0xff] }
 0x1a0   :  { %3585 = vmatprep.subr.bf16.mxu0 %v4317_v9  ;;  %v818_v13 = vadd.f32 %v4513_v52, %v650_v51  ;;  %v1209_v19 = vsel %vm476_vm0, %v1017_v12, 0  ;;  %v825_v51 = vadd.f32 %v4513_v52, %v657_v1  ;;  %v658_v12 = vld [vmem:[%s5761_s25 + $0x2c0] sm:$0xff] }
 0x1a1   :  { %4091 = vtanh.f32 %v801_v63 }
 0x1a2   :  { %4093 = vtanh.f32 %v802_v7 }
 0x1a3   :  { %v4084_v10 = vpop.eup %4083 }
 0x1a4   :  { %v1025_v16 = vpack.c.bf16 %v4084_v10, %v4082_v5  ;;  %v4086_v18 = vpop.eup %4085  ;;  %v643_v10 = vld [vmem:[%s5761_s25 + $0x248] sm:$0xff] }
 0x1a5   :  { %3566 = vmatpush3.bf16.xpose.msra.mxu1 %v1197_v11  ;;  %v803_v11 = vadd.f32 %v4504_v46, %v635_v45  ;;  %v4088_v21 = vpop.eup %4087 }
 0x1a6   :  { %3567 = vmatprep.subr.bf16.mxu1 %v4317_v9  ;;  %v4090_v23 = vpop.eup %4089  ;;  %v1273_v24 = vsel %vm476_vm0, %v1025_v16, 0  ;;  %v1018_v29 = vpack.c.bf16 %v4088_v21, %v4086_v18  ;;  %v826_v21 = vadd.f32 %v4513_v52, %v658_v12 }
 0x1a7   :  { %3586 = vmatpush3.bf16.xpose.msra.mxu0 %v1261_v17  ;;  %4095 = vtanh.f32 %v803_v11  ;;  %v636_v17 = vld [vmem:[%s5761_s25 + $0x210] sm:$0xff] }
 0x1a8   :  { %3587 = vmatprep.subr.bf16.mxu0 %v4317_v9  ;;  %4097 = vtanh.f32 %v818_v13  ;;  %v804_v25 = vadd.f32 %v4504_v46, %v636_v17  ;;  %v1212_v36 = vsel %vm476_vm0, %v1018_v29, 0  ;;  %v659_v17 = vld [vmem:[%s5761_s25 + $0x2c8] sm:$0xff]  ;;  %v660_v29 = vld [vmem:[%s5761_s25 + $0x2d0] sm:$0xff] }
 0x1a9   :  { %4099 = vtanh.f32 %v819_v14  ;;  %v827_v22 = vadd.f32 %v4513_v52, %v659_v17 }
 0x1aa   :  { %4101 = vtanh.f32 %v804_v25 }
 0x1ab   :  { %v4092_v27 = vpop.eup %4091 }
 0x1ac   :  { %v1026_v33 = vpack.c.bf16 %v4092_v27, %v4090_v23  ;;  %v4094_v35 = vpop.eup %4093  ;;  %v645_v27 = vld [vmem:[%s5761_s25 + $0x258] sm:$0xff] }
 0x1ad   :  { %3568 = vmatpush3.bf16.xpose.msra.mxu1 %v1200_v28  ;;  %v805_v28 = vadd.f32 %v4504_v46, %v637_v20 }
 0x1ae   :  { %3569 = vmatprep.subr.bf16.mxu1 %v4317_v9  ;;  %v1276_v43 = vsel %vm476_vm0, %v1026_v33, 0 }
 0x1af   :  { %3588 = vmatpush3.bf16.xpose.msra.mxu0 %v1264_v34  ;;  %4103 = vtanh.f32 %v805_v28  ;;  %v638_v34 = vld [vmem:[%s5761_s25 + $0x220] sm:$0xff] }
 0x1b0   :  { %3589 = vmatprep.subr.bf16.mxu0 %v4317_v9  ;;  %4105 = vtanh.f32 %v820_v30  ;;  %v806_v44 = vadd.f32 %v4504_v46, %v638_v34  ;;  %v661_v34 = vld [vmem:[%s5761_s25 + $0x2d8] sm:$0xff] }
 0x1b1   :  { %v4096_v39 = vpop.eup %4095  ;;  %4107 = vtanh.f32 %v821_v32  ;;  %v829_v40 = vadd.f32 %v4513_v52, %v661_v34 }
 0x1b2   :  { %v4098_v42 = vpop.eup %4097  ;;  %v1027_v41 = vpack.c.bf16 %v4096_v39, %v4094_v35  ;;  %4109 = vtanh.f32 %v806_v44  ;;  %v828_v39 = vadd.f32 %v4513_v52, %v660_v29  ;;  %v668_v29 = vld [vmem:[%s5761_s25 + $0x310] sm:$0xff] }
 0x1b3   :  { %v4100_v37 = vpop.eup %4099 }
 0x1b4   :  { %v1035_v54 = vpack.c.bf16 %v4100_v37, %v4098_v42  ;;  %v4102_v56 = vpop.eup %4101  ;;  %v1319_v57 = vsel %vm476_vm0, %v1027_v41, 0  ;;  %v647_v37 = vld [vmem:[%s5761_s25 + $0x268] sm:$0xff]  ;;  %v662_v41 = vld [vmem:[%s5761_s25 + $0x2e0] sm:$0xff] }
 0x1b5   :  { %3570 = vmatpush3.bf16.xpose.msra.mxu1 %v1203_v48  ;;  %v807_v48 = vadd.f32 %v4504_v46, %v639_v38 }
 0x1b6   :  { %3571 = vmatprep.subr.bf16.mxu1 %v4317_v9  ;;  %v1383_v63 = vsel %vm476_vm0, %v1035_v54, 0 }
 0x1b7   :  { %3590 = vmatpush3.bf16.xpose.msra.mxu0 %v1267_v55  ;;  %4111 = vtanh.f32 %v807_v48  ;;  %v640_v55 = vld [vmem:[%s5761_s25 + $0x230] sm:$0xff] }
 0x1b8   :  { %3591 = vmatprep.subr.bf16.mxu0 %v4317_v9  ;;  %4113 = vtanh.f32 %v822_v49  ;;  %v808_v0 = vadd.f32 %v4504_v46, %v640_v55  ;;  %v663_v55 = vld [vmem:[%s5761_s25 + $0x2e8] sm:$0xff] }
 0x1b9   :  { %v4104_v60 = vpop.eup %4103  ;;  %4115 = vtanh.f32 %v823_v50  ;;  %v831_v61 = vadd.f32 %v4513_v52, %v663_v55 }
 0x1ba   :  { %v4106_v62 = vpop.eup %4105  ;;  %v1028_v45 = vpack.c.bf16 %v4104_v60, %v4102_v56  ;;  %4117 = vtanh.f32 %v808_v0  ;;  %v830_v60 = vadd.f32 %v4513_v52, %v662_v41  ;;  %v670_v41 = vld [vmem:[%s5761_s25 + $0x320] sm:$0xff] }
 0x1bb   :  { %v4108_v2 = vpop.eup %4107 }
 0x1bc   :  { %v1036_v5 = vpack.c.bf16 %v4108_v2, %v4106_v62  ;;  %v4110_v7 = vpop.eup %4109  ;;  %v1322_v8 = vsel %vm476_vm0, %v1028_v45, 0  ;;  %v649_v2 = vld [vmem:[%s5761_s25 + $0x278] sm:$0xff]  ;;  %v664_v45 = vld [vmem:[%s5761_s25 + $0x2f0] sm:$0xff] }
 0x1bd   :  { %3572 = vmatpush3.bf16.xpose.msra.mxu1 %v1206_v3  ;;  %v809_v3 = vadd.f32 %v4504_v46, %v641_v58 }
 0x1be   :  { %3573 = vmatprep.subr.bf16.mxu1 %v4317_v9  ;;  %v1386_v14 = vsel %vm476_vm0, %v1036_v5, 0 }
 0x1bf   :  { %3592 = vmatpush3.bf16.xpose.msra.mxu0 %v1270_v6  ;;  %4119 = vtanh.f32 %v809_v3  ;;  %v642_v6 = vld [vmem:[%s5761_s25 + $0x240] sm:$0xff] }
 0x1c0   :  { %3593 = vmatprep.subr.bf16.mxu0 %v4317_v9  ;;  %4121 = vtanh.f32 %v824_v4  ;;  %v810_v16 = vadd.f32 %v4504_v46, %v642_v6  ;;  %v665_v6 = vld [vmem:[%s5761_s25 + $0x2f8] sm:$0xff] }
 0x1c1   :  { %v4112_v11 = vpop.eup %4111  ;;  %4123 = vtanh.f32 %v825_v51  ;;  %v833_v12 = vadd.f32 %v4513_v52, %v665_v6 }
 0x1c2   :  { %v4114_v13 = vpop.eup %4113  ;;  %v1029_v20 = vpack.c.bf16 %v4112_v11, %v4110_v7  ;;  %4125 = vtanh.f32 %v810_v16  ;;  %v832_v11 = vadd.f32 %v4513_v52, %v664_v45  ;;  %v682_v52 = vld [vmem:[%s5761_s25 + $0x380] sm:$0xff]  ;;  %v672_v45 = vld [vmem:[%s5761_s25 + $0x330] sm:$0xff] }
 0x1c3   :  { %v4116_v18 = vpop.eup %4115 }
 0x1c4   :  { %v1037_v23 = vpack.c.bf16 %v4116_v18, %v4114_v13  ;;  %v4118_v25 = vpop.eup %4117  ;;  %v1325_v26 = vsel %vm476_vm0, %v1029_v20, 0 }
 0x1c5   :  { %3574 = vmatpush3.bf16.xpose.msra.mxu1 %v1209_v19  ;;  %v811_v19 = vadd.f32 %v4504_v46, %v643_v10 }
 0x1c6   :  { %3575 = vmatprep.subr.bf16.mxu1 %v4317_v9  ;;  %v1389_v32 = vsel %vm476_vm0, %v1037_v23, 0 }
 0x1c7   :  { %3594 = vmatpush3.bf16.xpose.msra.mxu0 %v1273_v24  ;;  %4127 = vtanh.f32 %v811_v19  ;;  %v644_v24 = vld [vmem:[%s5761_s25 + $0x250] sm:$0xff] }
 0x1c8   :  { %3595 = vmatprep.subr.bf16.mxu0 %v4317_v9  ;;  %4129 = vtanh.f32 %v826_v21  ;;  %v812_v33 = vadd.f32 %v4504_v46, %v644_v24 }
 0x1c9   :  { %v4120_v28 = vpop.eup %4119  ;;  %4131 = vtanh.f32 %v827_v22  ;;  %v683_v22 = vld [vmem:[%s5761_s25 + $0x388] sm:$0xff] }
 0x1ca   :  { %v4122_v30 = vpop.eup %4121  ;;  %v1030_v38 = vpack.c.bf16 %v4120_v28, %v4118_v25  ;;  %4133 = vtanh.f32 %v812_v33  ;;  %v669_v33 = vld [vmem:[%s5761_s25 + $0x318] sm:$0xff] }
 0x1cb   :  { %v4124_v35 = vpop.eup %4123 }
 0x1cc   :  { %v1038_v42 = vpack.c.bf16 %v4124_v35, %v4122_v30  ;;  %v4126_v44 = vpop.eup %4125  ;;  %v1328_v47 = vsel %vm476_vm0, %v1030_v38, 0  ;;  %v684_v35 = vld [vmem:[%s5761_s25 + $0x390] sm:$0xff] }
 0x1cd   :  { %3576 = vmatpush3.bf16.xpose.msra.mxu1 %v1212_v36  ;;  %v813_v36 = vadd.f32 %v4504_v46, %v645_v27  ;;  %v851_v27 = vadd.f32 %v4526_v59, %v683_v22  ;;  %v690_v22 = vld [vmem:[%s5761_s25 + $0x3c0] sm:$0xff] }
 0x1ce   :  { %3601 = vmatprep.subr.bf16.mxu1 %v4317_v9  ;;  %v1392_v50 = vsel %vm476_vm0, %v1038_v42, 0 }
 0x1cf   :  { %3596 = vmatpush3.bf16.xpose.msra.mxu0 %v1276_v43  ;;  %4135 = vtanh.f32 %v813_v36  ;;  %v646_v43 = vld [vmem:[%s5761_s25 + $0x260] sm:$0xff] }
 0x1d0   :  { %3621 = vmatprep.subr.bf16.mxu0 %v4317_v9  ;;  %4137 = vtanh.f32 %v828_v39  ;;  %v814_v54 = vadd.f32 %v4504_v46, %v646_v43  ;;  %v836_v39 = vadd.f32 %v4515_v53, %v668_v29  ;;  %v837_v43 = vadd.f32 %v4515_v53, %v669_v33 }
 0x1d1   :  { %v4128_v48 = vpop.eup %4127  ;;  %4139 = vtanh.f32 %v829_v40  ;;  %v685_v40 = vld [vmem:[%s5761_s25 + $0x398] sm:$0xff] }
 0x1d2   :  { %v4130_v49 = vpop.eup %4129  ;;  %v1031_v58 = vpack.c.bf16 %v4128_v48, %v4126_v44  ;;  %4141 = vtanh.f32 %v814_v54  ;;  %v671_v54 = vld [vmem:[%s5761_s25 + $0x328] sm:$0xff] }
 0x1d3   :  { %v4132_v56 = vpop.eup %4131 }
 0x1d4   :  { %3578 = vmatmul.mubr.msk.bf16.vlgmr.msra.gmra.mrb[4].mxu1 %vm476_vm0, %v4709_v31  ;;  %v1039_v62 = vpack.c.bf16 %v4132_v56, %v4130_v49  ;;  %v4134_v0 = vpop.eup %4133  ;;  %v1331_v1 = vsel %vm476_vm0, %v1031_v58, 0  ;;  %v686_v56 = vld [vmem:[%s5761_s25 + $0x3a0] sm:$0xff] }
 0x1d5   :  { %3602 = vmatpush3.bf16.xpose.msra.mxu1 %v1319_v57  ;;  %3617 = vmatprep.mubr.msk.bf16.mxu1 %vm4318_vm1, %v4317_v9  ;;  %v815_v57 = vadd.f32 %v4504_v46, %v647_v37  ;;  %v853_v37 = vadd.f32 %v4526_v59, %v685_v40  ;;  %v692_v40 = vld [vmem:[%s5761_s25 + $0x3d0] sm:$0xff] }
 0x1d6   :  { %3598 = vmatmul.mubr.msk.bf16.vlgmr.msra.gmra.mrb[8].mxu0 %vm476_vm0, %v4709_v31  ;;  %3603 = vmatprep.subr.bf16.mxu1 %v4317_v9  ;;  %v1395_v51 = vsel %vm476_vm0, %v1039_v62, 0 }
 0x1d7   :  { %3622 = vmatpush3.bf16.xpose.msra.mxu0 %v1383_v63  ;;  %3637 = vmatprep.mubr.msk.bf16.mxu0 %vm4318_vm1, %v4317_v9  ;;  %4143 = vtanh.f32 %v815_v57  ;;  %v648_v63 = vld [vmem:[%s5761_s25 + $0x270] sm:$0xff] }
 0x1d8   :  { %3623 = vmatprep.subr.bf16.mxu0 %v4317_v9  ;;  %4145 = vtanh.f32 %v830_v60  ;;  %v816_v5 = vadd.f32 %v4504_v46, %v648_v63  ;;  %v838_v60 = vadd.f32 %v4515_v53, %v670_v41  ;;  %v839_v63 = vadd.f32 %v4515_v53, %v671_v54 }
 0x1d9   :  { %v4136_v3 = vpop.eup %4135  ;;  %4147 = vtanh.f32 %v831_v61  ;;  %v687_v61 = vld [vmem:[%s5761_s25 + $0x3a8] sm:$0xff] }
 0x1da   :  { %v4138_v4 = vpop.eup %4137  ;;  %v1032_v10 = vpack.c.bf16 %v4136_v3, %v4134_v0  ;;  %4149 = vtanh.f32 %v816_v5  ;;  %v673_v5 = vld [vmem:[%s5761_s25 + $0x338] sm:$0xff] }
 0x1db   :  { %v4140_v7 = vpop.eup %4139 }
 0x1dc   :  { %v1040_v13 = vpack.c.bf16 %v4140_v7, %v4138_v4  ;;  %v4142_v16 = vpop.eup %4141  ;;  %v1334_v17 = vsel %vm476_vm0, %v1032_v10, 0  ;;  %v688_v7 = vld [vmem:[%s5761_s25 + $0x3b0] sm:$0xff] }
 0x1dd   :  { %3604 = vmatpush3.bf16.xpose.msra.mxu1 %v1322_v8  ;;  %v817_v8 = vadd.f32 %v4504_v46, %v649_v2  ;;  %v667_v46 = vld [vmem:[%s5761_s25 + $0x308] sm:$0xff]  ;;  %v855_v2 = vadd.f32 %v4526_v59, %v687_v61  ;;  %v694_v61 = vld [vmem:[%s5761_s25 + $0x3e0] sm:$0xff] }
 0x1de   :  { %3605 = vmatprep.subr.bf16.mxu1 %v4317_v9  ;;  %v1398_v20 = vsel %vm476_vm0, %v1040_v13, 0  ;;  %v835_v24 = vadd.f32 %v4515_v53, %v667_v46 }
 0x1df   :  { %3624 = vmatpush3.bf16.xpose.msra.mxu0 %v1386_v14  ;;  %4151 = vtanh.f32 %v817_v8  ;;  %v666_v14 = vld [vmem:[%s5761_s25 + $0x300] sm:$0xff] }
 0x1e0   :  { %3625 = vmatprep.subr.bf16.mxu0 %v4317_v9  ;;  %4153 = vtanh.f32 %v832_v11  ;;  %v834_v21 = vadd.f32 %v4515_v53, %v666_v14  ;;  %v840_v11 = vadd.f32 %v4515_v53, %v672_v45  ;;  %v841_v14 = vadd.f32 %v4515_v53, %v673_v5 }
 0x1e1   :  { %v4144_v18 = vpop.eup %4143  ;;  %4155 = vtanh.f32 %v833_v12  ;;  %v689_v12 = vld [vmem:[%s5761_s25 + $0x3b8] sm:$0xff] }
 0x1e2   :  { %v4146_v19 = vpop.eup %4145  ;;  %v1033_v25 = vpack.c.bf16 %v4144_v18, %v4142_v16  ;;  %4157 = vtanh.f32 %v834_v21  ;;  %v674_v18 = vld [vmem:[%s5761_s25 + $0x340] sm:$0xff] }
 0x1e3   :  { %v4148_v23 = vpop.eup %4147  ;;  %4159 = vtanh.f32 %v835_v24 }
 0x1e4   :  { %v1041_v28 = vpack.c.bf16 %v4148_v23, %v4146_v19  ;;  %v4150_v30 = vpop.eup %4149 }
 0x1e5   :  { %3606 = vmatpush3.bf16.xpose.msra.mxu1 %v1325_v26  ;;  %v850_v26 = vadd.f32 %v4526_v59, %v682_v52 }
 0x1e6   :  { %3607 = vmatprep.subr.bf16.mxu1 %v4317_v9  ;;  %v1401_v38 = vsel %vm476_vm0, %v1041_v28, 0 }
 0x1e7   :  { %3626 = vmatpush3.bf16.xpose.msra.mxu0 %v1389_v32  ;;  %v1337_v32 = vsel %vm476_vm0, %v1033_v25, 0  ;;  %4161 = vtanh.f32 %v850_v26  ;;  %v842_v25 = vadd.f32 %v4515_v53, %v674_v18  ;;  %v691_v26 = vld [vmem:[%s5761_s25 + $0x3c8] sm:$0xff] }
 0x1e8   :  { %3627 = vmatprep.subr.bf16.mxu0 %v4317_v9  ;;  %4163 = vtanh.f32 %v851_v27 }
 0x1e9   :  { %v4152_v34 = vpop.eup %4151  ;;  %4165 = vtanh.f32 %v836_v39 }
 0x1ea   :  { %v4154_v36 = vpop.eup %4153  ;;  %v1034_v44 = vpack.c.bf16 %v4152_v34, %v4150_v30  ;;  %4167 = vtanh.f32 %v837_v43  ;;  %v858_v30 = vadd.f32 %v4526_v59, %v690_v22  ;;  %v676_v34 = vld [vmem:[%s5761_s25 + $0x350] sm:$0xff] }
 0x1eb   :  { %v4156_v42 = vpop.eup %4155 }
 0x1ec   :  { %v1042_v48 = vpack.c.bf16 %v4156_v42, %v4154_v36  ;;  %v4158_v49 = vpop.eup %4157 }
 0x1ed   :  { %3608 = vmatpush3.bf16.xpose.msra.mxu1 %v1328_v47  ;;  %v852_v47 = vadd.f32 %v4526_v59, %v684_v35  ;;  %v4160_v55 = vpop.eup %4159 }
 0x1ee   :  { %3609 = vmatprep.subr.bf16.mxu1 %v4317_v9  ;;  %v1404_v58 = vsel %vm476_vm0, %v1042_v48, 0  ;;  %v1043_v0 = vpack.c.bf16 %v4160_v55, %v4158_v49  ;;  %v860_v49 = vadd.f32 %v4526_v59, %v692_v40  ;;  %v678_v55 = vld [vmem:[%s5761_s25 + $0x360] sm:$0xff]  ;;  %v5178_v40 = vand.u32 127, %v525_v15 }
 0x1ef   :  { %3628 = vmatpush3.bf16.xpose.msra.mxu0 %v1392_v50  ;;  %v1340_v50 = vsel %vm476_vm0, %v1034_v44, 0  ;;  %4169 = vtanh.f32 %v852_v47  ;;  %v844_v44 = vadd.f32 %v4515_v53, %v676_v34  ;;  %v693_v47 = vld [vmem:[%s5761_s25 + $0x3d8] sm:$0xff] }
 0x1f0   :  { %3629 = vmatprep.subr.bf16.mxu0 %v4317_v9  ;;  %4171 = vtanh.f32 %v853_v37  ;;  %vm1576_vm2 = vcmp.lt.s32.totalorder %v5178_v40, 8 }
 0x1f1   :  { %v4162_v57 = vpop.eup %4161  ;;  %4173 = vtanh.f32 %v838_v60 }
 0x1f2   :  { %v4164_v62 = vpop.eup %4163  ;;  %4175 = vtanh.f32 %v839_v63 }
 0x1f3   :  { %v1051_v3 = vpack.c.bf16 %v4164_v62, %v4162_v57  ;;  %v4166_v4 = vpop.eup %4165 }
 0x1f4   :  { %v4168_v6 = vpop.eup %4167 }
 0x1f5   :  { %3610 = vmatpush3.bf16.xpose.msra.mxu1 %v1331_v1  ;;  %v854_v1 = vadd.f32 %v4526_v59, %v686_v56  ;;  %v1511_v10 = vsel %vm476_vm0, %v1051_v3, 0  ;;  %v1044_v16 = vpack.c.bf16 %v4168_v6, %v4166_v4  ;;  %v862_v4 = vadd.f32 %v4526_v59, %v694_v61  ;;  %v680_v6 = vld [vmem:[%s5761_s25 + $0x370] sm:$0xff] }
 0x1f6   :  { %3611 = vmatprep.subr.bf16.mxu1 %v4317_v9 }
 0x1f7   :  { %3630 = vmatpush3.bf16.xpose.msra.mxu0 %v1395_v51  ;;  %v1447_v51 = vsel %vm476_vm0, %v1043_v0, 0  ;;  %4177 = vtanh.f32 %v854_v1  ;;  %v1450_v19 = vsel %vm476_vm0, %v1044_v16, 0  ;;  %v846_v0 = vadd.f32 %v4515_v53, %v678_v55  ;;  %v695_v1 = vld [vmem:[%s5761_s25 + $0x3e8] sm:$0xff] }
 0x1f8   :  { %3631 = vmatprep.subr.bf16.mxu0 %v4317_v9  ;;  %4179 = vtanh.f32 %v855_v2  ;;  %v848_v16 = vadd.f32 %v4515_v53, %v680_v6 }
 0x1f9   :  { %v4170_v8 = vpop.eup %4169  ;;  %4181 = vtanh.f32 %v840_v11 }
 0x1fa   :  { %v4172_v13 = vpop.eup %4171  ;;  %4183 = vtanh.f32 %v841_v14 }
 0x1fb   :  { %v1052_v46 = vpack.c.bf16 %v4172_v13, %v4170_v8  ;;  %v4174_v52 = vpop.eup %4173 }
 0x1fc   :  { %v4176_v21 = vpop.eup %4175 }
 0x1fd   :  { %3612 = vmatpush3.bf16.xpose.msra.mxu1 %v1334_v17  ;;  %v857_v17 = vadd.f32 %v4526_v59, %v689_v12  ;;  %v1514_v24 = vsel %vm476_vm0, %v1052_v46, 0  ;;  %v1045_v29 = vpack.c.bf16 %v4176_v21, %v4174_v52  ;;  %v696_v12 = vld [vmem:[%s5761_s25 + $0x3f0] sm:$0xff] }
 0x1fe   :  { %3613 = vmatprep.subr.bf16.mxu1 %v4317_v9  ;;  %v864_v52 = vadd.f32 %v4526_v59, %v696_v12 }
 0x1ff   :  { %3632 = vmatpush3.bf16.xpose.msra.mxu0 %v1398_v20  ;;  %v675_v20 = vld [vmem:[%s5761_s25 + $0x348] sm:$0xff]  ;;  %v1453_v36 = vsel %vm476_vm0, %v1045_v29, 0 }
 0x200   :  { %3633 = vmatprep.subr.bf16.mxu0 %v4317_v9  ;;  %v843_v28 = vadd.f32 %v4515_v53, %v675_v20 }
 0x201   :  { %v4178_v23 = vpop.eup %4177 }
 0x202   :  { %v4180_v27 = vpop.eup %4179 }
 0x203   :  { %v1053_v33 = vpack.c.bf16 %v4180_v27, %v4178_v23  ;;  %v4182_v35 = vpop.eup %4181 }
 0x204   :  { %v4184_v39 = vpop.eup %4183 }
 0x205   :  { %3614 = vmatpush3.bf16.xpose.msra.mxu1 %v1337_v32  ;;  %v859_v32 = vadd.f32 %v4526_v59, %v691_v26  ;;  %v1517_v43 = vsel %vm476_vm0, %v1053_v33, 0  ;;  %v1046_v41 = vpack.c.bf16 %v4184_v39, %v4182_v35  ;;  %v4253_v39 = vld [vmem:[%s5733_s8] sm:$0x1] }
 0x206   :  { %3615 = vmatprep.subr.bf16.mxu1 %v4317_v9 }
 0x207   :  { %3634 = vmatpush3.bf16.xpose.msra.mxu0 %v1401_v38  ;;  %v677_v38 = vld [vmem:[%s5761_s25 + $0x358] sm:$0xff]  ;;  %v1456_v57 = vsel %vm476_vm0, %v1046_v41, 0 }
 0x208   :  { %3635 = vmatprep.subr.bf16.mxu0 %v4317_v9  ;;  %v845_v48 = vadd.f32 %v4515_v53, %v677_v38 }
 0x20d   :  { %3616 = vmatpush3.bf16.xpose.msra.mxu1 %v1340_v50  ;;  %v861_v50 = vadd.f32 %v4526_v59, %v693_v47 }
 0x20e   :  { %3641 = vmatprep.subr.bf16.mxu1 %v4317_v9 }
 0x20f   :  { %3636 = vmatpush3.bf16.xpose.msra.mxu0 %v1404_v58  ;;  %v679_v58 = vld [vmem:[%s5761_s25 + $0x368] sm:$0xff] }
 0x210   :  { %3661 = vmatprep.subr.bf16.mxu0 %v4317_v9  ;;  %v847_v3 = vadd.f32 %v4515_v53, %v679_v58 }
 0x214   :  { %3618 = vmatmul.mubr.msk.bf16.vlgmr.msra.gmra.mrb[8].mxu1 %vm476_vm0, %v4709_v31 }
 0x215   :  { %3642 = vmatpush3.bf16.xpose.msra.mxu1 %v1447_v51  ;;  %3657 = vmatprep.mubr.msk.bf16.mxu1 %vm4318_vm1, %v4317_v9  ;;  %v863_v51 = vadd.f32 %v4526_v59, %v695_v1 }
 0x216   :  { %3638 = vmatmul.mubr.msk.bf16.vlgmr.msra.gmra.mrb[12].mxu0 %vm476_vm0, %v4709_v31  ;;  %3643 = vmatprep.subr.bf16.mxu1 %v4317_v9  ;;  %v856_v31 = vadd.f32 %v4526_v59, %v688_v7 }
 0x217   :  { %3662 = vmatpush3.bf16.xpose.msra.mxu0 %v1511_v10  ;;  %3677 = vmatprep.mubr.msk.bf16.mxu0 %vm4318_vm1, %v4317_v9  ;;  %v681_v10 = vld [vmem:[%s5761_s25 + $0x378] sm:$0xff] }
 0x218   :  { %3663 = vmatprep.subr.bf16.mxu0 %v4317_v9  ;;  %4185 = vtanh.f32 %v856_v31  ;;  %v697_v31 = vld [vmem:[%s5761_s25 + $0x3f8] sm:$0xff]  ;;  %v849_v46 = vadd.f32 %v4515_v53, %v681_v10 }
 0x219   :  { %4187 = vtanh.f32 %v857_v17 }
 0x21a   :  { %4189 = vtanh.f32 %v842_v25 }
 0x21b   :  { %4191 = vtanh.f32 %v843_v28 }
 0x21c   :  { %4193 = vtanh.f32 %v858_v30 }
 0x21d   :  { %3644 = vmatpush3.bf16.xpose.msra.mxu1 %v1450_v19  ;;  %4195 = vtanh.f32 %v859_v32  ;;  %v865_v19 = vadd.f32 %v4526_v59, %v697_v31 }
 0x21e   :  { %3645 = vmatprep.subr.bf16.mxu1 %v4317_v9  ;;  %4197 = vtanh.f32 %v844_v44 }
 0x21f   :  { %3664 = vmatpush3.bf16.xpose.msra.mxu0 %v1514_v24  ;;  %4199 = vtanh.f32 %v845_v48 }
 0x220   :  { %3665 = vmatprep.subr.bf16.mxu0 %v4317_v9  ;;  %4201 = vtanh.f32 %v860_v49 }
 0x221   :  { %4203 = vtanh.f32 %v861_v50 }
 0x222   :  { %v4186_v42 = vpop.eup %4185  ;;  %4205 = vtanh.f32 %v846_v0 }
 0x223   :  { %v4188_v37 = vpop.eup %4187  ;;  %4207 = vtanh.f32 %v847_v3 }
 0x224   :  { %v1054_v54 = vpack.c.bf16 %v4188_v37, %v4186_v42  ;;  %v4190_v56 = vpop.eup %4189  ;;  %4209 = vtanh.f32 %v862_v4 }
 0x225   :  { %3646 = vmatpush3.bf16.xpose.msra.mxu1 %v1453_v36  ;;  %v4192_v60 = vpop.eup %4191  ;;  %4211 = vtanh.f32 %v863_v51 }
 0x226   :  { %3647 = vmatprep.subr.bf16.mxu1 %v4317_v9  ;;  %v4194_v62 = vpop.eup %4193  ;;  %v1520_v63 = vsel %vm476_vm0, %v1054_v54, 0  ;;  %v1047_v45 = vpack.c.bf16 %v4192_v60, %v4190_v56  ;;  %4213 = vtanh.f32 %v848_v16 }
 0x227   :  { %3666 = vmatpush3.bf16.xpose.msra.mxu0 %v1517_v43  ;;  %v4196_v2 = vpop.eup %4195  ;;  %4215 = vtanh.f32 %v849_v46 }
 0x228   :  { %3667 = vmatprep.subr.bf16.mxu0 %v4317_v9  ;;  %v1055_v5 = vpack.c.bf16 %v4196_v2, %v4194_v62  ;;  %v4198_v7 = vpop.eup %4197  ;;  %v1459_v8 = vsel %vm476_vm0, %v1047_v45, 0  ;;  %4217 = vtanh.f32 %v864_v52 }
 0x229   :  { %v4200_v11 = vpop.eup %4199  ;;  %4219 = vtanh.f32 %v865_v19 }
 0x22a   :  { %v4202_v13 = vpop.eup %4201  ;;  %v1523_v14 = vsel %vm476_vm0, %v1055_v5, 0  ;;  %v1048_v18 = vpack.c.bf16 %v4200_v11, %v4198_v7 }
 0x22b   :  { %v4204_v17 = vpop.eup %4203 }
 0x22c   :  { %v1056_v20 = vpack.c.bf16 %v4204_v17, %v4202_v13  ;;  %v4206_v21 = vpop.eup %4205  ;;  %v1462_v22 = vsel %vm476_vm0, %v1048_v18, 0 }
 0x22d   :  { %3648 = vmatpush3.bf16.xpose.msra.mxu1 %v1456_v57  ;;  %v4208_v23 = vpop.eup %4207 }
 0x22e   :  { %3649 = vmatprep.subr.bf16.mxu1 %v4317_v9  ;;  %v4210_v24 = vpop.eup %4209  ;;  %v1526_v53 = vsel %vm476_vm0, %v1056_v20, 0  ;;  %v1049_v26 = vpack.c.bf16 %v4208_v23, %v4206_v21  ;;  %v3901_v20 = vld [vmem:[%s5762_s27] sm:$0xff]   ;;  %v3902_v23 = vld [vmem:[%s5762_s27 + $0x8] sm:$0xff]  }
 0x22f   :  { %3668 = vmatpush3.bf16.xpose.msra.mxu0 %v1520_v63  ;;  %v4212_v25 = vpop.eup %4211 }
 0x230   :  { %3669 = vmatprep.subr.bf16.mxu0 %v4317_v9  ;;  %v1057_v59 = vpack.c.bf16 %v4212_v25, %v4210_v24  ;;  %v4214_v27 = vpop.eup %4213  ;;  %v1465_v28 = vsel %vm476_vm0, %v1049_v26, 0  ;;  %v3903_v24 = vld [vmem:[%s5762_s27 + $0x40] sm:$0xff]   ;;  %v3904_v25 = vld [vmem:[%s5762_s27 + $0x10] sm:$0xff]   ;;  %v3905_v26 = vld [vmem:[%s5762_s27 + $0x48] sm:$0xff]  }
 0x231   :  { %v4216_v29 = vpop.eup %4215 }
 0x232   :  { %v4218_v30 = vpop.eup %4217  ;;  %v1529_v32 = vsel %vm476_vm0, %v1057_v59, 0  ;;  %v1050_v34 = vpack.c.bf16 %v4216_v29, %v4214_v27  ;;  %v3906_v27 = vld [vmem:[%s5762_s27 + $0x18] sm:$0xff]   ;;  %v3908_v29 = vld [vmem:[%s5762_s27 + $0x20] sm:$0xff]  }
 0x233   :  { %v4220_v33 = vpop.eup %4219 }
 0x234   :  { %v1058_v35 = vpack.c.bf16 %v4220_v33, %v4218_v30  ;;  %v1468_v36 = vsel %vm476_vm0, %v1050_v34, 0  ;;  %v3909_v30 = vld [vmem:[%s5762_s27 + $0x58] sm:$0xff]   ;;  %v3911_v33 = vld [vmem:[%s5762_s27 + $0x60] sm:$0xff]   ;;  %v3912_v34 = vld [vmem:[%s5762_s27 + $0x30] sm:$0xff]  }
 0x235   :  { %3650 = vmatpush3.bf16.xpose.msra.mxu1 %v1459_v8 }
 0x236   :  { %3651 = vmatprep.subr.bf16.mxu1 %v4317_v9  ;;  %v1532_v38 = vsel %vm476_vm0, %v1058_v35, 0  ;;  %v3913_v35 = vld [vmem:[%s5762_s27 + $0x68] sm:$0xff]  }
 0x237   :  { %3670 = vmatpush3.bf16.xpose.msra.mxu0 %v1523_v14 }
 0x238   :  { %3671 = vmatprep.subr.bf16.mxu0 %v4317_v9 }
 0x23d   :  { %3652 = vmatpush3.bf16.xpose.msra.mxu1 %v1462_v22 }
 0x23e   :  { %3653 = vmatprep.subr.bf16.mxu1 %v4317_v9 }
 0x23f   :  { %3672 = vmatpush3.bf16.xpose.msra.mxu0 %v1526_v53 }
 0x240   :  { %3673 = vmatprep.subr.bf16.mxu0 %v4317_v9 }
 0x245   :  { %3654 = vmatpush3.bf16.xpose.msra.mxu1 %v1465_v28  ;;  %v3907_v28 = vld [vmem:[%s5762_s27 + $0x50] sm:$0xff]  }
 0x246   :  { %3655 = vmatprep.subr.bf16.mxu1 %v4317_v9 }
 0x247   :  { %3674 = vmatpush3.bf16.xpose.msra.mxu0 %v1529_v32  ;;  %v3910_v32 = vld [vmem:[%s5762_s27 + $0x28] sm:$0xff]  }
 0x248   :  { %3675 = vmatprep.subr.bf16.mxu0 %v4317_v9 }
 0x24d   :  { %3656 = vmatpush3.bf16.xpose.msra.mxu1 %v1468_v36  ;;  %v3914_v36 = vld [vmem:[%s5762_s27 + $0x38] sm:$0xff]  }
 0x24e   :  { %3681 = vmatprep.subr.bf16.mxu1 %v4317_v9 }
 0x24f   :  { %3676 = vmatpush3.bf16.xpose.msra.mxu0 %v1532_v38  ;;  %v3915_v38 = vld [vmem:[%s5762_s27 + $0x70] sm:$0xff]  }
 0x250   :  { %3701 = vmatprep.subr.bf16.mxu0 %v4317_v9 }
 0x254   :  { %3658 = vmatmul.mubr.msk.bf16.vlgmr.msra.gmra.mrb[12].mxu1 %vm476_vm0, %v4253_v39 }
 0x255   :  { %3697 = vmatprep.mubr.msk.bf16.mxu1 %vm4318_vm1, %v4317_v9  ;;  %3682 = vmatpush3.bf16.msra.mxu1 %v3901_v20 }
 0x256   :  { %3678 = vmatmul.mubr.msk.bf16.vlgmr.msra.gmra.mrb[16].mxu0 %vm476_vm0, %v4253_v39  ;;  %3683 = vmatprep.subr.bf16.mxu1 %v4317_v9  ;;  %v3916_v39 = vld [vmem:[%s5762_s27 + $0x78] sm:$0xff]  }
 0x257   :  { %3717 = vmatprep.mubr.msk.bf16.mxu0 %vm4318_vm1, %v4317_v9  ;;  %3702 = vmatpush3.bf16.msra.mxu0 %v3903_v24  ;;  %v3923_v24 = vld [vmem:[%s5762_s27 + $0xd0] sm:$0xff]  }
 0x258   :  { %3703 = vmatprep.subr.bf16.mxu0 %v4317_v9 }
 0x259   :  { %3684 = vmatpush3.bf16.msra.mxu1 %v3902_v23  ;;  %v3922_v23 = vld [vmem:[%s5762_s27 + $0x98] sm:$0xff]  }
 0x25a   :  { %3685 = vmatprep.subr.bf16.mxu1 %v4317_v9 }
 0x25b   :  { %3704 = vmatpush3.bf16.msra.mxu0 %v3905_v26  ;;  %v3926_v26 = vld [vmem:[%s5762_s27 + $0xa8] sm:$0xff]  }
 0x25c   :  { %3705 = vmatprep.subr.bf16.mxu0 %v4317_v9 }
 0x25d   :  { %3686 = vmatpush3.bf16.msra.mxu1 %v3904_v25  ;;  %v3925_v25 = vld [vmem:[%s5762_s27 + $0xd8] sm:$0xff]  }
 0x25e   :  { %3687 = vmatprep.subr.bf16.mxu1 %v4317_v9 }
 0x25f   :  { %3706 = vmatpush3.bf16.msra.mxu0 %v3907_v28 }
 0x260   :  { %3707 = vmatprep.subr.bf16.mxu0 %v4317_v9 }
 0x261   :  { %3688 = vmatpush3.bf16.msra.mxu1 %v3906_v27 }
 0x262   :  { %3689 = vmatprep.subr.bf16.mxu1 %v4317_v9 }
 0x263   :  { %3708 = vmatpush3.bf16.msra.mxu0 %v3909_v30 }
 0x264   :  { %3709 = vmatprep.subr.bf16.mxu0 %v4317_v9 }
 0x265   :  { %3690 = vmatpush3.bf16.msra.mxu1 %v3908_v29 }
 0x266   :  { %3691 = vmatprep.subr.bf16.mxu1 %v4317_v9 }
 0x267   :  { %v1120_v42 = vpop.f32.mrb[0].mxu1  ;;  %3710 = vmatpush3.bf16.msra.mxu0 %v3911_v33  ;;  %v3928_v33 = vld [vmem:[%s5762_s27 + $0xb0] sm:$0xff]  }
 0x268   :  { %v1577_v43 = vsel %vm1576_vm2, %v1120_v42, -1e+30  ;;  %v3539_v44 = vpop.f32.mrb[1].mxu1  ;;  %3711 = vmatprep.subr.bf16.mxu0 %v4317_v9 }
 0x269   :  { %v1123_v47 = vpop.f32.mrb[2].mxu1  ;;  %v1184_v37 = vpop.f32.mrb[4].mxu0  ;;  %v1586_v48 = vsel %vm1585_vm3, %v1577_v43, -inf  ;;  %3692 = vmatpush3.bf16.msra.mxu1 %v3910_v32 }
 0x26a   :  { %v1578_v41 = vsel %vm1576_vm2, %v1184_v37, -1e+30  ;;  %1587 = vmax.xlane.f32.xlu0 %v1586_v48  ;;  %v3540_v49 = vpop.f32.mrb[3].mxu1  ;;  %v3559_v50 = vpop.f32.mrb[5].mxu0  ;;  %3693 = vmatprep.subr.bf16.mxu1 %v4317_v9 }
 0x26b   :  { %v1187_v15 = vpop.f32.mrb[6].mxu0  ;;  %v1589_v54 = vsel %vm1585_vm3, %v1578_v41, -inf  ;;  %3712 = vmatpush3.bf16.msra.mxu0 %v3913_v35 }
 0x26c   :  { %v3560_v55 = vpop.f32.mrb[7].mxu0  ;;  %3713 = vmatprep.subr.bf16.mxu0 %v4317_v9 }
 0x26d   :  { %3694 = vmatpush3.bf16.msra.mxu1 %v3912_v34  ;;  %v3929_v34 = vld [vmem:[%s5762_s27 + $0xe8] sm:$0xff]  }
 0x26e   :  { %1590 = vmax.xlane.f32.xlu0 %v1589_v54  ;;  %3695 = vmatprep.subr.bf16.mxu1 %v4317_v9 }
 0x26f   :  { %3714 = vmatpush3.bf16.msra.mxu0 %v3915_v38  ;;  %v3931_v38 = vld [vmem:[%s5762_s27 + $0xf0] sm:$0xff]  }
 0x270   :  { %3715 = vmatprep.subr.bf16.mxu0 %v4317_v9 }
 0x271   :  { %3696 = vmatpush3.bf16.msra.mxu1 %v3914_v36  ;;  %v3930_v36 = vld [vmem:[%s5762_s27 + $0xb8] sm:$0xff]  }
 0x272   :  { %3721 = vmatprep.subr.bf16.mxu1 %v4317_v9 }
 0x273   :  { %3716 = vmatpush3.bf16.msra.mxu0 %v3916_v39  ;;  %v3932_v39 = vld [vmem:[%s5762_s27 + $0xf8] sm:$0xff]  }
 0x274   :  { %3741 = vmatprep.subr.bf16.mxu0 %v4317_v9 }
 0x2a7   :  { %v1248_v56 = vpop.f32.mrb[4].mxu1 }
 0x2a8   :  { %v5189_v57 = vsel %vm1576_vm2, %v1248_v56, -1e+30  ;;  %v3579_v58 = vpop.f32.mrb[5].mxu1 }
 0x2a9   :  { %v1251_v60 = vpop.f32.mrb[6].mxu1  ;;  %v1312_v61 = vpop.f32.mrb[8].mxu0  ;;  %v1592_v62 = vsel %vm1585_vm3, %v5189_v57, -inf }
 0x2aa   :  { %v5195_v63 = vsel %vm1576_vm2, %v1312_v61, -1e+30  ;;  %1593 = vmax.xlane.f32.xlu1 %v1592_v62  ;;  %v3580_v0 = vpop.f32.mrb[7].mxu1  ;;  %v3599_v1 = vpop.f32.mrb[9].mxu0 }
 0x2ab   :  { %v1315_v2 = vpop.f32.mrb[10].mxu0  ;;  %v1595_v3 = vsel %vm1585_vm3, %v5195_v63, -inf }
 0x2ac   :  { %v3600_v45 = vpop.f32.mrb[11].mxu0 }
 0x2ae   :  { %1596 = vmax.xlane.f32.xlu1 %v1595_v3 }
 0x2e7   :  { %v1376_v4 = vpop.f32.mrb[8].mxu1 }
 0x2e8   :  { %v5201_v51 = vsel %vm1576_vm2, %v1376_v4, -1e+30  ;;  %v3619_v5 = vpop.f32.mrb[9].mxu1 }
 0x2e9   :  { %v1379_v6 = vpop.f32.mrb[10].mxu1  ;;  %v1440_v7 = vpop.f32.mrb[12].mxu0  ;;  %v1598_v8 = vsel %vm1585_vm3, %v5201_v51, -inf }
 0x2ea   :  { %v5207_v10 = vsel %vm1576_vm2, %v1440_v7, -1e+30  ;;  %v3620_v11 = vpop.f32.mrb[11].mxu1  ;;  %1599 = vmax.xlane.f32.xlu0 %v1598_v8  ;;  %v3639_v12 = vpop.f32.mrb[13].mxu0 }
 0x2eb   :  { %v1443_v13 = vpop.f32.mrb[14].mxu0  ;;  %v1601_v14 = vsel %vm1585_vm3, %v5207_v10, -inf }
 0x2ec   :  { %1602 = vmax.xlane.f32.xlu1 %v1601_v14  ;;  %v3640_v16 = vpop.f32.mrb[15].mxu0 }
 0x2f7   :  { %v1588_v31 = vpop.xlane.xlu0 %1587 }
 0x2f8   :  { %v1610_v17 = vsub.f32 %v1577_v43, %v1588_v31  ;;  %v3917_v31 = vld [vmem:[%s5762_s27 + $0x80] sm:$0xff]  }
 0x2fa   :  { %v1618_v46 = vmul.f32 1.442695, %v1610_v17 }
 0x2fb   :  { %v1591_v18 = vpop.xlane.xlu0 %1590 }
 0x2fc   :  { %4221 = vpow2.f32 %v1618_v46  ;;  %v1611_v52 = vsub.f32 %v1578_v41, %v1591_v18 }
 0x2fe   :  { %v1620_v19 = vmul.f32 1.442695, %v1611_v52  ;;  %v3918_v52 = vld [vmem:[%s5762_s27 + $0x88] sm:$0xff]  }
 0x300   :  { %4223 = vpow2.f32 %v1620_v19  ;;  %v3919_v19 = vld [vmem:[%s5762_s27 + $0xc0] sm:$0xff]  }
 0x306   :  { %v5215_v21 = vpop.eup %4221 }
 0x307   :  { %v1634_v22 = vsel %vm1585_vm3, %v5215_v21, 0.0 }
 0x308   :  { %1635 = vadd.xlane.f32.xlu0 %v1634_v22  ;;  %v3921_v22 = vld [vmem:[%s5762_s27 + $0xc8] sm:$0xff]  }
 0x30a   :  { %v5225_v53 = vpop.eup %4223 }
 0x30b   :  { %v1637_v59 = vsel %vm1585_vm3, %v5225_v53, 0.0 }
 0x30c   :  { %1638 = vadd.xlane.f32.xlu1 %v1637_v59  ;;  %v3927_v59 = vld [vmem:[%s5762_s27 + $0xe0] sm:$0xff]  }
 0x327   :  { %v1504_v42 = vpop.f32.mrb[12].mxu1 }
 0x328   :  { %v5284_v43 = vsel %vm1576_vm2, %v1504_v42, -1e+30  ;;  %v3659_v44 = vpop.f32.mrb[13].mxu1 }
 0x329   :  { %v1507_v47 = vpop.f32.mrb[14].mxu1  ;;  %v1568_v37 = vpop.f32.mrb[16].mxu0  ;;  %v1604_v48 = vsel %vm1585_vm3, %v5284_v43, -inf }
 0x32a   :  { %v5291_v41 = vsel %vm1576_vm2, %v1568_v37, -1e+30  ;;  %v3660_v49 = vpop.f32.mrb[15].mxu1  ;;  %1605 = vmax.xlane.f32.xlu0 %v1604_v48  ;;  %v3679_v50 = vpop.f32.mrb[17].mxu0 }
 0x32b   :  { %v1571_v15 = vpop.f32.mrb[18].mxu0  ;;  %v1607_v54 = vsel %vm1585_vm3, %v5291_v41, -inf  ;;  %v3933_v50 = vld [vmem:[%s5762_s27 + $0x100] sm:$0xff]  }
 0x32c   :  { %1608 = vmax.xlane.f32.xlu1 %v1607_v54  ;;  %v3680_v55 = vpop.f32.mrb[19].mxu0 }
 0x337   :  { %v1594_v56 = vpop.xlane.xlu1 %1593 }
 0x338   :  { %v1612_v58 = vsub.f32 %v5189_v57, %v1594_v56  ;;  %v3934_v56 = vld [vmem:[%s5762_s27 + $0x140] sm:$0xff]  }
 0x33a   :  { %v1622_v60 = vmul.f32 1.442695, %v1612_v58  ;;  %v3935_v58 = vld [vmem:[%s5762_s27 + $0x108] sm:$0xff]  }
 0x33b   :  { %v1597_v61 = vpop.xlane.xlu1 %1596 }
 0x33c   :  { %4225 = vpow2.f32 %v1622_v60  ;;  %v1613_v62 = vsub.f32 %v5195_v63, %v1597_v61  ;;  %v3936_v61 = vld [vmem:[%s5762_s27 + $0x148] sm:$0xff]  }
 0x33e   :  { %v1624_v0 = vmul.f32 1.442695, %v1613_v62  ;;  %v3937_v62 = vld [vmem:[%s5762_s27 + $0x110] sm:$0xff]  }
 0x340   :  { %4227 = vpow2.f32 %v1624_v0  ;;  %v3938_v0 = vld [vmem:[%s5762_s27 + $0x150] sm:$0xff]  }
 0x346   :  { %v5297_v1 = vpop.eup %4225 }
 0x347   :  { %v1640_v2 = vsel %vm1585_vm3, %v5297_v1, 0.0 }
 0x348   :  { %1641 = vadd.xlane.f32.xlu0 %v1640_v2  ;;  %v3940_v2 = vld [vmem:[%s5762_s27 + $0x158] sm:$0xff]  }
 0x34a   :  { %v5301_v3 = vpop.eup %4227 }
 0x34b   :  { %v1643_v45 = vsel %vm1585_vm3, %v5301_v3, 0.0 }
 0x34c   :  { %1644 = vadd.xlane.f32.xlu1 %v1643_v45  ;;  %v3942_v45 = vld [vmem:[%s5762_s27 + $0x160] sm:$0xff]  }
 0x377   :  { %v1600_v57 = vpop.xlane.xlu0 %1599 }
 0x378   :  { %v1614_v4 = vsub.f32 %v5201_v51, %v1600_v57  ;;  %v3943_v57 = vld [vmem:[%s5762_s27 + $0x128] sm:$0xff]  }
 0x379   :  { %v1603_v5 = vpop.xlane.xlu1 %1602 }
 0x37a   :  { %v1626_v6 = vmul.f32 1.442695, %v1614_v4  ;;  %v1615_v63 = vsub.f32 %v5207_v10, %v1603_v5  ;;  %v3944_v4 = vld [vmem:[%s5762_s27 + $0x168] sm:$0xff]   ;;  %v3945_v5 = vld [vmem:[%s5762_s27 + $0x130] sm:$0xff]  }
 0x37c   :  { %4229 = vpow2.f32 %v1626_v6  ;;  %v1628_v7 = vmul.f32 1.442695, %v1615_v63  ;;  %v3946_v6 = vld [vmem:[%s5762_s27 + $0x170] sm:$0xff]   ;;  %v3947_v63 = vld [vmem:[%s5762_s27 + $0x138] sm:$0xff]  }
 0x37e   :  { %4231 = vpow2.f32 %v1628_v7  ;;  %v3948_v7 = vld [vmem:[%s5762_s27 + $0x178] sm:$0xff]  }
 0x386   :  { %v5307_v8 = vpop.eup %4229 }
 0x387   :  { %v1646_v11 = vsel %vm1585_vm3, %v5307_v8, 0.0 }
 0x388   :  { %v5311_v12 = vpop.eup %4231  ;;  %1647 = vadd.xlane.f32.xlu0 %v1646_v11 }
 0x389   :  { %v1649_v13 = vsel %vm1585_vm3, %v5311_v12, 0.0 }
 0x38a   :  { %1650 = vadd.xlane.f32.xlu1 %v1649_v13 }
 0x395   :  { %v1636_v51 = vpop.xlane.xlu0 %1635 }
 0x396   :  { %4233 = vrcp.f32 %v1636_v51 }
 0x399   :  { %v1639_v14 = vpop.xlane.xlu1 %1638 }
 0x39a   :  { %4235 = vrcp.f32 %v1639_v14 }
 0x3a0   :  { %v4234_v10 = vpop.eup %4233 }
 0x3a1   :  { %v1666_v16 = vmul.f32 %v4234_v10, %v5215_v21  ;;  %v3920_v21 = vld [vmem:[%s5762_s27 + $0x90] sm:$0xff]  }
 0x3a3   :  { %1674 = vst [vmem:[%s5746_s21] sm:$0x1] %v1666_v16  ;;  %v1682_v17 = vpack.c.bf16 %v1666_v16, %v1666_v16  ;;  %v3949_v16 = vld [vmem:[%s5762_s27 + $0x180] sm:$0xff]  }
 0x3a4   :  { %v4236_v46 = vpop.eup %4235 }
 0x3a5   :  { %3698 = vmatmul.mubr.bf16.vlgmr.msra.gmra.mrb[16].mxu1 %v1682_v17  ;;  %v1667_v18 = vmul.f32 %v4236_v46, %v5225_v53  ;;  %v3924_v53 = vld [vmem:[%s5762_s27 + $0xa0] sm:$0xff]  }
 0x3a6   :  { %3722 = vmatpush3.bf16.msra.mxu1 %v3917_v31  ;;  %3737 = vmatprep.mubr.msk.bf16.mxu1 %vm4318_vm1, %v4317_v9  ;;  %v3950_v46 = vld [vmem:[%s5762_s27 + $0x1c0] sm:$0xff]  }
 0x3a7   :  { %1675 = vst [vmem:[%s5746_s21 + $0x1] sm:$0x1] %v1667_v18  ;;  %v1683_v20 = vpack.c.bf16 %v1667_v18, %v1667_v18  ;;  %3723 = vmatprep.subr.bf16.mxu1 %v4317_v9  ;;  %v3951_v18 = vld [vmem:[%s5762_s27 + $0x188] sm:$0xff]  }
 0x3a9   :  { %3718 = vmatmul.mubr.bf16.vlgmr.msra.gmra.mrb[20].mxu0 %v1683_v20  ;;  %v3955_v20 = vld [vmem:[%s5762_s27 + $0x198] sm:$0xff]  }
 0x3aa   :  { %3724 = vmatpush3.bf16.msra.mxu1 %v3918_v52  ;;  %3742 = vmatpush3.bf16.msra.mxu0 %v3919_v19  ;;  %v3953_v52 = vld [vmem:[%s5762_s27 + $0x190] sm:$0xff]  }
 0x3ab   :  { %3725 = vmatprep.subr.bf16.mxu1 %v4317_v9  ;;  %3743 = vmatprep.subr.bf16.mxu0 %v4317_v9  ;;  %v3954_v19 = vld [vmem:[%s5762_s27 + $0x1d0] sm:$0xff]  }
 0x3ac   :  { %3757 = vmatprep.mubr.msk.bf16.mxu0 %vm4318_vm1, %v4317_v9 }
 0x3ae   :  { %3726 = vmatpush3.bf16.msra.mxu1 %v3920_v21  ;;  %3744 = vmatpush3.bf16.msra.mxu0 %v3921_v22  ;;  %v3956_v21 = vld [vmem:[%s5762_s27 + $0x1d8] sm:$0xff]   ;;  %v3957_v22 = vld [vmem:[%s5762_s27 + $0x1a0] sm:$0xff]  }
 0x3af   :  { %3727 = vmatprep.subr.bf16.mxu1 %v4317_v9  ;;  %3745 = vmatprep.subr.bf16.mxu0 %v4317_v9 }
 0x3b2   :  { %3728 = vmatpush3.bf16.msra.mxu1 %v3922_v23  ;;  %3746 = vmatpush3.bf16.msra.mxu0 %v3923_v24  ;;  %v3958_v23 = vld [vmem:[%s5762_s27 + $0x1e0] sm:$0xff]   ;;  %v3959_v24 = vld [vmem:[%s5762_s27 + $0x1a8] sm:$0xff]  }
 0x3b3   :  { %3729 = vmatprep.subr.bf16.mxu1 %v4317_v9  ;;  %3747 = vmatprep.subr.bf16.mxu0 %v4317_v9 }
 0x3b6   :  { %3730 = vmatpush3.bf16.msra.mxu1 %v3924_v53  ;;  %3748 = vmatpush3.bf16.msra.mxu0 %v3925_v25  ;;  %v3960_v53 = vld [vmem:[%s5762_s27 + $0x1e8] sm:$0xff]   ;;  %v3961_v25 = vld [vmem:[%s5762_s27 + $0x1b0] sm:$0xff]  }
 0x3b7   :  { %v1606_v27 = vpop.xlane.xlu0 %1605  ;;  %3731 = vmatprep.subr.bf16.mxu1 %v4317_v9  ;;  %3749 = vmatprep.subr.bf16.mxu0 %v4317_v9 }
 0x3b8   :  { %v1616_v28 = vsub.f32 %v5284_v43, %v1606_v27  ;;  %v3964_v27 = vld [vmem:[%s5762_s27 + $0x1f8] sm:$0xff]  }
 0x3b9   :  { %v1609_v29 = vpop.xlane.xlu1 %1608 }
 0x3ba   :  { %v1630_v30 = vmul.f32 1.442695, %v1616_v28  ;;  %v1617_v32 = vsub.f32 %v5291_v41, %v1609_v29  ;;  %3732 = vmatpush3.bf16.msra.mxu1 %v3926_v26  ;;  %3750 = vmatpush3.bf16.msra.mxu0 %v3927_v59  ;;  %v3962_v26 = vld [vmem:[%s5762_s27 + $0x1f0] sm:$0xff]   ;;  %v3963_v59 = vld [vmem:[%s5762_s27 + $0x1b8] sm:$0xff]  }
 0x3bb   :  { %3733 = vmatprep.subr.bf16.mxu1 %v4317_v9  ;;  %3751 = vmatprep.subr.bf16.mxu0 %v4317_v9 }
 0x3bc   :  { %4237 = vpow2.f32 %v1630_v30  ;;  %v1632_v35 = vmul.f32 1.442695, %v1617_v32 }
 0x3be   :  { %4239 = vpow2.f32 %v1632_v35  ;;  %3734 = vmatpush3.bf16.msra.mxu1 %v3928_v33  ;;  %3752 = vmatpush3.bf16.msra.mxu0 %v3929_v34 }
 0x3bf   :  { %3735 = vmatprep.subr.bf16.mxu1 %v4317_v9  ;;  %3753 = vmatprep.subr.bf16.mxu0 %v4317_v9 }
 0x3c2   :  { %3736 = vmatpush3.bf16.msra.mxu1 %v3930_v36  ;;  %3754 = vmatpush3.bf16.msra.mxu0 %v3931_v38 }
 0x3c3   :  { %3755 = vmatprep.subr.bf16.mxu0 %v4317_v9  ;;  %3761 = vmatprep.subr.bf16.mxu1 %v4317_v9 }
 0x3c6   :  { %v5392_v42 = vpop.eup %4237  ;;  %3756 = vmatpush3.bf16.msra.mxu0 %v3932_v39 }
 0x3c7   :  { %v1652_v43 = vsel %vm1585_vm3, %v5392_v42, 0.0  ;;  %3781 = vmatprep.subr.bf16.mxu0 %v4317_v9 }
 0x3c8   :  { %v5397_v44 = vpop.eup %4239  ;;  %1653 = vadd.xlane.f32.xlu0 %v1652_v43 }
 0x3c9   :  { %v1655_v47 = vsel %vm1585_vm3, %v5397_v44, 0.0 }
 0x3ca   :  { %1656 = vadd.xlane.f32.xlu1 %v1655_v47 }
 0x3d5   :  { %v1642_v37 = vpop.xlane.xlu0 %1641 }
 0x3d6   :  { %4241 = vrcp.f32 %v1642_v37 }
 0x3d9   :  { %v1645_v48 = vpop.xlane.xlu1 %1644 }
 0x3da   :  { %4243 = vrcp.f32 %v1645_v48 }
 0x3e0   :  { %v4242_v41 = vpop.eup %4241 }
 0x3e1   :  { %v1668_v49 = vmul.f32 %v4242_v41, %v5297_v1  ;;  %v3939_v1 = vld [vmem:[%s5762_s27 + $0x118] sm:$0xff]  }
 0x3e3   :  { %1676 = vst [vmem:[%s5746_s21 + $0x2] sm:$0x1] %v1668_v49  ;;  %v1684_v15 = vpack.c.bf16 %v1668_v49, %v1668_v49 }
 0x3e4   :  { %v4244_v54 = vpop.eup %4243 }
 0x3e5   :  { %3738 = vmatmul.mubr.bf16.vlgmr.msra.gmra.mrb[20].mxu1 %v1684_v15  ;;  %v1669_v55 = vmul.f32 %v4244_v54, %v5301_v3  ;;  %v3941_v3 = vld [vmem:[%s5762_s27 + $0x120] sm:$0xff]  }
 0x3e6   :  { %3762 = vmatpush3.bf16.msra.mxu1 %v3933_v50  ;;  %3777 = vmatprep.mubr.msk.bf16.mxu1 %vm4318_vm1, %v4317_v9 }
 0x3e7   :  { %1677 = vst [vmem:[%s5746_s21 + $0x3] sm:$0x1] %v1669_v55  ;;  %v1685_v60 = vpack.c.bf16 %v1669_v55, %v1669_v55  ;;  %3763 = vmatprep.subr.bf16.mxu1 %v4317_v9 }
 0x3e9   :  { %3758 = vmatmul.mubr.bf16.vlgmr.msra.gmra.mrb[24].mxu0 %v1685_v60 }
 0x3ea   :  { %3782 = vmatpush3.bf16.msra.mxu0 %v3934_v56  ;;  %3764 = vmatpush3.bf16.msra.mxu1 %v3935_v58 }
 0x3eb   :  { %3783 = vmatprep.subr.bf16.mxu0 %v4317_v9  ;;  %3765 = vmatprep.subr.bf16.mxu1 %v4317_v9 }
 0x3ec   :  { %3797 = vmatprep.mubr.msk.bf16.mxu0 %vm4318_vm1, %v4317_v9 }
 0x3ee   :  { %3784 = vmatpush3.bf16.msra.mxu0 %v3936_v61  ;;  %3766 = vmatpush3.bf16.msra.mxu1 %v3937_v62 }
 0x3ef   :  { %3785 = vmatprep.subr.bf16.mxu0 %v4317_v9  ;;  %3767 = vmatprep.subr.bf16.mxu1 %v4317_v9 }
 0x3f2   :  { %3786 = vmatpush3.bf16.msra.mxu0 %v3938_v0  ;;  %3768 = vmatpush3.bf16.msra.mxu1 %v3939_v1 }
 0x3f3   :  { %3787 = vmatprep.subr.bf16.mxu0 %v4317_v9  ;;  %3769 = vmatprep.subr.bf16.mxu1 %v4317_v9 }
 0x3f6   :  { %3788 = vmatpush3.bf16.msra.mxu0 %v3940_v2  ;;  %3770 = vmatpush3.bf16.msra.mxu1 %v3941_v3 }
 0x3f7   :  { %3789 = vmatprep.subr.bf16.mxu0 %v4317_v9  ;;  %3771 = vmatprep.subr.bf16.mxu1 %v4317_v9 }
 0x3fa   :  { %3790 = vmatpush3.bf16.msra.mxu0 %v3942_v45  ;;  %3772 = vmatpush3.bf16.msra.mxu1 %v3943_v57 }
 0x3fb   :  { %3791 = vmatprep.subr.bf16.mxu0 %v4317_v9  ;;  %3773 = vmatprep.subr.bf16.mxu1 %v4317_v9 }
 0x3fe   :  { %3792 = vmatpush3.bf16.msra.mxu0 %v3944_v4  ;;  %3774 = vmatpush3.bf16.msra.mxu1 %v3945_v5 }
 0x3ff   :  { %3793 = vmatprep.subr.bf16.mxu0 %v4317_v9  ;;  %3775 = vmatprep.subr.bf16.mxu1 %v4317_v9 }
 0x402   :  { %3794 = vmatpush3.bf16.msra.mxu0 %v3946_v6  ;;  %3776 = vmatpush3.bf16.msra.mxu1 %v3947_v63 }
 0x403   :  { %3795 = vmatprep.subr.bf16.mxu0 %v4317_v9  ;;  %3801 = vmatprep.subr.bf16.mxu1 %v4317_v9 }
 0x406   :  { %3796 = vmatpush3.bf16.msra.mxu0 %v3948_v7 }
 0x407   :  { %3821 = vmatprep.subr.bf16.mxu0 %v4317_v9 }
 0x415   :  { %v1648_v11 = vpop.xlane.xlu0 %1647 }
 0x416   :  { %4245 = vrcp.f32 %v1648_v11 }
 0x417   :  { %v1651_v13 = vpop.xlane.xlu1 %1650 }
 0x418   :  { %4247 = vrcp.f32 %v1651_v13 }
 0x420   :  { %v4246_v51 = vpop.eup %4245 }
 0x421   :  { %v1670_v14 = vmul.f32 %v4246_v51, %v5307_v8 }
 0x422   :  { %v4248_v10 = vpop.eup %4247 }
 0x423   :  { %1678 = vst [vmem:[%s5746_s21 + $0x4] sm:$0x1] %v1670_v14  ;;  %v1686_v31 = vpack.c.bf16 %v1670_v14, %v1670_v14  ;;  %v1671_v17 = vmul.f32 %v4248_v10, %v5311_v12  ;;  %v3952_v12 = vld [vmem:[%s5762_s27 + $0x1c8] sm:$0xff]  }
 0x425   :  { %3778 = vmatmul.mubr.bf16.vlgmr.msra.gmra.mrb[24].mxu1 %v1686_v31  ;;  %1679 = vst [vmem:[%s5746_s21 + $0x5] sm:$0x1] %v1671_v17  ;;  %v1687_v8 = vpack.c.bf16 %v1671_v17, %v1671_v17 }
 0x426   :  { %3802 = vmatpush3.bf16.msra.mxu1 %v3949_v16  ;;  %3817 = vmatprep.mubr.msk.bf16.mxu1 %vm4318_vm1, %v4317_v9 }
 0x427   :  { %3798 = vmatmul.mubr.bf16.vlgmr.msra.gmra.mrb[28].mxu0 %v1687_v8  ;;  %3803 = vmatprep.subr.bf16.mxu1 %v4317_v9 }
 0x428   :  { %3822 = vmatpush3.bf16.msra.mxu0 %v3950_v46  ;;  %3837 = vmatprep.mubr.msk.bf16.mxu0 %vm4318_vm1, %v4317_v9 }
 0x429   :  { %3823 = vmatprep.subr.bf16.mxu0 %v4317_v9 }
 0x42a   :  { %3804 = vmatpush3.bf16.msra.mxu1 %v3951_v18 }
 0x42b   :  { %3805 = vmatprep.subr.bf16.mxu1 %v4317_v9 }
 0x42c   :  { %3824 = vmatpush3.bf16.msra.mxu0 %v3952_v12 }
 0x42d   :  { %3825 = vmatprep.subr.bf16.mxu0 %v4317_v9 }
 0x42e   :  { %3806 = vmatpush3.bf16.msra.mxu1 %v3953_v52 }
 0x42f   :  { %3807 = vmatprep.subr.bf16.mxu1 %v4317_v9 }
 0x430   :  { %3826 = vmatpush3.bf16.msra.mxu0 %v3954_v19 }
 0x431   :  { %3827 = vmatprep.subr.bf16.mxu0 %v4317_v9 }
 0x432   :  { %3808 = vmatpush3.bf16.msra.mxu1 %v3955_v20 }
 0x433   :  { %3809 = vmatprep.subr.bf16.mxu1 %v4317_v9 }
 0x434   :  { %3828 = vmatpush3.bf16.msra.mxu0 %v3956_v21 }
 0x435   :  { %3829 = vmatprep.subr.bf16.mxu0 %v4317_v9 }
 0x436   :  { %3810 = vmatpush3.bf16.msra.mxu1 %v3957_v22 }
 0x437   :  { %3811 = vmatprep.subr.bf16.mxu1 %v4317_v9 }
 0x438   :  { %3830 = vmatpush3.bf16.msra.mxu0 %v3958_v23 }
 0x439   :  { %3831 = vmatprep.subr.bf16.mxu0 %v4317_v9 }
 0x43a   :  { %3812 = vmatpush3.bf16.msra.mxu1 %v3959_v24 }
 0x43b   :  { %3813 = vmatprep.subr.bf16.mxu1 %v4317_v9 }
 0x43c   :  { %3832 = vmatpush3.bf16.msra.mxu0 %v3960_v53 }
 0x43d   :  { %3833 = vmatprep.subr.bf16.mxu0 %v4317_v9 }
 0x43e   :  { %3814 = vmatpush3.bf16.msra.mxu1 %v3961_v25 }
 0x43f   :  { %3815 = vmatprep.subr.bf16.mxu1 %v4317_v9 }
 0x440   :  { %3834 = vmatpush3.bf16.msra.mxu0 %v3962_v26 }
 0x441   :  { %3835 = vmatprep.subr.bf16.mxu0 %v4317_v9 }
 0x442   :  { %3816 = vmatpush3.bf16.msra.mxu1 %v3963_v59 }
 0x444   :  { %3836 = vmatpush3.bf16.msra.mxu0 %v3964_v27 }
 0x455   :  { %v1654_v28 = vpop.xlane.xlu0 %1653 }
 0x456   :  { %4249 = vrcp.f32 %v1654_v28 }
 0x457   :  { %v1657_v29 = vpop.xlane.xlu1 %1656 }
 0x458   :  { %4251 = vrcp.f32 %v1657_v29 }
 0x460   :  { %v4250_v30 = vpop.eup %4249 }
 0x461   :  { %v1672_v32 = vmul.f32 %v4250_v30, %v5392_v42 }
 0x462   :  { %v4252_v33 = vpop.eup %4251 }
 0x463   :  { %1680 = vst [vmem:[%s5746_s21 + $0x6] sm:$0x1] %v1672_v32  ;;  %v1688_v34 = vpack.c.bf16 %v1672_v32, %v1672_v32  ;;  %v1673_v35 = vmul.f32 %v4252_v33, %v5397_v44 }
 0x465   :  { %3818 = vmatmul.mubr.bf16.vlgmr.msra.gmra.mrb[28].mxu1 %v1688_v34  ;;  %1681 = vst [vmem:[%s5746_s21 + $0x7] sm:$0x1] %v1673_v35  ;;  %v1689_v36 = vpack.c.bf16 %v1673_v35, %v1673_v35 }
 0x467   :  { %3838 = vmatmul.mubr.bf16.vlgmr.msra.gmra.mrb[32].mxu0 %v1689_v36 }
 0x478   :  { %v5559_v38 = vpop.f32.mrb[16].mxu1 }
 0x479   :  { %v3699_v39 = vpop.f32.mrb[17].mxu1 }
 0x47a   :  { %v1903_v43 = vpop.f32.mrb[18].mxu1 }
 0x47b   :  { %v3700_v42 = vpop.f32.mrb[19].mxu1 }
 0x47c   :  { %v5561_v47 = vpop.f32.mrb[20].mxu0 }
 0x47d   :  { %v3719_v37 = vpop.f32.mrb[21].mxu0 }
 0x47e   :  { %v1991_v48 = vpop.f32.mrb[22].mxu0 }
 0x47f   :  { %v3720_v41 = vpop.f32.mrb[23].mxu0 }
 0x4b8   :  { %v5563_v49 = vpop.f32.mrb[20].mxu1 }
 0x4b9   :  { %v3739_v44 = vpop.f32.mrb[21].mxu1 }
 0x4ba   :  { %v2079_v50 = vpop.f32.mrb[22].mxu1 }
 0x4bb   :  { %v3740_v15 = vpop.f32.mrb[23].mxu1 }
 0x4bc   :  { %v5565_v54 = vpop.f32.mrb[24].mxu0 }
 0x4bd   :  { %v3759_v55 = vpop.f32.mrb[25].mxu0 }
 0x4be   :  { %v2167_v56 = vpop.f32.mrb[26].mxu0 }
 0x4bf   :  { %v3760_v58 = vpop.f32.mrb[27].mxu0 }
 0x4f8   :  { %v5567_v60 = vpop.f32.mrb[24].mxu1 }
 0x4f9   :  { %v3779_v61 = vpop.f32.mrb[25].mxu1 }
 0x4fa   :  { %v2255_v62 = vpop.f32.mrb[26].mxu1  ;;  %v5569_v0 = vpop.f32.mrb[28].mxu0 }
 0x4fb   :  { %v3780_v1 = vpop.f32.mrb[27].mxu1  ;;  %v3799_v2 = vpop.f32.mrb[29].mxu0 }
 0x4fc   :  { %v2343_v3 = vpop.f32.mrb[30].mxu0 }
 0x4fd   :  { %v3800_v45 = vpop.f32.mrb[31].mxu0 }
 0x538   :  { %v5571_v57 = vpop.f32.mrb[28].mxu1 }
 0x539   :  { %v3819_v4 = vpop.f32.mrb[29].mxu1 }
 0x53a   :  { %v2431_v5 = vpop.f32.mrb[30].mxu1  ;;  %v5573_v6 = vpop.f32.mrb[32].mxu0 }
 0x53b   :  { %v3820_v63 = vpop.f32.mrb[31].mxu1  ;;  %v3839_v7 = vpop.f32.mrb[33].mxu0 }
 0x53c   :  { %v2519_v11 = vpop.f32.mrb[34].mxu0 }
 0x53d   :  { %v3840_v13 = vpop.f32.mrb[35].mxu0 }
 0x53e   :  { %4300 = dma.done.wait [#allocation3], 16 }
 0x53f   :  { %4301 = vsyncadd [#allocation3], 4294967280 }
 0x540   :  { %4302 = dma.done.wait [#allocation3 + $0x1], 16 }
 0x541   :  { %4303 = vsyncadd [#allocation3 + $0x1], 4294967280 }
 0x542   :  { %4304 = dma.done.wait [#allocation3 + $0x2], 16 }
 0x543   :  { %4305 = vsyncadd [#allocation3 + $0x2], 4294967280 }
 0x544   :  { %4306 = dma.done.wait [#allocation3 + $0x3], 16 }
 0x545   :  { %4307 = vsyncadd [#allocation3 + $0x3], 4294967280 }
 0x546   :  { %4308 = dma.done.wait [#allocation3 + $0x4], 16 }
 0x547   :  { %4309 = vsyncadd [#allocation3 + $0x4], 4294967280 }
 0x548   :  { %4310 = dma.done.wait [#allocation3 + $0x5], 16 }
 0x549   :  { %4311 = vsyncadd [#allocation3 + $0x5], 4294967280 }
 0x54a   :  { %4312 = dma.done.wait [#allocation3 + $0x6], 16 }
 0x54b   :  { %4313 = vsyncadd [#allocation3 + $0x6], 4294967280 }
 0x54c   :  { %4314 = dma.done.wait [#allocation3 + $0x7], 16 }
 0x54d   :  { %4315 = vsyncadd [#allocation3 + $0x7], 4294967280  ;;  %3855 = vmatprep.subr.bf16.mxu0 %v4317_v9  ;;  %3859 = vmatprep.mubr.msk.bf16.mxu0 %vm4318_vm1, %v4317_v9  ;;  %s5763_s22 = sld [smem:[#allocation27_spill]]  ;;  %s4320_s23 = smov 32   ;;  %v4254_v14 = vld [vmem:[%s5736_s11] sm:$0xff]   ;;  %v4255_v10 = vld [vmem:[%s5736_s11 + $0x8] sm:$0xff]  }
 0x54e   :  { %3841 = vmatprep.subr.bf16.mxu1 %v4317_v9  ;;  %3851 = vmatprep.mubr.msk.bf16.mxu1 %vm4318_vm1, %v4317_v9  ;;  %v5594_v16 = vld [vmem:[%s5760_s4] sm:$0xff]  ;;  %v4257_v17 = vld [vmem:[%s5734_s9 + $0x8] sm:$0xff]   ;;  %v4258_v8 = vld [vmem:[%s5734_s9 + $0x10] sm:$0xff]   ;;  %v2549_v12 = vrot.slane %v5561_v47, 7  ;;  %vm2550_vm4 = vcmask 1041409   ;;  %v2552_v52 = vrot.slane %v5563_v49, 6 }
 0x54f   :  { %3856 = vmatpush3.bf16.msra.mxu0 %v4254_v14  ;;  %v4256_v31 = vld [vmem:[%s5734_s9] sm:$0xff]   ;;  %v2674_v46 = vpack.c.bf16 %v5594_v16, %v5594_v16  ;;  %v4259_v18 = vld [vmem:[%s5734_s9 + $0x18] sm:$0xff]   ;;  %vm2553_vm5 = vcmask 1042434   ;;  %v2555_v20 = vrot.slane %v5565_v54, 5  ;;  %vm2556_vm6 = vcmask 1043459   ;;  %s4321_s5 = smov 64  }
 0x550   :  { %3857 = vmatprep.subr.bf16.mxu0 %v4317_v9  ;;  %3842 = vmatpush3.bf16.msra.mxu1 %v4256_v31  ;;  %v2551_v19 = vsel %vm2550_vm4, %v2549_v12, %v5559_v38  ;;  %v2558_v22 = vrot.slane %v5567_v60, 4  ;;  %vm2559_vm7 = vcmask 1044484   ;;  %v4260_v24 = vld [vmem:[%s5734_s9 + $0x20] sm:$0xff]   ;;  %v2561_v53 = vrot.slane %v5569_v0, 3  ;;  %v4262_v5 = vld [vmem:[%s5740_s15 + $0x8] sm:$0xff]   ;;  %v4265_v11 = vld [vmem:[%s5738_s13 + $0x10] sm:$0xff]  }
 0x551   :  { %3843 = vmatprep.subr.bf16.mxu1 %v4317_v9  ;;  %v2554_v21 = vsel %vm2553_vm5, %v2552_v52, %v2551_v19  ;;  %vm2562_vm8 = vcmask 1045509   ;;  %v2564_v26 = vrot.slane %v5571_v57, 2  ;;  %vm2565_vm9 = vcmask 1046534   ;;  %v3314_v33 = vld [vmem:[%s5737_s12] ss:$0 sm:$0xff]  ;;  %v4264_v63 = vld [vmem:[%s5738_s13 + $0x8] sm:$0xff]  }
 0x552   :  { %v2557_v23 = vsel %vm2556_vm6, %v2555_v20, %v2554_v21  ;;  %v2567_v27 = vrot.slane %v5573_v6, 1  ;;  %vm2568_vm10 = vcmask 1047559   ;;  %v2539_v43 = vld [vmem:[#allocation2] sm:$0xff]  ;;  %vm2630_vm11 = vcmask 654336   ;;  %v3319_v6 = vld [vmem:[%s5760_s4 + $0x8] sm:$0xff]  ;;  %v4266_v14 = vld [vmem:[%s5738_s13 + $0x18] sm:$0xff]  }
 0x553   :  { %v2540_v51 = vld [vmem:[%s5763_s22] sm:$0xff]  ;;  %3858 = vmatpush3.bf16.msra.mxu0 %v4255_v10  ;;  %v2560_v25 = vsel %vm2559_vm7, %v2558_v22, %v2557_v23  ;;  %v2872_v7 = vpack.c.bf16 %v3319_v6, %v3319_v6  ;;  %s5764_s21 = sld [smem:[#allocation29_spill]]  ;;  %vm3048_vm12 = vcmp.lt.s32.totalorder %v5178_v40, 50 }
 0x554   :  { %2572 = vrot.lane.b32.xlu0 %v2540_v51, %s4320_s23  ;;  %3863 = vmatprep.subr.bf16.mxu0 %v4317_v9  ;;  %v2563_v59 = vsel %vm2562_vm8, %v2561_v53, %v2560_v25  ;;  %v3307_v48 = vld [vmem:[%s5735_s10] ss:$0 sm:$0xff] }
 0x555   :  { %3844 = vmatpush3.bf16.msra.mxu1 %v4257_v17  ;;  %v2566_v28 = vsel %vm2565_vm9, %v2564_v26, %v2563_v59  ;;  %v4261_v57 = vld [vmem:[%s5740_s15] sm:$0xff]  }
 0x556   :  { %3860 = vmatmul.mubr.msk.bf16.vlgmr.msra.gmra.mrb[36].mxu0 %vm476_vm0, %v2674_v46  ;;  %3845 = vmatprep.subr.bf16.mxu1 %v4317_v9  ;;  %v2569_v29 = vsel %vm2568_vm10, %v2567_v27, %v2566_v28  ;;  %v4263_v4 = vld [vmem:[%s5738_s13] sm:$0xff]  }
 0x557   :  { %3873 = vmatprep.mubr.msk.bf16.mxu0 %vm4318_vm1, %v4317_v9  ;;  %3864 = vmatpush3.bf16.msra.mxu0 %v4263_v4  ;;  %v4267_v10 = vld [vmem:[%s5738_s13 + $0x20] sm:$0xff]  }
 0x558   :  { %3865 = vmatprep.subr.bf16.mxu0 %v4317_v9  ;;  %v3327_v17 = vld [vmem:[%s5741_s16] ss:$0 sm:$0xff] }
 0x559   :  { %3846 = vmatpush3.bf16.msra.mxu1 %v4258_v8  ;;  %v3320_v22 = vld [vmem:[%s5764_s21] ss:$0 sm:$0xff] }
 0x55a   :  { %3847 = vmatprep.subr.bf16.mxu1 %v4317_v9 }
 0x55b   :  { %3866 = vmatpush3.bf16.msra.mxu0 %v4264_v63 }
 0x55c   :  { %3867 = vmatprep.subr.bf16.mxu0 %v4317_v9 }
 0x55d   :  { %3848 = vmatpush3.bf16.msra.mxu1 %v4259_v18 }
 0x55e   :  { %3849 = vmatprep.subr.bf16.mxu1 %v4317_v9 }
 0x55f   :  { %3868 = vmatpush3.bf16.msra.mxu0 %v4265_v11 }
 0x560   :  { %3869 = vmatprep.subr.bf16.mxu0 %v4317_v9 }
 0x561   :  { %3850 = vmatpush3.bf16.msra.mxu1 %v4260_v24 }
 0x562   :  { %3877 = vmatprep.subr.bf16.mxu1 %v4317_v9 }
 0x563   :  { %3870 = vmatpush3.bf16.msra.mxu0 %v4266_v14 }
 0x564   :  { %3871 = vmatprep.subr.bf16.mxu0 %v4317_v9 }
 0x567   :  { %3872 = vmatpush3.bf16.msra.mxu0 %v4267_v10 }
 0x5c6   :  { %v2573_v30 = vpop.permute.xlu0 %2572 }
 0x5c7   :  { %v2575_v32 = vsel %vm476_vm0, %v2569_v29, %v2573_v30 }
 0x5c8   :  { %2578 = vrot.lane.b32.xlu0 %v2575_v32, %s4320_s23 }
 0x629   :  { %v2735_v34 = vpop.f32.mrb[36].mxu0 }
 0x62a   :  { %v2736_v35 = vadd.f32 %v3314_v33, %v2735_v34  ;;  %v3861_v36 = vpop.f32.mrb[37].mxu0 }
 0x62b   :  { %v2738_v38 = vpop.f32.mrb[38].mxu0 }
 0x62c   :  { %v3862_v39 = vpop.f32.mrb[39].mxu0  ;;  %2749 = vrot.lane.b32.xlu1 %v2736_v35, %s4321_s5 }
 0x63a   :  { %v5637_v42 = vpop.permute.xlu0 %2578 }
 0x63b   :  { %v2581_v47 = vsel %vm476_vm0, %v2539_v43, %v5637_v42  ;;  %v4268_v43 = vld [vmem:[%s5742_s17] sm:$0xff]  }
 0x63c   :  { %v2582_v37 = vpack.c.bf16 %v2581_v47, %v2581_v47 }
 0x63e   :  { %3852 = vmatmul.mubr.msk.bf16.vlgmr.msra.gmra.mrb[32].mxu1 %vm2630_vm11, %v2582_v37 }
 0x63f   :  { %3881 = vmatprep.mubr.msk.bf16.mxu1 %vm4318_vm1, %v4317_v9  ;;  %3878 = vmatpush3.bf16.msra.mxu1 %v4261_v57 }
 0x640   :  { %3879 = vmatprep.subr.bf16.mxu1 %v4317_v9 }
 0x643   :  { %3880 = vmatpush3.bf16.msra.mxu1 %v4262_v5 }
 0x644   :  { %3885 = vmatprep.subr.bf16.mxu1 %v4317_v9 }
 0x646   :  { %3882 = vmatmul.mubr.msk.bf16.vlgmr.msra.gmra.mrb[36].mxu1 %vm476_vm0, %v2872_v7 }
 0x647   :  { %3889 = vmatprep.mubr.msk.bf16.mxu1 %vm4318_vm1, %v4317_v9  ;;  %3886 = vmatpush3.bf16.msra.mxu1 %v4268_v43 }
 0x648   :  { %3887 = vmatprep.subr.bf16.mxu1 %v4317_v9 }
 0x69e   :  { %v2750_v60 = vpop.permute.xlu1 %2749 }
 0x711   :  { %v2668_v41 = vpop.f32.mrb[32].mxu1 }
 0x712   :  { %v2669_v49 = vadd.f32 %v3307_v48, %v2668_v41  ;;  %v3853_v44 = vpop.f32.mrb[33].mxu1 }
 0x713   :  { %v2671_v50 = vpop.f32.mrb[34].mxu1 }
 0x714   :  { %v2741_v15 = vadd.f32 %v2736_v35, %v2669_v49  ;;  %v3854_v54 = vpop.f32.mrb[35].mxu1  ;;  %v3333_v50 = vld [vmem:[%s5743_s18] ss:$0 sm:$0xff] }
 0x716   :  { %v3318_v55 = vmul.f32 -1.442695, %v2741_v15 }
 0x718   :  { %4270 = vpow2.f32 %v3318_v55 }
 0x719   :  { %v2933_v46 = vpop.f32.mrb[36].mxu1 }
 0x71a   :  { %v2934_v8 = vadd.f32 %v3327_v17, %v2933_v46  ;;  %v3883_v18 = vpop.f32.mrb[37].mxu1 }
 0x71b   :  { %v2936_v12 = vpop.f32.mrb[38].mxu1 }
 0x71c   :  { %v3884_v52 = vpop.f32.mrb[39].mxu1 }
 0x722   :  { %v4271_v56 = vpop.eup %4270 }
 0x723   :  { %v2745_v58 = vadd.f32 1.0, %v4271_v56 }
 0x725   :  { %4272 = vrcp.f32 %v2745_v58 }
 0x72f   :  { %v4273_v61 = vpop.eup %4272 }
 0x730   :  { %v2752_v62 = vmul.f32 %v4273_v61, %v2750_v60 }
 0x732   :  { %2754 = vrot.lane.b32.xlu1 %v2752_v62, %s4321_s5 }
 0x7a4   :  { %v2755_v0 = vpop.permute.xlu1 %2754 }
 0x7a5   :  { %v2757_v1 = vadd.f32 %v2755_v0, %v2669_v49 }
 0x7a7   :  { %4274 = vtanh.f32 %v2757_v1 }
 0x7b1   :  { %v4275_v2 = vpop.eup %4274 }
 0x7b2   :  { %2760 = vrot.lane.b32.xlu0 %v4275_v2, %s4321_s5 }
 0x824   :  { %v2761_v3 = vpop.permute.xlu0 %2760 }
 0x825   :  { %v2763_v45 = vsub.f32 %v5594_v16, %v2761_v3 }
 0x827   :  { %2765 = vrot.lane.b32.xlu1 %v2763_v45, %s4320_s23 }
 0x899   :  { %v2766_v13 = vpop.permute.xlu1 %2765 }
 0x89a   :  { %v2768_v51 = vmul.f32 %v4273_v61, %v2766_v13 }
 0x89c   :  { %2770 = vrot.lane.b32.xlu0 %v2768_v51, %s4320_s23 }
 0x8a0   :  { %2947 = vrot.lane.b32.xlu0 %v2934_v8, %s4321_s5 }
 0x90e   :  { %v2771_v16 = vpop.permute.xlu0 %2770 }
 0x90f   :  { %v2773_v31 = vadd.f32 %v4275_v2, %v2771_v16 }
 0x911   :  { %2775 = vrot.lane.b32.xlu1 %v2773_v31, %s4321_s5 }
 0x912   :  { %v2948_v30 = vpop.permute.xlu0 %2947 }
 0x983   :  { %v2776_v19 = vpop.permute.xlu1 %2775 }
 0x984   :  { %2778 = vst.msk [vmem:[%s5745_s20] sm:$0xff] %vm476_vm0, %v2776_v19  ;;  %v2780_v20 = vsel %vm476_vm0, %v2776_v19, %v5637_v42  ;;  %v4269_v42 = vld [vmem:[%s5742_s17 + $0x8] sm:$0xff]  }
 0x985   :  { %v2781_v21 = vpack.c.bf16 %v2780_v20, %v2780_v20  ;;  %3888 = vmatpush3.bf16.msra.mxu1 %v4269_v42 }
 0x987   :  { %3874 = vmatmul.mubr.msk.bf16.vlgmr.msra.gmra.mrb[40].mxu0 %vm2630_vm11, %v2781_v21 }
 0xa5a   :  { %v2866_v23 = vpop.f32.mrb[40].mxu0 }
 0xa5b   :  { %v2867_v24 = vadd.f32 %v3320_v22, %v2866_v23  ;;  %v3875_v53 = vpop.f32.mrb[41].mxu0 }
 0xa5c   :  { %v2869_v25 = vpop.f32.mrb[42].mxu0 }
 0xa5d   :  { %v2939_v26 = vadd.f32 %v2934_v8, %v2867_v24  ;;  %v3876_v59 = vpop.f32.mrb[43].mxu0 }
 0xa5f   :  { %v3331_v27 = vmul.f32 -1.442695, %v2939_v26 }
 0xa61   :  { %4276 = vpow2.f32 %v3331_v27 }
 0xa6b   :  { %v4277_v28 = vpop.eup %4276 }
 0xa6c   :  { %v2943_v29 = vadd.f32 1.0, %v4277_v28 }
 0xa6e   :  { %4278 = vrcp.f32 %v2943_v29 }
 0xa78   :  { %v4279_v32 = vpop.eup %4278 }
 0xa79   :  { %v2950_v33 = vmul.f32 %v4279_v32, %v2948_v30 }
 0xa7b   :  { %2952 = vrot.lane.b32.xlu1 %v2950_v33, %s4321_s5 }
 0xaed   :  { %v2953_v34 = vpop.permute.xlu1 %2952 }
 0xaee   :  { %v2955_v35 = vadd.f32 %v2953_v34, %v2867_v24 }
 0xaf0   :  { %4280 = vtanh.f32 %v2955_v35 }
 0xafa   :  { %v4281_v36 = vpop.eup %4280 }
 0xafb   :  { %2958 = vrot.lane.b32.xlu0 %v4281_v36, %s4321_s5 }
 0xb6d   :  { %v2959_v38 = vpop.permute.xlu0 %2958 }
 0xb6e   :  { %v2961_v39 = vsub.f32 %v3319_v6, %v2959_v38 }
 0xb70   :  { %2963 = vrot.lane.b32.xlu1 %v2961_v39, %s4320_s23 }
 0xbe2   :  { %v2964_v47 = vpop.permute.xlu1 %2963 }
 0xbe3   :  { %v2966_v37 = vmul.f32 %v4279_v32, %v2964_v47 }
 0xbe5   :  { %2968 = vrot.lane.b32.xlu0 %v2966_v37, %s4320_s23 }
 0xc57   :  { %v2969_v48 = vpop.permute.xlu0 %2968 }
 0xc58   :  { %v2971_v41 = vadd.f32 %v4281_v36, %v2969_v48 }
 0xc5a   :  { %v2978_v49 = vpack.c.bf16 %v2971_v41, %v2971_v41 }
 0xc5c   :  { %2991 = vrot.lane.b32.xlu1 %v2978_v49, %s4321_s5 }
 0xcce   :  { %v2992_v44 = vpop.permute.xlu1 %2991 }
 0xccf   :  { %3890 = vmatmul.mubr.msk.bf16.vlgmr.msra.gmra.mrb[40].mxu1 %vm476_vm0, %v2992_v44 }
 0xda2   :  { %v3042_v15 = vpop.f32.mrb[40].mxu1 }
 0xda3   :  { %v3043_v9 = vadd.f32 %v3333_v50, %v3042_v15  ;;  %v3891_v54 = vpop.f32.mrb[41].mxu1 }
 0xda4   :  { %v3045_v55 = vpop.f32.mrb[42].mxu1 }
 0xda5   :  { %v3892_v56 = vpop.f32.mrb[43].mxu1  ;;  %v3049_v58 = vsel %vm3048_vm12, %v3043_v9, -1e+30 }
 0xda6   :  { %3050 = vmax.xlane.f32.xlu0 %v3049_v58 }
 0xdbc   :  { %2973 = vrot.lane.b32.xlu0 %v2971_v41, %s4321_s5 }
 0xe33   :  { %v3051_v60 = vpop.xlane.xlu0 %3050 }
 0xe34   :  { %v3052_v61 = vsub.f32 %v3049_v58, %v3051_v60 }
 0xe36   :  { %v3053_v62 = vmul.f32 1.442695, %v3052_v61 }
 0xe37   :  { %v2974_v0 = vpop.permute.xlu0 %2973 }
 0xe38   :  { %4282 = vpow2.f32 %v3053_v62  ;;  %3332 = vst.msk [vmem:[%s5745_s20 + $0x8] sm:$0xff] %vm476_vm0, %v2974_v0 }
 0xe42   :  { %v4283_v1 = vpop.eup %4282 }
 0xe43   :  { %3055 = vadd.xlane.f32.xlu1 %v4283_v1 }
 0xed0   :  { %v3056_v40 = vpop.xlane.xlu1 %3055 }
 0xed1   :  { %4284 = vlog2.f32 %v3056_v40 }
 0xedb   :  { %v4285_v2 = vpop.eup %4284 }
 0xedc   :  { %v3058_v3 = vmul.f32 0.6931472, %v4285_v2 }
 0xede   :  { %v3059_v45 = vsub.f32 %v3052_v61, %v3058_v3 }
 0xee0   :  { %3060 = vst [vmem:[%s5744_s19] sm:$0xff] %v3059_v45 }
 0xee1   :  { %3073 = vsyncmov [#allocation3] }
 0xee4   :  { %s3074_s5 = vpop.sfrf %3073 }
 0xee5   :  { %p3337_p5 = scmp.ne.s32.totalorder %s3074_s5, 0 }
 0xee7   :  { %3078 = shalt.err (%p3337_p5)  }
 0xee8   :  { %3080 = vsyncmov [#allocation3 + $0x1] }
 0xeeb   :  { %s3081_s2 = vpop.sfrf %3080 }
 0xeec   :  { %p3338_p6 = scmp.ne.s32.totalorder %s3081_s2, 0 }
 0xeee   :  { %3085 = shalt.err (%p3338_p6)  }
 0xeef   :  { %3087 = vsyncmov [#allocation3 + $0x2] }
 0xef2   :  { %s3088_s20 = vpop.sfrf %3087 }
 0xef3   :  { %p3339_p7 = scmp.ne.s32.totalorder %s3088_s20, 0 }
 0xef5   :  { %3092 = shalt.err (%p3339_p7)  }
 0xef6   :  { %3094 = vsyncmov [#allocation3 + $0x3] }
 0xef9   :  { %s3095_s25 = vpop.sfrf %3094 }
 0xefa   :  { %p3340_p8 = scmp.ne.s32.totalorder %s3095_s25, 0 }
 0xefc   :  { %3099 = shalt.err (%p3340_p8)  }
 0xefd   :  { %3101 = vsyncmov [#allocation3 + $0x4] }
 0xf00   :  { %s3102_s7 = vpop.sfrf %3101 }
 0xf01   :  { %p3341_p9 = scmp.ne.s32.totalorder %s3102_s7, 0 }
 0xf03   :  { %3106 = shalt.err (%p3341_p9)  }
 0xf04   :  { %3108 = vsyncmov [#allocation3 + $0x5] }
 0xf07   :  { %s3109_s19 = vpop.sfrf %3108 }
 0xf08   :  { %p3342_p10 = scmp.ne.s32.totalorder %s3109_s19, 0 }
 0xf0a   :  { %3113 = shalt.err (%p3342_p10)  }
 0xf0b   :  { %3115 = vsyncmov [#allocation3 + $0x6] }
 0xf0e   :  { %s3116_s8 = vpop.sfrf %3115 }
 0xf0f   :  { %p3343_p11 = scmp.ne.s32.totalorder %s3116_s8, 0 }
 0xf11   :  { %3120 = shalt.err (%p3343_p11)  }
 0xf12   :  { %3122 = vsyncmov [#allocation3 + $0x7] }
 0xf15   :  { %s3123_s26 = vpop.sfrf %3122 }
 0xf16   :  { %p3344_p12 = scmp.ne.s32.totalorder %s3123_s26, 0 }
 0xf18   :  { %3127 = shalt.err (%p3344_p12)  }

</bundles_post_ra>
